<compile_context>
chip_gen: v7x
topology: tpu7x:2x2x1
jax: 0.10.0
libtpu: 0.0.40
codegen_flags: <defaults>
</compile_context>

<pallas_src>
import functools

import jax
import jax.numpy as jnp
from jax.experimental import pallas as pl
from jax.experimental.pallas import tpu as pltpu


# --------------------------------------------------------------------------
# Fused forward kernel.
#   refs = [patches_tm,
#           (Wih_f, bih_f, Whh_f, bhh_f, Wih_b, bih_b, Whh_b, bhh_b) * num_layers,
#           head_w, head_b,
#           out]
#   patches_tm : (T*N, P) time-major flattened patches (rows t*N..t*N+N-1 = time t)
#   Wih        : (Din, 3H)  gate columns ordered [r | z | n]
#   Whh        : (H,   3H)
#   biases     : (1, 3H)
#   head_w     : (2H, P), head_b : (1, P)
#   out        : (1, 1) scalar loss in SMEM
# --------------------------------------------------------------------------
def _fused_forward_kernel(*refs, T, N, P, H, lo, hi):
    patches_ref = refs[0]
    out_ref = refs[-1]
    param_refs = refs[1:-1]
    head_w_ref, head_b_ref = param_refs[-2], param_refs[-1]
    layer_refs = param_refs[:-2]
    num_layers = len(layer_refs) // 8

    patches = patches_ref[...]                      # (T*N, P)

    # masked_fill(mask, 0): zero the rows of patches lo..hi-1 (static bounds).
    if hi > lo:
        x = jnp.concatenate(
            [patches[: lo * N],
             jnp.zeros(((hi - lo) * N, P), jnp.float32),
             patches[hi * N:]],
            axis=0)
    else:
        x = patches

    layer_in = x                                    # (T*N, Din)
    for l in range(num_layers):
        (wih_f_ref, bih_f_ref, whh_f_ref, bhh_f_ref,
         wih_b_ref, bih_b_ref, whh_b_ref, bhh_b_ref) = layer_refs[8 * l: 8 * (l + 1)]

        # Hoisted input-gate matmuls: all timesteps at once, per direction.
        ig_f = (jnp.dot(layer_in, wih_f_ref[...],
                        preferred_element_type=jnp.float32) + bih_f_ref[...])
        ig_b = (jnp.dot(layer_in, wih_b_ref[...],
                        preferred_element_type=jnp.float32) + bih_b_ref[...])

        whh_f = whh_f_ref[...]
        bhh_f = bhh_f_ref[...]
        whh_b = whh_b_ref[...]
        bhh_b = bhh_b_ref[...]

        h_f = jnp.zeros((N, H), jnp.float32)
        h_b = jnp.zeros((N, H), jnp.float32)
        fwd_out = [None] * T
        bwd_out = [None] * T

        # Fully-unrolled time recurrence: fwd and bwd run in the same body.
        for s in range(T):
            tf = s
            tb = T - 1 - s
            i_f = ig_f[tf * N:(tf + 1) * N, :]          # (N, 3H)
            i_b = ig_b[tb * N:(tb + 1) * N, :]          # (N, 3H)

            hg_f = jnp.dot(h_f, whh_f, preferred_element_type=jnp.float32) + bhh_f
            hg_b = jnp.dot(h_b, whh_b, preferred_element_type=jnp.float32) + bhh_b

            r_f = jax.nn.sigmoid(i_f[:, 0:H] + hg_f[:, 0:H])
            z_f = jax.nn.sigmoid(i_f[:, H:2 * H] + hg_f[:, H:2 * H])
            n_f = jnp.tanh(i_f[:, 2 * H:3 * H] + r_f * hg_f[:, 2 * H:3 * H])
            h_f = (1.0 - z_f) * n_f + z_f * h_f

            r_b = jax.nn.sigmoid(i_b[:, 0:H] + hg_b[:, 0:H])
            z_b = jax.nn.sigmoid(i_b[:, H:2 * H] + hg_b[:, H:2 * H])
            n_b = jnp.tanh(i_b[:, 2 * H:3 * H] + r_b * hg_b[:, 2 * H:3 * H])
            h_b = (1.0 - z_b) * n_b + z_b * h_b

            fwd_out[tf] = h_f
            bwd_out[tb] = h_b

        # Bidirectional output, time-major flat: (T*N, 2H)
        layer_in = jnp.concatenate(
            [jnp.concatenate([fwd_out[t], bwd_out[t]], axis=1) for t in range(T)],
            axis=0)
        # TODO(synk): nn.GRU inter-layer dropout (p=0.1, training mode only) omitted.

    # head linear + masked MSE mean (mean over ALL N*T*P elements)
    recons = (jnp.dot(layer_in, head_w_ref[...],
                      preferred_element_type=jnp.float32) + head_b_ref[...])   # (T*N, P)
    if hi > lo:
        d = recons[lo * N:hi * N, :] - patches[lo * N:hi * N, :]
        loss = jnp.sum(d * d) / float(T * N * P)
    else:
        loss = jnp.float32(0.0)
    out_ref[0, 0] = loss


# --------------------------------------------------------------------------
# Weight fusion helpers (plain JAX, tiny, done once per call).
# --------------------------------------------------------------------------
def _fuse_direction_params(wih, whh, bih, bhh):
    # (3, Din, H) -> (Din, 3H); (3, H, H) -> (H, 3H); (3, H) -> (3H,)
    W_ih = jnp.concatenate([wih[0], wih[1], wih[2]], axis=1)
    W_hh = jnp.concatenate([whh[0], whh[1], whh[2]], axis=1)
    b_ih = jnp.concatenate([bih[0], bih[1], bih[2]], axis=0)
    b_hh = jnp.concatenate([bhh[0], bhh[1], bhh[2]], axis=0)
    return W_ih, b_ih, W_hh, b_hh


# --------------------------------------------------------------------------
# Parameter init (deterministic, PyTorch-style uniform bounds).
# --------------------------------------------------------------------------
def init_params(key, patch_size, expansion_ratio, num_layers):
    H = patch_size * expansion_ratio
    params = {}
    n_keys = 4 + num_layers * 2 * 4
    keys = iter(jax.random.split(key, n_keys))

    def u(shape, bound):
        return jax.random.uniform(next(keys), shape, jnp.float32, -bound, bound)

    bp = patch_size ** -0.5
    bh = H ** -0.5
    params["proj_w"] = u((patch_size, patch_size), bp)          # (in, out)
    params["proj_b"] = u((patch_size,), bp)
    params["head_w"] = u((2 * H, patch_size), (2 * H) ** -0.5)  # (in, out)
    params["head_b"] = u((patch_size,), (2 * H) ** -0.5)
    for l in range(num_layers):
        din = patch_size if l == 0 else 2 * H
        for d in ("fwd", "bwd"):
            wih = u((3, din, H), bh)
            whh = u((3, H, H), bh)
            bih = u((3, H), bh)
            bhh = u((3, H), bh)
            params[f"gru_{l}_{d}"] = (wih, whh, bih, bhh)
    return params


# --------------------------------------------------------------------------
# Forward pass (matches PatchDetectorGruCenter.forward semantics).
# --------------------------------------------------------------------------
def patch_detector_gru_center_forward(x, params, *, patch_size, expansion_ratio,
                                      num_layers, mask_ratio):
    B, S, C = x.shape
    P = patch_size
    H = P * expansion_ratio
    N = B * C
    T = S // P

    mask_centre = T // 2
    mask_patch_num = int(T * mask_ratio)
    lo = mask_centre - mask_patch_num // 2
    hi = mask_centre + mask_patch_num // 2

    # (B, S, C) -> (B, C, S) -> (N, T, P) -> time-major flat (T*N, P)
    patches_tm = (jnp.transpose(x, (0, 2, 1)).reshape(N, T, P)
                  .transpose(1, 0, 2).reshape(T * N, P))

    # Fuse gate weights; fold the proj Linear into layer-0 input weights:
    #   (x@Wp+bp)@Wih + bih  ==  x @ (Wp@Wih) + (bp@Wih + bih)
    flat = []
    for l in range(num_layers):
        for d in ("fwd", "bwd"):
            W_ih, b_ih, W_hh, b_hh = _fuse_direction_params(*params[f"gru_{l}_{d}"])
            if l == 0:
                b_ih = params["proj_b"] @ W_ih + b_ih
                W_ih = params["proj_w"] @ W_ih
            flat += [W_ih, b_ih[None, :], W_hh, b_hh[None, :]]
    head_w = params["head_w"]
    head_b = params["head_b"][None, :]

    n_in = 1 + len(flat) + 2
    kernel = functools.partial(_fused_forward_kernel,
                               T=T, N=N, P=P, H=H, lo=lo, hi=hi)
    out = pl.pallas_call(
        kernel,
        out_shape=jax.ShapeDtypeStruct((1, 1), jnp.float32),
        in_specs=[pl.BlockSpec(memory_space=pltpu.MemorySpace.VMEM)] * n_in,
        out_specs=pl.BlockSpec(memory_space=pltpu.MemorySpace.SMEM),
    )(patches_tm, *flat, head_w, head_b)
    return out[0, 0]


if __name__ == "__main__":
    batch, num_channels = 2, 4
    patch_size = 16
    expansion_ratio = 2
    num_layers = 2
    mask_ratio = 0.2
    patch_num = 10
    seq_len = patch_num * patch_size            # 160

    key = jax.random.PRNGKey(0)
    k_x, k_p = jax.random.split(key)
    x = jax.random.normal(k_x, (batch, seq_len, num_channels), jnp.float32)
    params = init_params(k_p, patch_size, expansion_ratio, num_layers)

    loss = patch_detector_gru_center_forward(
        x, params,
        patch_size=patch_size,
        expansion_ratio=expansion_ratio,
        num_layers=num_layers,
        mask_ratio=mask_ratio,
    )
    loss = jax.block_until_ready(loss)
    assert loss.shape == () and jnp.isfinite(loss)
    print("KERNEL_OK")
</pallas_src>

<mosaic_0001>
module attributes {stable_mosaic.version = 11 : i64} {
  func.func @_fused_forward_kernel(%arg0: memref<80x16xf32, #tpu.memory_space<vmem>>, %arg1: memref<16x96xf32, #tpu.memory_space<vmem>>, %arg2: memref<1x96xf32, #tpu.memory_space<vmem>>, %arg3: memref<32x96xf32, #tpu.memory_space<vmem>>, %arg4: memref<1x96xf32, #tpu.memory_space<vmem>>, %arg5: memref<16x96xf32, #tpu.memory_space<vmem>>, %arg6: memref<1x96xf32, #tpu.memory_space<vmem>>, %arg7: memref<32x96xf32, #tpu.memory_space<vmem>>, %arg8: memref<1x96xf32, #tpu.memory_space<vmem>>, %arg9: memref<64x96xf32, #tpu.memory_space<vmem>>, %arg10: memref<1x96xf32, #tpu.memory_space<vmem>>, %arg11: memref<32x96xf32, #tpu.memory_space<vmem>>, %arg12: memref<1x96xf32, #tpu.memory_space<vmem>>, %arg13: memref<64x96xf32, #tpu.memory_space<vmem>>, %arg14: memref<1x96xf32, #tpu.memory_space<vmem>>, %arg15: memref<32x96xf32, #tpu.memory_space<vmem>>, %arg16: memref<1x96xf32, #tpu.memory_space<vmem>>, %arg17: memref<64x16xf32, #tpu.memory_space<vmem>>, %arg18: memref<1x16xf32, #tpu.memory_space<vmem>>, %arg19: memref<1x1xf32, #tpu.memory_space<smem>>) attributes {dimension_semantics = [], scalar_prefetch = 0 : i64, scratch_operands = 0 : i64, tpu.core_type = #tpu.core_type<tc>} {
    %c0 = arith.constant 0 : index
    %c0_0 = arith.constant 0 : index
    %0 = vector.load %arg0[%c0, %c0_0] : memref<80x16xf32, #tpu.memory_space<vmem>>, vector<80x16xf32>
    %1 = vector.extract_strided_slice %0 {offsets = [0, 0], sizes = [32, 16], strides = [1, 1]} : vector<80x16xf32> to vector<32x16xf32>
    %cst = arith.constant 0.000000e+00 : f32
    %2 = vector.broadcast %cst : f32 to vector<16x16xf32>
    %3 = vector.extract_strided_slice %0 {offsets = [48, 0], sizes = [32, 16], strides = [1, 1]} : vector<80x16xf32> to vector<32x16xf32>
    %4 = tpu.concatenate %1, %2, %3 in 0 : vector<32x16xf32>, vector<16x16xf32>, vector<32x16xf32> -> vector<80x16xf32>
    %c0_1 = arith.constant 0 : index
    %c0_2 = arith.constant 0 : index
    %5 = vector.load %arg1[%c0_1, %c0_2] : memref<16x96xf32, #tpu.memory_space<vmem>>, vector<16x96xf32>
    %cst_3 = arith.constant dense<0.000000e+00> : vector<80x96xf32>
    %6 = tpu.matmul %4, %5, %cst_3 {dimension_numbers = #tpu.dot_dimension_numbers<[1], [0], [0], [1], [0, 0, 1, 1], [], []>} : vector<80x16xf32>, vector<16x96xf32>, vector<80x96xf32> -> vector<80x96xf32>
    %c0_4 = arith.constant 0 : index
    %c0_5 = arith.constant 0 : index
    %7 = vector.load %arg2[%c0_4, %c0_5] : memref<1x96xf32, #tpu.memory_space<vmem>>, vector<1x96xf32>
    %8 = vector.broadcast %7 : vector<1x96xf32> to vector<80x96xf32>
    %9 = arith.addf %6, %8 : vector<80x96xf32>
    %c0_6 = arith.constant 0 : index
    %c0_7 = arith.constant 0 : index
    %10 = vector.load %arg5[%c0_6, %c0_7] : memref<16x96xf32, #tpu.memory_space<vmem>>, vector<16x96xf32>
    %cst_8 = arith.constant dense<0.000000e+00> : vector<80x96xf32>
    %11 = tpu.matmul %4, %10, %cst_8 {dimension_numbers = #tpu.dot_dimension_numbers<[1], [0], [0], [1], [0, 0, 1, 1], [], []>} : vector<80x16xf32>, vector<16x96xf32>, vector<80x96xf32> -> vector<80x96xf32>
    %c0_9 = arith.constant 0 : index
    %c0_10 = arith.constant 0 : index
    %12 = vector.load %arg6[%c0_9, %c0_10] : memref<1x96xf32, #tpu.memory_space<vmem>>, vector<1x96xf32>
    %13 = vector.broadcast %12 : vector<1x96xf32> to vector<80x96xf32>
    %14 = arith.addf %11, %13 : vector<80x96xf32>
    %c0_11 = arith.constant 0 : index
    %c0_12 = arith.constant 0 : index
    %15 = vector.load %arg3[%c0_11, %c0_12] : memref<32x96xf32, #tpu.memory_space<vmem>>, vector<32x96xf32>
    %c0_13 = arith.constant 0 : index
    %c0_14 = arith.constant 0 : index
    %16 = vector.load %arg4[%c0_13, %c0_14] : memref<1x96xf32, #tpu.memory_space<vmem>>, vector<1x96xf32>
    %c0_15 = arith.constant 0 : index
    %c0_16 = arith.constant 0 : index
    %17 = vector.load %arg7[%c0_15, %c0_16] : memref<32x96xf32, #tpu.memory_space<vmem>>, vector<32x96xf32>
    %c0_17 = arith.constant 0 : index
    %c0_18 = arith.constant 0 : index
    %18 = vector.load %arg8[%c0_17, %c0_18] : memref<1x96xf32, #tpu.memory_space<vmem>>, vector<1x96xf32>
    %cst_19 = arith.constant 0.000000e+00 : f32
    %19 = vector.broadcast %cst_19 : f32 to vector<8x32xf32>
    %cst_20 = arith.constant 0.000000e+00 : f32
    %20 = vector.broadcast %cst_20 : f32 to vector<8x32xf32>
    %21 = vector.extract_strided_slice %9 {offsets = [0, 0], sizes = [8, 96], strides = [1, 1]} : vector<80x96xf32> to vector<8x96xf32>
    %22 = vector.extract_strided_slice %14 {offsets = [72, 0], sizes = [8, 96], strides = [1, 1]} : vector<80x96xf32> to vector<8x96xf32>
    %cst_21 = arith.constant dense<0.000000e+00> : vector<8x96xf32>
    %23 = tpu.matmul %19, %15, %cst_21 {dimension_numbers = #tpu.dot_dimension_numbers<[1], [0], [0], [1], [0, 0, 1, 1], [], []>} : vector<8x32xf32>, vector<32x96xf32>, vector<8x96xf32> -> vector<8x96xf32>
    %24 = vector.broadcast %16 : vector<1x96xf32> to vector<8x96xf32>
    %25 = arith.addf %23, %24 : vector<8x96xf32>
    %cst_22 = arith.constant dense<0.000000e+00> : vector<8x96xf32>
    %26 = tpu.matmul %20, %17, %cst_22 {dimension_numbers = #tpu.dot_dimension_numbers<[1], [0], [0], [1], [0, 0, 1, 1], [], []>} : vector<8x32xf32>, vector<32x96xf32>, vector<8x96xf32> -> vector<8x96xf32>
    %27 = vector.broadcast %18 : vector<1x96xf32> to vector<8x96xf32>
    %28 = arith.addf %26, %27 : vector<8x96xf32>
    %29 = vector.extract_strided_slice %21 {offsets = [0, 0], sizes = [8, 32], strides = [1, 1]} : vector<8x96xf32> to vector<8x32xf32>
    %30 = vector.extract_strided_slice %25 {offsets = [0, 0], sizes = [8, 32], strides = [1, 1]} : vector<8x96xf32> to vector<8x32xf32>
    %31 = arith.addf %29, %30 : vector<8x32xf32>
    %32 = arith.negf %31 : vector<8x32xf32>
    %33 = math.exp %32 : vector<8x32xf32>
    %cst_23 = arith.constant 1.000000e+00 : f32
    %34 = vector.broadcast %cst_23 : f32 to vector<8x32xf32>
    %35 = arith.addf %34, %33 : vector<8x32xf32>
    %36 = arith.divf %34, %35 : vector<8x32xf32>
    %37 = vector.extract_strided_slice %21 {offsets = [0, 32], sizes = [8, 32], strides = [1, 1]} : vector<8x96xf32> to vector<8x32xf32>
    %38 = vector.extract_strided_slice %25 {offsets = [0, 32], sizes = [8, 32], strides = [1, 1]} : vector<8x96xf32> to vector<8x32xf32>
    %39 = arith.addf %37, %38 : vector<8x32xf32>
    %40 = arith.negf %39 : vector<8x32xf32>
    %41 = math.exp %40 : vector<8x32xf32>
    %cst_24 = arith.constant 1.000000e+00 : f32
    %42 = vector.broadcast %cst_24 : f32 to vector<8x32xf32>
    %43 = arith.addf %42, %41 : vector<8x32xf32>
    %44 = arith.divf %42, %43 : vector<8x32xf32>
    %45 = vector.extract_strided_slice %21 {offsets = [0, 64], sizes = [8, 32], strides = [1, 1]} : vector<8x96xf32> to vector<8x32xf32>
    %46 = vector.extract_strided_slice %25 {offsets = [0, 64], sizes = [8, 32], strides = [1, 1]} : vector<8x96xf32> to vector<8x32xf32>
    %47 = arith.mulf %36, %46 : vector<8x32xf32>
    %48 = arith.addf %45, %47 : vector<8x32xf32>
    %49 = math.tanh %48 : vector<8x32xf32>
    %cst_25 = arith.constant 1.000000e+00 : f32
    %50 = vector.broadcast %cst_25 : f32 to vector<8x32xf32>
    %51 = arith.subf %50, %44 : vector<8x32xf32>
    %52 = arith.mulf %51, %49 : vector<8x32xf32>
    %53 = arith.mulf %44, %19 : vector<8x32xf32>
    %54 = arith.addf %52, %53 : vector<8x32xf32>
    %55 = vector.extract_strided_slice %22 {offsets = [0, 0], sizes = [8, 32], strides = [1, 1]} : vector<8x96xf32> to vector<8x32xf32>
    %56 = vector.extract_strided_slice %28 {offsets = [0, 0], sizes = [8, 32], strides = [1, 1]} : vector<8x96xf32> to vector<8x32xf32>
    %57 = arith.addf %55, %56 : vector<8x32xf32>
    %58 = arith.negf %57 : vector<8x32xf32>
    %59 = math.exp %58 : vector<8x32xf32>
    %cst_26 = arith.constant 1.000000e+00 : f32
    %60 = vector.broadcast %cst_26 : f32 to vector<8x32xf32>
    %61 = arith.addf %60, %59 : vector<8x32xf32>
    %62 = arith.divf %60, %61 : vector<8x32xf32>
    %63 = vector.extract_strided_slice %22 {offsets = [0, 32], sizes = [8, 32], strides = [1, 1]} : vector<8x96xf32> to vector<8x32xf32>
    %64 = vector.extract_strided_slice %28 {offsets = [0, 32], sizes = [8, 32], strides = [1, 1]} : vector<8x96xf32> to vector<8x32xf32>
    %65 = arith.addf %63, %64 : vector<8x32xf32>
    %66 = arith.negf %65 : vector<8x32xf32>
    %67 = math.exp %66 : vector<8x32xf32>
    %cst_27 = arith.constant 1.000000e+00 : f32
    %68 = vector.broadcast %cst_27 : f32 to vector<8x32xf32>
    %69 = arith.addf %68, %67 : vector<8x32xf32>
    %70 = arith.divf %68, %69 : vector<8x32xf32>
    %71 = vector.extract_strided_slice %22 {offsets = [0, 64], sizes = [8, 32], strides = [1, 1]} : vector<8x96xf32> to vector<8x32xf32>
    %72 = vector.extract_strided_slice %28 {offsets = [0, 64], sizes = [8, 32], strides = [1, 1]} : vector<8x96xf32> to vector<8x32xf32>
    %73 = arith.mulf %62, %72 : vector<8x32xf32>
    %74 = arith.addf %71, %73 : vector<8x32xf32>
    %75 = math.tanh %74 : vector<8x32xf32>
    %cst_28 = arith.constant 1.000000e+00 : f32
    %76 = vector.broadcast %cst_28 : f32 to vector<8x32xf32>
    %77 = arith.subf %76, %70 : vector<8x32xf32>
    %78 = arith.mulf %77, %75 : vector<8x32xf32>
    %79 = arith.mulf %70, %20 : vector<8x32xf32>
    %80 = arith.addf %78, %79 : vector<8x32xf32>
    %81 = vector.extract_strided_slice %9 {offsets = [8, 0], sizes = [8, 96], strides = [1, 1]} : vector<80x96xf32> to vector<8x96xf32>
    %82 = vector.extract_strided_slice %14 {offsets = [64, 0], sizes = [8, 96], strides = [1, 1]} : vector<80x96xf32> to vector<8x96xf32>
    %cst_29 = arith.constant dense<0.000000e+00> : vector<8x96xf32>
    %83 = tpu.matmul %54, %15, %cst_29 {dimension_numbers = #tpu.dot_dimension_numbers<[1], [0], [0], [1], [0, 0, 1, 1], [], []>} : vector<8x32xf32>, vector<32x96xf32>, vector<8x96xf32> -> vector<8x96xf32>
    %84 = vector.broadcast %16 : vector<1x96xf32> to vector<8x96xf32>
    %85 = arith.addf %83, %84 : vector<8x96xf32>
    %cst_30 = arith.constant dense<0.000000e+00> : vector<8x96xf32>
    %86 = tpu.matmul %80, %17, %cst_30 {dimension_numbers = #tpu.dot_dimension_numbers<[1], [0], [0], [1], [0, 0, 1, 1], [], []>} : vector<8x32xf32>, vector<32x96xf32>, vector<8x96xf32> -> vector<8x96xf32>
    %87 = vector.broadcast %18 : vector<1x96xf32> to vector<8x96xf32>
    %88 = arith.addf %86, %87 : vector<8x96xf32>
    %89 = vector.extract_strided_slice %81 {offsets = [0, 0], sizes = [8, 32], strides = [1, 1]} : vector<8x96xf32> to vector<8x32xf32>
    %90 = vector.extract_strided_slice %85 {offsets = [0, 0], sizes = [8, 32], strides = [1, 1]} : vector<8x96xf32> to vector<8x32xf32>
    %91 = arith.addf %89, %90 : vector<8x32xf32>
    %92 = arith.negf %91 : vector<8x32xf32>
    %93 = math.exp %92 : vector<8x32xf32>
    %cst_31 = arith.constant 1.000000e+00 : f32
    %94 = vector.broadcast %cst_31 : f32 to vector<8x32xf32>
    %95 = arith.addf %94, %93 : vector<8x32xf32>
    %96 = arith.divf %94, %95 : vector<8x32xf32>
    %97 = vector.extract_strided_slice %81 {offsets = [0, 32], sizes = [8, 32], strides = [1, 1]} : vector<8x96xf32> to vector<8x32xf32>
    %98 = vector.extract_strided_slice %85 {offsets = [0, 32], sizes = [8, 32], strides = [1, 1]} : vector<8x96xf32> to vector<8x32xf32>
    %99 = arith.addf %97, %98 : vector<8x32xf32>
    %100 = arith.negf %99 : vector<8x32xf32>
    %101 = math.exp %100 : vector<8x32xf32>
    %cst_32 = arith.constant 1.000000e+00 : f32
    %102 = vector.broadcast %cst_32 : f32 to vector<8x32xf32>
    %103 = arith.addf %102, %101 : vector<8x32xf32>
    %104 = arith.divf %102, %103 : vector<8x32xf32>
    %105 = vector.extract_strided_slice %81 {offsets = [0, 64], sizes = [8, 32], strides = [1, 1]} : vector<8x96xf32> to vector<8x32xf32>
    %106 = vector.extract_strided_slice %85 {offsets = [0, 64], sizes = [8, 32], strides = [1, 1]} : vector<8x96xf32> to vector<8x32xf32>
    %107 = arith.mulf %96, %106 : vector<8x32xf32>
    %108 = arith.addf %105, %107 : vector<8x32xf32>
    %109 = math.tanh %108 : vector<8x32xf32>
    %cst_33 = arith.constant 1.000000e+00 : f32
    %110 = vector.broadcast %cst_33 : f32 to vector<8x32xf32>
    %111 = arith.subf %110, %104 : vector<8x32xf32>
    %112 = arith.mulf %111, %109 : vector<8x32xf32>
    %113 = arith.mulf %104, %54 : vector<8x32xf32>
    %114 = arith.addf %112, %113 : vector<8x32xf32>
    %115 = vector.extract_strided_slice %82 {offsets = [0, 0], sizes = [8, 32], strides = [1, 1]} : vector<8x96xf32> to vector<8x32xf32>
    %116 = vector.extract_strided_slice %88 {offsets = [0, 0], sizes = [8, 32], strides = [1, 1]} : vector<8x96xf32> to vector<8x32xf32>
    %117 = arith.addf %115, %116 : vector<8x32xf32>
    %118 = arith.negf %117 : vector<8x32xf32>
    %119 = math.exp %118 : vector<8x32xf32>
    %cst_34 = arith.constant 1.000000e+00 : f32
    %120 = vector.broadcast %cst_34 : f32 to vector<8x32xf32>
    %121 = arith.addf %120, %119 : vector<8x32xf32>
    %122 = arith.divf %120, %121 : vector<8x32xf32>
    %123 = vector.extract_strided_slice %82 {offsets = [0, 32], sizes = [8, 32], strides = [1, 1]} : vector<8x96xf32> to vector<8x32xf32>
    %124 = vector.extract_strided_slice %88 {offsets = [0, 32], sizes = [8, 32], strides = [1, 1]} : vector<8x96xf32> to vector<8x32xf32>
    %125 = arith.addf %123, %124 : vector<8x32xf32>
    %126 = arith.negf %125 : vector<8x32xf32>
    %127 = math.exp %126 : vector<8x32xf32>
    %cst_35 = arith.constant 1.000000e+00 : f32
    %128 = vector.broadcast %cst_35 : f32 to vector<8x32xf32>
    %129 = arith.addf %128, %127 : vector<8x32xf32>
    %130 = arith.divf %128, %129 : vector<8x32xf32>
    %131 = vector.extract_strided_slice %82 {offsets = [0, 64], sizes = [8, 32], strides = [1, 1]} : vector<8x96xf32> to vector<8x32xf32>
    %132 = vector.extract_strided_slice %88 {offsets = [0, 64], sizes = [8, 32], strides = [1, 1]} : vector<8x96xf32> to vector<8x32xf32>
    %133 = arith.mulf %122, %132 : vector<8x32xf32>
    %134 = arith.addf %131, %133 : vector<8x32xf32>
    %135 = math.tanh %134 : vector<8x32xf32>
    %cst_36 = arith.constant 1.000000e+00 : f32
    %136 = vector.broadcast %cst_36 : f32 to vector<8x32xf32>
    %137 = arith.subf %136, %130 : vector<8x32xf32>
    %138 = arith.mulf %137, %135 : vector<8x32xf32>
    %139 = arith.mulf %130, %80 : vector<8x32xf32>
    %140 = arith.addf %138, %139 : vector<8x32xf32>
    %141 = vector.extract_strided_slice %9 {offsets = [16, 0], sizes = [8, 96], strides = [1, 1]} : vector<80x96xf32> to vector<8x96xf32>
    %142 = vector.extract_strided_slice %14 {offsets = [56, 0], sizes = [8, 96], strides = [1, 1]} : vector<80x96xf32> to vector<8x96xf32>
    %cst_37 = arith.constant dense<0.000000e+00> : vector<8x96xf32>
    %143 = tpu.matmul %114, %15, %cst_37 {dimension_numbers = #tpu.dot_dimension_numbers<[1], [0], [0], [1], [0, 0, 1, 1], [], []>} : vector<8x32xf32>, vector<32x96xf32>, vector<8x96xf32> -> vector<8x96xf32>
    %144 = vector.broadcast %16 : vector<1x96xf32> to vector<8x96xf32>
    %145 = arith.addf %143, %144 : vector<8x96xf32>
    %cst_38 = arith.constant dense<0.000000e+00> : vector<8x96xf32>
    %146 = tpu.matmul %140, %17, %cst_38 {dimension_numbers = #tpu.dot_dimension_numbers<[1], [0], [0], [1], [0, 0, 1, 1], [], []>} : vector<8x32xf32>, vector<32x96xf32>, vector<8x96xf32> -> vector<8x96xf32>
    %147 = vector.broadcast %18 : vector<1x96xf32> to vector<8x96xf32>
    %148 = arith.addf %146, %147 : vector<8x96xf32>
    %149 = vector.extract_strided_slice %141 {offsets = [0, 0], sizes = [8, 32], strides = [1, 1]} : vector<8x96xf32> to vector<8x32xf32>
    %150 = vector.extract_strided_slice %145 {offsets = [0, 0], sizes = [8, 32], strides = [1, 1]} : vector<8x96xf32> to vector<8x32xf32>
    %151 = arith.addf %149, %150 : vector<8x32xf32>
    %152 = arith.negf %151 : vector<8x32xf32>
    %153 = math.exp %152 : vector<8x32xf32>
    %cst_39 = arith.constant 1.000000e+00 : f32
    %154 = vector.broadcast %cst_39 : f32 to vector<8x32xf32>
    %155 = arith.addf %154, %153 : vector<8x32xf32>
    %156 = arith.divf %154, %155 : vector<8x32xf32>
    %157 = vector.extract_strided_slice %141 {offsets = [0, 32], sizes = [8, 32], strides = [1, 1]} : vector<8x96xf32> to vector<8x32xf32>
    %158 = vector.extract_strided_slice %145 {offsets = [0, 32], sizes = [8, 32], strides = [1, 1]} : vector<8x96xf32> to vector<8x32xf32>
    %159 = arith.addf %157, %158 : vector<8x32xf32>
    %160 = arith.negf %159 : vector<8x32xf32>
    %161 = math.exp %160 : vector<8x32xf32>
    %cst_40 = arith.constant 1.000000e+00 : f32
    %162 = vector.broadcast %cst_40 : f32 to vector<8x32xf32>
    %163 = arith.addf %162, %161 : vector<8x32xf32>
    %164 = arith.divf %162, %163 : vector<8x32xf32>
    %165 = vector.extract_strided_slice %141 {offsets = [0, 64], sizes = [8, 32], strides = [1, 1]} : vector<8x96xf32> to vector<8x32xf32>
    %166 = vector.extract_strided_slice %145 {offsets = [0, 64], sizes = [8, 32], strides = [1, 1]} : vector<8x96xf32> to vector<8x32xf32>
    %167 = arith.mulf %156, %166 : vector<8x32xf32>
    %168 = arith.addf %165, %167 : vector<8x32xf32>
    %169 = math.tanh %168 : vector<8x32xf32>
    %cst_41 = arith.constant 1.000000e+00 : f32
    %170 = vector.broadcast %cst_41 : f32 to vector<8x32xf32>
    %171 = arith.subf %170, %164 : vector<8x32xf32>
    %172 = arith.mulf %171, %169 : vector<8x32xf32>
    %173 = arith.mulf %164, %114 : vector<8x32xf32>
    %174 = arith.addf %172, %173 : vector<8x32xf32>
    %175 = vector.extract_strided_slice %142 {offsets = [0, 0], sizes = [8, 32], strides = [1, 1]} : vector<8x96xf32> to vector<8x32xf32>
    %176 = vector.extract_strided_slice %148 {offsets = [0, 0], sizes = [8, 32], strides = [1, 1]} : vector<8x96xf32> to vector<8x32xf32>
    %177 = arith.addf %175, %176 : vector<8x32xf32>
    %178 = arith.negf %177 : vector<8x32xf32>
    %179 = math.exp %178 : vector<8x32xf32>
    %cst_42 = arith.constant 1.000000e+00 : f32
    %180 = vector.broadcast %cst_42 : f32 to vector<8x32xf32>
    %181 = arith.addf %180, %179 : vector<8x32xf32>
    %182 = arith.divf %180, %181 : vector<8x32xf32>
    %183 = vector.extract_strided_slice %142 {offsets = [0, 32], sizes = [8, 32], strides = [1, 1]} : vector<8x96xf32> to vector<8x32xf32>
    %184 = vector.extract_strided_slice %148 {offsets = [0, 32], sizes = [8, 32], strides = [1, 1]} : vector<8x96xf32> to vector<8x32xf32>
    %185 = arith.addf %183, %184 : vector<8x32xf32>
    %186 = arith.negf %185 : vector<8x32xf32>
    %187 = math.exp %186 : vector<8x32xf32>
    %cst_43 = arith.constant 1.000000e+00 : f32
    %188 = vector.broadcast %cst_43 : f32 to vector<8x32xf32>
    %189 = arith.addf %188, %187 : vector<8x32xf32>
    %190 = arith.divf %188, %189 : vector<8x32xf32>
    %191 = vector.extract_strided_slice %142 {offsets = [0, 64], sizes = [8, 32], strides = [1, 1]} : vector<8x96xf32> to vector<8x32xf32>
    %192 = vector.extract_strided_slice %148 {offsets = [0, 64], sizes = [8, 32], strides = [1, 1]} : vector<8x96xf32> to vector<8x32xf32>
    %193 = arith.mulf %182, %192 : vector<8x32xf32>
    %194 = arith.addf %191, %193 : vector<8x32xf32>
    %195 = math.tanh %194 : vector<8x32xf32>
    %cst_44 = arith.constant 1.000000e+00 : f32
    %196 = vector.broadcast %cst_44 : f32 to vector<8x32xf32>
    %197 = arith.subf %196, %190 : vector<8x32xf32>
    %198 = arith.mulf %197, %195 : vector<8x32xf32>
    %199 = arith.mulf %190, %140 : vector<8x32xf32>
    %200 = arith.addf %198, %199 : vector<8x32xf32>
    %201 = vector.extract_strided_slice %9 {offsets = [24, 0], sizes = [8, 96], strides = [1, 1]} : vector<80x96xf32> to vector<8x96xf32>
    %202 = vector.extract_strided_slice %14 {offsets = [48, 0], sizes = [8, 96], strides = [1, 1]} : vector<80x96xf32> to vector<8x96xf32>
    %cst_45 = arith.constant dense<0.000000e+00> : vector<8x96xf32>
    %203 = tpu.matmul %174, %15, %cst_45 {dimension_numbers = #tpu.dot_dimension_numbers<[1], [0], [0], [1], [0, 0, 1, 1], [], []>} : vector<8x32xf32>, vector<32x96xf32>, vector<8x96xf32> -> vector<8x96xf32>
    %204 = vector.broadcast %16 : vector<1x96xf32> to vector<8x96xf32>
    %205 = arith.addf %203, %204 : vector<8x96xf32>
    %cst_46 = arith.constant dense<0.000000e+00> : vector<8x96xf32>
    %206 = tpu.matmul %200, %17, %cst_46 {dimension_numbers = #tpu.dot_dimension_numbers<[1], [0], [0], [1], [0, 0, 1, 1], [], []>} : vector<8x32xf32>, vector<32x96xf32>, vector<8x96xf32> -> vector<8x96xf32>
    %207 = vector.broadcast %18 : vector<1x96xf32> to vector<8x96xf32>
    %208 = arith.addf %206, %207 : vector<8x96xf32>
    %209 = vector.extract_strided_slice %201 {offsets = [0, 0], sizes = [8, 32], strides = [1, 1]} : vector<8x96xf32> to vector<8x32xf32>
    %210 = vector.extract_strided_slice %205 {offsets = [0, 0], sizes = [8, 32], strides = [1, 1]} : vector<8x96xf32> to vector<8x32xf32>
    %211 = arith.addf %209, %210 : vector<8x32xf32>
    %212 = arith.negf %211 : vector<8x32xf32>
    %213 = math.exp %212 : vector<8x32xf32>
    %cst_47 = arith.constant 1.000000e+00 : f32
    %214 = vector.broadcast %cst_47 : f32 to vector<8x32xf32>
    %215 = arith.addf %214, %213 : vector<8x32xf32>
    %216 = arith.divf %214, %215 : vector<8x32xf32>
    %217 = vector.extract_strided_slice %201 {offsets = [0, 32], sizes = [8, 32], strides = [1, 1]} : vector<8x96xf32> to vector<8x32xf32>
    %218 = vector.extract_strided_slice %205 {offsets = [0, 32], sizes = [8, 32], strides = [1, 1]} : vector<8x96xf32> to vector<8x32xf32>
    %219 = arith.addf %217, %218 : vector<8x32xf32>
    %220 = arith.negf %219 : vector<8x32xf32>
    %221 = math.exp %220 : vector<8x32xf32>
    %cst_48 = arith.constant 1.000000e+00 : f32
    %222 = vector.broadcast %cst_48 : f32 to vector<8x32xf32>
    %223 = arith.addf %222, %221 : vector<8x32xf32>
    %224 = arith.divf %222, %223 : vector<8x32xf32>
    %225 = vector.extract_strided_slice %201 {offsets = [0, 64], sizes = [8, 32], strides = [1, 1]} : vector<8x96xf32> to vector<8x32xf32>
    %226 = vector.extract_strided_slice %205 {offsets = [0, 64], sizes = [8, 32], strides = [1, 1]} : vector<8x96xf32> to vector<8x32xf32>
    %227 = arith.mulf %216, %226 : vector<8x32xf32>
    %228 = arith.addf %225, %227 : vector<8x32xf32>
    %229 = math.tanh %228 : vector<8x32xf32>
    %cst_49 = arith.constant 1.000000e+00 : f32
    %230 = vector.broadcast %cst_49 : f32 to vector<8x32xf32>
    %231 = arith.subf %230, %224 : vector<8x32xf32>
    %232 = arith.mulf %231, %229 : vector<8x32xf32>
    %233 = arith.mulf %224, %174 : vector<8x32xf32>
    %234 = arith.addf %232, %233 : vector<8x32xf32>
    %235 = vector.extract_strided_slice %202 {offsets = [0, 0], sizes = [8, 32], strides = [1, 1]} : vector<8x96xf32> to vector<8x32xf32>
    %236 = vector.extract_strided_slice %208 {offsets = [0, 0], sizes = [8, 32], strides = [1, 1]} : vector<8x96xf32> to vector<8x32xf32>
    %237 = arith.addf %235, %236 : vector<8x32xf32>
    %238 = arith.negf %237 : vector<8x32xf32>
    %239 = math.exp %238 : vector<8x32xf32>
    %cst_50 = arith.constant 1.000000e+00 : f32
    %240 = vector.broadcast %cst_50 : f32 to vector<8x32xf32>
    %241 = arith.addf %240, %239 : vector<8x32xf32>
    %242 = arith.divf %240, %241 : vector<8x32xf32>
    %243 = vector.extract_strided_slice %202 {offsets = [0, 32], sizes = [8, 32], strides = [1, 1]} : vector<8x96xf32> to vector<8x32xf32>
    %244 = vector.extract_strided_slice %208 {offsets = [0, 32], sizes = [8, 32], strides = [1, 1]} : vector<8x96xf32> to vector<8x32xf32>
    %245 = arith.addf %243, %244 : vector<8x32xf32>
    %246 = arith.negf %245 : vector<8x32xf32>
    %247 = math.exp %246 : vector<8x32xf32>
    %cst_51 = arith.constant 1.000000e+00 : f32
    %248 = vector.broadcast %cst_51 : f32 to vector<8x32xf32>
    %249 = arith.addf %248, %247 : vector<8x32xf32>
    %250 = arith.divf %248, %249 : vector<8x32xf32>
    %251 = vector.extract_strided_slice %202 {offsets = [0, 64], sizes = [8, 32], strides = [1, 1]} : vector<8x96xf32> to vector<8x32xf32>
    %252 = vector.extract_strided_slice %208 {offsets = [0, 64], sizes = [8, 32], strides = [1, 1]} : vector<8x96xf32> to vector<8x32xf32>
    %253 = arith.mulf %242, %252 : vector<8x32xf32>
    %254 = arith.addf %251, %253 : vector<8x32xf32>
    %255 = math.tanh %254 : vector<8x32xf32>
    %cst_52 = arith.constant 1.000000e+00 : f32
    %256 = vector.broadcast %cst_52 : f32 to vector<8x32xf32>
    %257 = arith.subf %256, %250 : vector<8x32xf32>
    %258 = arith.mulf %257, %255 : vector<8x32xf32>
    %259 = arith.mulf %250, %200 : vector<8x32xf32>
    %260 = arith.addf %258, %259 : vector<8x32xf32>
    %261 = vector.extract_strided_slice %9 {offsets = [32, 0], sizes = [8, 96], strides = [1, 1]} : vector<80x96xf32> to vector<8x96xf32>
    %262 = vector.extract_strided_slice %14 {offsets = [40, 0], sizes = [8, 96], strides = [1, 1]} : vector<80x96xf32> to vector<8x96xf32>
    %cst_53 = arith.constant dense<0.000000e+00> : vector<8x96xf32>
    %263 = tpu.matmul %234, %15, %cst_53 {dimension_numbers = #tpu.dot_dimension_numbers<[1], [0], [0], [1], [0, 0, 1, 1], [], []>} : vector<8x32xf32>, vector<32x96xf32>, vector<8x96xf32> -> vector<8x96xf32>
    %264 = vector.broadcast %16 : vector<1x96xf32> to vector<8x96xf32>
    %265 = arith.addf %263, %264 : vector<8x96xf32>
    %cst_54 = arith.constant dense<0.000000e+00> : vector<8x96xf32>
    %266 = tpu.matmul %260, %17, %cst_54 {dimension_numbers = #tpu.dot_dimension_numbers<[1], [0], [0], [1], [0, 0, 1, 1], [], []>} : vector<8x32xf32>, vector<32x96xf32>, vector<8x96xf32> -> vector<8x96xf32>
    %267 = vector.broadcast %18 : vector<1x96xf32> to vector<8x96xf32>
    %268 = arith.addf %266, %267 : vector<8x96xf32>
    %269 = vector.extract_strided_slice %261 {offsets = [0, 0], sizes = [8, 32], strides = [1, 1]} : vector<8x96xf32> to vector<8x32xf32>
    %270 = vector.extract_strided_slice %265 {offsets = [0, 0], sizes = [8, 32], strides = [1, 1]} : vector<8x96xf32> to vector<8x32xf32>
    %271 = arith.addf %269, %270 : vector<8x32xf32>
    %272 = arith.negf %271 : vector<8x32xf32>
    %273 = math.exp %272 : vector<8x32xf32>
    %cst_55 = arith.constant 1.000000e+00 : f32
    %274 = vector.broadcast %cst_55 : f32 to vector<8x32xf32>
    %275 = arith.addf %274, %273 : vector<8x32xf32>
    %276 = arith.divf %274, %275 : vector<8x32xf32>
    %277 = vector.extract_strided_slice %261 {offsets = [0, 32], sizes = [8, 32], strides = [1, 1]} : vector<8x96xf32> to vector<8x32xf32>
    %278 = vector.extract_strided_slice %265 {offsets = [0, 32], sizes = [8, 32], strides = [1, 1]} : vector<8x96xf32> to vector<8x32xf32>
    %279 = arith.addf %277, %278 : vector<8x32xf32>
    %280 = arith.negf %279 : vector<8x32xf32>
    %281 = math.exp %280 : vector<8x32xf32>
    %cst_56 = arith.constant 1.000000e+00 : f32
    %282 = vector.broadcast %cst_56 : f32 to vector<8x32xf32>
    %283 = arith.addf %282, %281 : vector<8x32xf32>
    %284 = arith.divf %282, %283 : vector<8x32xf32>
    %285 = vector.extract_strided_slice %261 {offsets = [0, 64], sizes = [8, 32], strides = [1, 1]} : vector<8x96xf32> to vector<8x32xf32>
    %286 = vector.extract_strided_slice %265 {offsets = [0, 64], sizes = [8, 32], strides = [1, 1]} : vector<8x96xf32> to vector<8x32xf32>
    %287 = arith.mulf %276, %286 : vector<8x32xf32>
    %288 = arith.addf %285, %287 : vector<8x32xf32>
    %289 = math.tanh %288 : vector<8x32xf32>
    %cst_57 = arith.constant 1.000000e+00 : f32
    %290 = vector.broadcast %cst_57 : f32 to vector<8x32xf32>
    %291 = arith.subf %290, %284 : vector<8x32xf32>
    %292 = arith.mulf %291, %289 : vector<8x32xf32>
    %293 = arith.mulf %284, %234 : vector<8x32xf32>
    %294 = arith.addf %292, %293 : vector<8x32xf32>
    %295 = vector.extract_strided_slice %262 {offsets = [0, 0], sizes = [8, 32], strides = [1, 1]} : vector<8x96xf32> to vector<8x32xf32>
    %296 = vector.extract_strided_slice %268 {offsets = [0, 0], sizes = [8, 32], strides = [1, 1]} : vector<8x96xf32> to vector<8x32xf32>
    %297 = arith.addf %295, %296 : vector<8x32xf32>
    %298 = arith.negf %297 : vector<8x32xf32>
    %299 = math.exp %298 : vector<8x32xf32>
    %cst_58 = arith.constant 1.000000e+00 : f32
    %300 = vector.broadcast %cst_58 : f32 to vector<8x32xf32>
    %301 = arith.addf %300, %299 : vector<8x32xf32>
    %302 = arith.divf %300, %301 : vector<8x32xf32>
    %303 = vector.extract_strided_slice %262 {offsets = [0, 32], sizes = [8, 32], strides = [1, 1]} : vector<8x96xf32> to vector<8x32xf32>
    %304 = vector.extract_strided_slice %268 {offsets = [0, 32], sizes = [8, 32], strides = [1, 1]} : vector<8x96xf32> to vector<8x32xf32>
    %305 = arith.addf %303, %304 : vector<8x32xf32>
    %306 = arith.negf %305 : vector<8x32xf32>
    %307 = math.exp %306 : vector<8x32xf32>
    %cst_59 = arith.constant 1.000000e+00 : f32
    %308 = vector.broadcast %cst_59 : f32 to vector<8x32xf32>
    %309 = arith.addf %308, %307 : vector<8x32xf32>
    %310 = arith.divf %308, %309 : vector<8x32xf32>
    %311 = vector.extract_strided_slice %262 {offsets = [0, 64], sizes = [8, 32], strides = [1, 1]} : vector<8x96xf32> to vector<8x32xf32>
    %312 = vector.extract_strided_slice %268 {offsets = [0, 64], sizes = [8, 32], strides = [1, 1]} : vector<8x96xf32> to vector<8x32xf32>
    %313 = arith.mulf %302, %312 : vector<8x32xf32>
    %314 = arith.addf %311, %313 : vector<8x32xf32>
    %315 = math.tanh %314 : vector<8x32xf32>
    %cst_60 = arith.constant 1.000000e+00 : f32
    %316 = vector.broadcast %cst_60 : f32 to vector<8x32xf32>
    %317 = arith.subf %316, %310 : vector<8x32xf32>
    %318 = arith.mulf %317, %315 : vector<8x32xf32>
    %319 = arith.mulf %310, %260 : vector<8x32xf32>
    %320 = arith.addf %318, %319 : vector<8x32xf32>
    %321 = vector.extract_strided_slice %9 {offsets = [40, 0], sizes = [8, 96], strides = [1, 1]} : vector<80x96xf32> to vector<8x96xf32>
    %322 = vector.extract_strided_slice %14 {offsets = [32, 0], sizes = [8, 96], strides = [1, 1]} : vector<80x96xf32> to vector<8x96xf32>
    %cst_61 = arith.constant dense<0.000000e+00> : vector<8x96xf32>
    %323 = tpu.matmul %294, %15, %cst_61 {dimension_numbers = #tpu.dot_dimension_numbers<[1], [0], [0], [1], [0, 0, 1, 1], [], []>} : vector<8x32xf32>, vector<32x96xf32>, vector<8x96xf32> -> vector<8x96xf32>
    %324 = vector.broadcast %16 : vector<1x96xf32> to vector<8x96xf32>
    %325 = arith.addf %323, %324 : vector<8x96xf32>
    %cst_62 = arith.constant dense<0.000000e+00> : vector<8x96xf32>
    %326 = tpu.matmul %320, %17, %cst_62 {dimension_numbers = #tpu.dot_dimension_numbers<[1], [0], [0], [1], [0, 0, 1, 1], [], []>} : vector<8x32xf32>, vector<32x96xf32>, vector<8x96xf32> -> vector<8x96xf32>
    %327 = vector.broadcast %18 : vector<1x96xf32> to vector<8x96xf32>
    %328 = arith.addf %326, %327 : vector<8x96xf32>
    %329 = vector.extract_strided_slice %321 {offsets = [0, 0], sizes = [8, 32], strides = [1, 1]} : vector<8x96xf32> to vector<8x32xf32>
    %330 = vector.extract_strided_slice %325 {offsets = [0, 0], sizes = [8, 32], strides = [1, 1]} : vector<8x96xf32> to vector<8x32xf32>
    %331 = arith.addf %329, %330 : vector<8x32xf32>
    %332 = arith.negf %331 : vector<8x32xf32>
    %333 = math.exp %332 : vector<8x32xf32>
    %cst_63 = arith.constant 1.000000e+00 : f32
    %334 = vector.broadcast %cst_63 : f32 to vector<8x32xf32>
    %335 = arith.addf %334, %333 : vector<8x32xf32>
    %336 = arith.divf %334, %335 : vector<8x32xf32>
    %337 = vector.extract_strided_slice %321 {offsets = [0, 32], sizes = [8, 32], strides = [1, 1]} : vector<8x96xf32> to vector<8x32xf32>
    %338 = vector.extract_strided_slice %325 {offsets = [0, 32], sizes = [8, 32], strides = [1, 1]} : vector<8x96xf32> to vector<8x32xf32>
    %339 = arith.addf %337, %338 : vector<8x32xf32>
    %340 = arith.negf %339 : vector<8x32xf32>
    %341 = math.exp %340 : vector<8x32xf32>
    %cst_64 = arith.constant 1.000000e+00 : f32
    %342 = vector.broadcast %cst_64 : f32 to vector<8x32xf32>
    %343 = arith.addf %342, %341 : vector<8x32xf32>
    %344 = arith.divf %342, %343 : vector<8x32xf32>
    %345 = vector.extract_strided_slice %321 {offsets = [0, 64], sizes = [8, 32], strides = [1, 1]} : vector<8x96xf32> to vector<8x32xf32>
    %346 = vector.extract_strided_slice %325 {offsets = [0, 64], sizes = [8, 32], strides = [1, 1]} : vector<8x96xf32> to vector<8x32xf32>
    %347 = arith.mulf %336, %346 : vector<8x32xf32>
    %348 = arith.addf %345, %347 : vector<8x32xf32>
    %349 = math.tanh %348 : vector<8x32xf32>
    %cst_65 = arith.constant 1.000000e+00 : f32
    %350 = vector.broadcast %cst_65 : f32 to vector<8x32xf32>
    %351 = arith.subf %350, %344 : vector<8x32xf32>
    %352 = arith.mulf %351, %349 : vector<8x32xf32>
    %353 = arith.mulf %344, %294 : vector<8x32xf32>
    %354 = arith.addf %352, %353 : vector<8x32xf32>
    %355 = vector.extract_strided_slice %322 {offsets = [0, 0], sizes = [8, 32], strides = [1, 1]} : vector<8x96xf32> to vector<8x32xf32>
    %356 = vector.extract_strided_slice %328 {offsets = [0, 0], sizes = [8, 32], strides = [1, 1]} : vector<8x96xf32> to vector<8x32xf32>
    %357 = arith.addf %355, %356 : vector<8x32xf32>
    %358 = arith.negf %357 : vector<8x32xf32>
    %359 = math.exp %358 : vector<8x32xf32>
    %cst_66 = arith.constant 1.000000e+00 : f32
    %360 = vector.broadcast %cst_66 : f32 to vector<8x32xf32>
    %361 = arith.addf %360, %359 : vector<8x32xf32>
    %362 = arith.divf %360, %361 : vector<8x32xf32>
    %363 = vector.extract_strided_slice %322 {offsets = [0, 32], sizes = [8, 32], strides = [1, 1]} : vector<8x96xf32> to vector<8x32xf32>
    %364 = vector.extract_strided_slice %328 {offsets = [0, 32], sizes = [8, 32], strides = [1, 1]} : vector<8x96xf32> to vector<8x32xf32>
    %365 = arith.addf %363, %364 : vector<8x32xf32>
    %366 = arith.negf %365 : vector<8x32xf32>
    %367 = math.exp %366 : vector<8x32xf32>
    %cst_67 = arith.constant 1.000000e+00 : f32
    %368 = vector.broadcast %cst_67 : f32 to vector<8x32xf32>
    %369 = arith.addf %368, %367 : vector<8x32xf32>
    %370 = arith.divf %368, %369 : vector<8x32xf32>
    %371 = vector.extract_strided_slice %322 {offsets = [0, 64], sizes = [8, 32], strides = [1, 1]} : vector<8x96xf32> to vector<8x32xf32>
    %372 = vector.extract_strided_slice %328 {offsets = [0, 64], sizes = [8, 32], strides = [1, 1]} : vector<8x96xf32> to vector<8x32xf32>
    %373 = arith.mulf %362, %372 : vector<8x32xf32>
    %374 = arith.addf %371, %373 : vector<8x32xf32>
    %375 = math.tanh %374 : vector<8x32xf32>
    %cst_68 = arith.constant 1.000000e+00 : f32
    %376 = vector.broadcast %cst_68 : f32 to vector<8x32xf32>
    %377 = arith.subf %376, %370 : vector<8x32xf32>
    %378 = arith.mulf %377, %375 : vector<8x32xf32>
    %379 = arith.mulf %370, %320 : vector<8x32xf32>
    %380 = arith.addf %378, %379 : vector<8x32xf32>
    %381 = vector.extract_strided_slice %9 {offsets = [48, 0], sizes = [8, 96], strides = [1, 1]} : vector<80x96xf32> to vector<8x96xf32>
    %382 = vector.extract_strided_slice %14 {offsets = [24, 0], sizes = [8, 96], strides = [1, 1]} : vector<80x96xf32> to vector<8x96xf32>
    %cst_69 = arith.constant dense<0.000000e+00> : vector<8x96xf32>
    %383 = tpu.matmul %354, %15, %cst_69 {dimension_numbers = #tpu.dot_dimension_numbers<[1], [0], [0], [1], [0, 0, 1, 1], [], []>} : vector<8x32xf32>, vector<32x96xf32>, vector<8x96xf32> -> vector<8x96xf32>
    %384 = vector.broadcast %16 : vector<1x96xf32> to vector<8x96xf32>
    %385 = arith.addf %383, %384 : vector<8x96xf32>
    %cst_70 = arith.constant dense<0.000000e+00> : vector<8x96xf32>
    %386 = tpu.matmul %380, %17, %cst_70 {dimension_numbers = #tpu.dot_dimension_numbers<[1], [0], [0], [1], [0, 0, 1, 1], [], []>} : vector<8x32xf32>, vector<32x96xf32>, vector<8x96xf32> -> vector<8x96xf32>
    %387 = vector.broadcast %18 : vector<1x96xf32> to vector<8x96xf32>
    %388 = arith.addf %386, %387 : vector<8x96xf32>
    %389 = vector.extract_strided_slice %381 {offsets = [0, 0], sizes = [8, 32], strides = [1, 1]} : vector<8x96xf32> to vector<8x32xf32>
    %390 = vector.extract_strided_slice %385 {offsets = [0, 0], sizes = [8, 32], strides = [1, 1]} : vector<8x96xf32> to vector<8x32xf32>
    %391 = arith.addf %389, %390 : vector<8x32xf32>
    %392 = arith.negf %391 : vector<8x32xf32>
    %393 = math.exp %392 : vector<8x32xf32>
    %cst_71 = arith.constant 1.000000e+00 : f32
    %394 = vector.broadcast %cst_71 : f32 to vector<8x32xf32>
    %395 = arith.addf %394, %393 : vector<8x32xf32>
    %396 = arith.divf %394, %395 : vector<8x32xf32>
    %397 = vector.extract_strided_slice %381 {offsets = [0, 32], sizes = [8, 32], strides = [1, 1]} : vector<8x96xf32> to vector<8x32xf32>
    %398 = vector.extract_strided_slice %385 {offsets = [0, 32], sizes = [8, 32], strides = [1, 1]} : vector<8x96xf32> to vector<8x32xf32>
    %399 = arith.addf %397, %398 : vector<8x32xf32>
    %400 = arith.negf %399 : vector<8x32xf32>
    %401 = math.exp %400 : vector<8x32xf32>
    %cst_72 = arith.constant 1.000000e+00 : f32
    %402 = vector.broadcast %cst_72 : f32 to vector<8x32xf32>
    %403 = arith.addf %402, %401 : vector<8x32xf32>
    %404 = arith.divf %402, %403 : vector<8x32xf32>
    %405 = vector.extract_strided_slice %381 {offsets = [0, 64], sizes = [8, 32], strides = [1, 1]} : vector<8x96xf32> to vector<8x32xf32>
    %406 = vector.extract_strided_slice %385 {offsets = [0, 64], sizes = [8, 32], strides = [1, 1]} : vector<8x96xf32> to vector<8x32xf32>
    %407 = arith.mulf %396, %406 : vector<8x32xf32>
    %408 = arith.addf %405, %407 : vector<8x32xf32>
    %409 = math.tanh %408 : vector<8x32xf32>
    %cst_73 = arith.constant 1.000000e+00 : f32
    %410 = vector.broadcast %cst_73 : f32 to vector<8x32xf32>
    %411 = arith.subf %410, %404 : vector<8x32xf32>
    %412 = arith.mulf %411, %409 : vector<8x32xf32>
    %413 = arith.mulf %404, %354 : vector<8x32xf32>
    %414 = arith.addf %412, %413 : vector<8x32xf32>
    %415 = vector.extract_strided_slice %382 {offsets = [0, 0], sizes = [8, 32], strides = [1, 1]} : vector<8x96xf32> to vector<8x32xf32>
    %416 = vector.extract_strided_slice %388 {offsets = [0, 0], sizes = [8, 32], strides = [1, 1]} : vector<8x96xf32> to vector<8x32xf32>
    %417 = arith.addf %415, %416 : vector<8x32xf32>
    %418 = arith.negf %417 : vector<8x32xf32>
    %419 = math.exp %418 : vector<8x32xf32>
    %cst_74 = arith.constant 1.000000e+00 : f32
    %420 = vector.broadcast %cst_74 : f32 to vector<8x32xf32>
    %421 = arith.addf %420, %419 : vector<8x32xf32>
    %422 = arith.divf %420, %421 : vector<8x32xf32>
    %423 = vector.extract_strided_slice %382 {offsets = [0, 32], sizes = [8, 32], strides = [1, 1]} : vector<8x96xf32> to vector<8x32xf32>
    %424 = vector.extract_strided_slice %388 {offsets = [0, 32], sizes = [8, 32], strides = [1, 1]} : vector<8x96xf32> to vector<8x32xf32>
    %425 = arith.addf %423, %424 : vector<8x32xf32>
    %426 = arith.negf %425 : vector<8x32xf32>
    %427 = math.exp %426 : vector<8x32xf32>
    %cst_75 = arith.constant 1.000000e+00 : f32
    %428 = vector.broadcast %cst_75 : f32 to vector<8x32xf32>
    %429 = arith.addf %428, %427 : vector<8x32xf32>
    %430 = arith.divf %428, %429 : vector<8x32xf32>
    %431 = vector.extract_strided_slice %382 {offsets = [0, 64], sizes = [8, 32], strides = [1, 1]} : vector<8x96xf32> to vector<8x32xf32>
    %432 = vector.extract_strided_slice %388 {offsets = [0, 64], sizes = [8, 32], strides = [1, 1]} : vector<8x96xf32> to vector<8x32xf32>
    %433 = arith.mulf %422, %432 : vector<8x32xf32>
    %434 = arith.addf %431, %433 : vector<8x32xf32>
    %435 = math.tanh %434 : vector<8x32xf32>
    %cst_76 = arith.constant 1.000000e+00 : f32
    %436 = vector.broadcast %cst_76 : f32 to vector<8x32xf32>
    %437 = arith.subf %436, %430 : vector<8x32xf32>
    %438 = arith.mulf %437, %435 : vector<8x32xf32>
    %439 = arith.mulf %430, %380 : vector<8x32xf32>
    %440 = arith.addf %438, %439 : vector<8x32xf32>
    %441 = vector.extract_strided_slice %9 {offsets = [56, 0], sizes = [8, 96], strides = [1, 1]} : vector<80x96xf32> to vector<8x96xf32>
    %442 = vector.extract_strided_slice %14 {offsets = [16, 0], sizes = [8, 96], strides = [1, 1]} : vector<80x96xf32> to vector<8x96xf32>
    %cst_77 = arith.constant dense<0.000000e+00> : vector<8x96xf32>
    %443 = tpu.matmul %414, %15, %cst_77 {dimension_numbers = #tpu.dot_dimension_numbers<[1], [0], [0], [1], [0, 0, 1, 1], [], []>} : vector<8x32xf32>, vector<32x96xf32>, vector<8x96xf32> -> vector<8x96xf32>
    %444 = vector.broadcast %16 : vector<1x96xf32> to vector<8x96xf32>
    %445 = arith.addf %443, %444 : vector<8x96xf32>
    %cst_78 = arith.constant dense<0.000000e+00> : vector<8x96xf32>
    %446 = tpu.matmul %440, %17, %cst_78 {dimension_numbers = #tpu.dot_dimension_numbers<[1], [0], [0], [1], [0, 0, 1, 1], [], []>} : vector<8x32xf32>, vector<32x96xf32>, vector<8x96xf32> -> vector<8x96xf32>
    %447 = vector.broadcast %18 : vector<1x96xf32> to vector<8x96xf32>
    %448 = arith.addf %446, %447 : vector<8x96xf32>
    %449 = vector.extract_strided_slice %441 {offsets = [0, 0], sizes = [8, 32], strides = [1, 1]} : vector<8x96xf32> to vector<8x32xf32>
    %450 = vector.extract_strided_slice %445 {offsets = [0, 0], sizes = [8, 32], strides = [1, 1]} : vector<8x96xf32> to vector<8x32xf32>
    %451 = arith.addf %449, %450 : vector<8x32xf32>
    %452 = arith.negf %451 : vector<8x32xf32>
    %453 = math.exp %452 : vector<8x32xf32>
    %cst_79 = arith.constant 1.000000e+00 : f32
    %454 = vector.broadcast %cst_79 : f32 to vector<8x32xf32>
    %455 = arith.addf %454, %453 : vector<8x32xf32>
    %456 = arith.divf %454, %455 : vector<8x32xf32>
    %457 = vector.extract_strided_slice %441 {offsets = [0, 32], sizes = [8, 32], strides = [1, 1]} : vector<8x96xf32> to vector<8x32xf32>
    %458 = vector.extract_strided_slice %445 {offsets = [0, 32], sizes = [8, 32], strides = [1, 1]} : vector<8x96xf32> to vector<8x32xf32>
    %459 = arith.addf %457, %458 : vector<8x32xf32>
    %460 = arith.negf %459 : vector<8x32xf32>
    %461 = math.exp %460 : vector<8x32xf32>
    %cst_80 = arith.constant 1.000000e+00 : f32
    %462 = vector.broadcast %cst_80 : f32 to vector<8x32xf32>
    %463 = arith.addf %462, %461 : vector<8x32xf32>
    %464 = arith.divf %462, %463 : vector<8x32xf32>
    %465 = vector.extract_strided_slice %441 {offsets = [0, 64], sizes = [8, 32], strides = [1, 1]} : vector<8x96xf32> to vector<8x32xf32>
    %466 = vector.extract_strided_slice %445 {offsets = [0, 64], sizes = [8, 32], strides = [1, 1]} : vector<8x96xf32> to vector<8x32xf32>
    %467 = arith.mulf %456, %466 : vector<8x32xf32>
    %468 = arith.addf %465, %467 : vector<8x32xf32>
    %469 = math.tanh %468 : vector<8x32xf32>
    %cst_81 = arith.constant 1.000000e+00 : f32
    %470 = vector.broadcast %cst_81 : f32 to vector<8x32xf32>
    %471 = arith.subf %470, %464 : vector<8x32xf32>
    %472 = arith.mulf %471, %469 : vector<8x32xf32>
    %473 = arith.mulf %464, %414 : vector<8x32xf32>
    %474 = arith.addf %472, %473 : vector<8x32xf32>
    %475 = vector.extract_strided_slice %442 {offsets = [0, 0], sizes = [8, 32], strides = [1, 1]} : vector<8x96xf32> to vector<8x32xf32>
    %476 = vector.extract_strided_slice %448 {offsets = [0, 0], sizes = [8, 32], strides = [1, 1]} : vector<8x96xf32> to vector<8x32xf32>
    %477 = arith.addf %475, %476 : vector<8x32xf32>
    %478 = arith.negf %477 : vector<8x32xf32>
    %479 = math.exp %478 : vector<8x32xf32>
    %cst_82 = arith.constant 1.000000e+00 : f32
    %480 = vector.broadcast %cst_82 : f32 to vector<8x32xf32>
    %481 = arith.addf %480, %479 : vector<8x32xf32>
    %482 = arith.divf %480, %481 : vector<8x32xf32>
    %483 = vector.extract_strided_slice %442 {offsets = [0, 32], sizes = [8, 32], strides = [1, 1]} : vector<8x96xf32> to vector<8x32xf32>
    %484 = vector.extract_strided_slice %448 {offsets = [0, 32], sizes = [8, 32], strides = [1, 1]} : vector<8x96xf32> to vector<8x32xf32>
    %485 = arith.addf %483, %484 : vector<8x32xf32>
    %486 = arith.negf %485 : vector<8x32xf32>
    %487 = math.exp %486 : vector<8x32xf32>
    %cst_83 = arith.constant 1.000000e+00 : f32
    %488 = vector.broadcast %cst_83 : f32 to vector<8x32xf32>
    %489 = arith.addf %488, %487 : vector<8x32xf32>
    %490 = arith.divf %488, %489 : vector<8x32xf32>
    %491 = vector.extract_strided_slice %442 {offsets = [0, 64], sizes = [8, 32], strides = [1, 1]} : vector<8x96xf32> to vector<8x32xf32>
    %492 = vector.extract_strided_slice %448 {offsets = [0, 64], sizes = [8, 32], strides = [1, 1]} : vector<8x96xf32> to vector<8x32xf32>
    %493 = arith.mulf %482, %492 : vector<8x32xf32>
    %494 = arith.addf %491, %493 : vector<8x32xf32>
    %495 = math.tanh %494 : vector<8x32xf32>
    %cst_84 = arith.constant 1.000000e+00 : f32
    %496 = vector.broadcast %cst_84 : f32 to vector<8x32xf32>
    %497 = arith.subf %496, %490 : vector<8x32xf32>
    %498 = arith.mulf %497, %495 : vector<8x32xf32>
    %499 = arith.mulf %490, %440 : vector<8x32xf32>
    %500 = arith.addf %498, %499 : vector<8x32xf32>
    %501 = vector.extract_strided_slice %9 {offsets = [64, 0], sizes = [8, 96], strides = [1, 1]} : vector<80x96xf32> to vector<8x96xf32>
    %502 = vector.extract_strided_slice %14 {offsets = [8, 0], sizes = [8, 96], strides = [1, 1]} : vector<80x96xf32> to vector<8x96xf32>
    %cst_85 = arith.constant dense<0.000000e+00> : vector<8x96xf32>
    %503 = tpu.matmul %474, %15, %cst_85 {dimension_numbers = #tpu.dot_dimension_numbers<[1], [0], [0], [1], [0, 0, 1, 1], [], []>} : vector<8x32xf32>, vector<32x96xf32>, vector<8x96xf32> -> vector<8x96xf32>
    %504 = vector.broadcast %16 : vector<1x96xf32> to vector<8x96xf32>
    %505 = arith.addf %503, %504 : vector<8x96xf32>
    %cst_86 = arith.constant dense<0.000000e+00> : vector<8x96xf32>
    %506 = tpu.matmul %500, %17, %cst_86 {dimension_numbers = #tpu.dot_dimension_numbers<[1], [0], [0], [1], [0, 0, 1, 1], [], []>} : vector<8x32xf32>, vector<32x96xf32>, vector<8x96xf32> -> vector<8x96xf32>
    %507 = vector.broadcast %18 : vector<1x96xf32> to vector<8x96xf32>
    %508 = arith.addf %506, %507 : vector<8x96xf32>
    %509 = vector.extract_strided_slice %501 {offsets = [0, 0], sizes = [8, 32], strides = [1, 1]} : vector<8x96xf32> to vector<8x32xf32>
    %510 = vector.extract_strided_slice %505 {offsets = [0, 0], sizes = [8, 32], strides = [1, 1]} : vector<8x96xf32> to vector<8x32xf32>
    %511 = arith.addf %509, %510 : vector<8x32xf32>
    %512 = arith.negf %511 : vector<8x32xf32>
    %513 = math.exp %512 : vector<8x32xf32>
    %cst_87 = arith.constant 1.000000e+00 : f32
    %514 = vector.broadcast %cst_87 : f32 to vector<8x32xf32>
    %515 = arith.addf %514, %513 : vector<8x32xf32>
    %516 = arith.divf %514, %515 : vector<8x32xf32>
    %517 = vector.extract_strided_slice %501 {offsets = [0, 32], sizes = [8, 32], strides = [1, 1]} : vector<8x96xf32> to vector<8x32xf32>
    %518 = vector.extract_strided_slice %505 {offsets = [0, 32], sizes = [8, 32], strides = [1, 1]} : vector<8x96xf32> to vector<8x32xf32>
    %519 = arith.addf %517, %518 : vector<8x32xf32>
    %520 = arith.negf %519 : vector<8x32xf32>
    %521 = math.exp %520 : vector<8x32xf32>
    %cst_88 = arith.constant 1.000000e+00 : f32
    %522 = vector.broadcast %cst_88 : f32 to vector<8x32xf32>
    %523 = arith.addf %522, %521 : vector<8x32xf32>
    %524 = arith.divf %522, %523 : vector<8x32xf32>
    %525 = vector.extract_strided_slice %501 {offsets = [0, 64], sizes = [8, 32], strides = [1, 1]} : vector<8x96xf32> to vector<8x32xf32>
    %526 = vector.extract_strided_slice %505 {offsets = [0, 64], sizes = [8, 32], strides = [1, 1]} : vector<8x96xf32> to vector<8x32xf32>
    %527 = arith.mulf %516, %526 : vector<8x32xf32>
    %528 = arith.addf %525, %527 : vector<8x32xf32>
    %529 = math.tanh %528 : vector<8x32xf32>
    %cst_89 = arith.constant 1.000000e+00 : f32
    %530 = vector.broadcast %cst_89 : f32 to vector<8x32xf32>
    %531 = arith.subf %530, %524 : vector<8x32xf32>
    %532 = arith.mulf %531, %529 : vector<8x32xf32>
    %533 = arith.mulf %524, %474 : vector<8x32xf32>
    %534 = arith.addf %532, %533 : vector<8x32xf32>
    %535 = vector.extract_strided_slice %502 {offsets = [0, 0], sizes = [8, 32], strides = [1, 1]} : vector<8x96xf32> to vector<8x32xf32>
    %536 = vector.extract_strided_slice %508 {offsets = [0, 0], sizes = [8, 32], strides = [1, 1]} : vector<8x96xf32> to vector<8x32xf32>
    %537 = arith.addf %535, %536 : vector<8x32xf32>
    %538 = arith.negf %537 : vector<8x32xf32>
    %539 = math.exp %538 : vector<8x32xf32>
    %cst_90 = arith.constant 1.000000e+00 : f32
    %540 = vector.broadcast %cst_90 : f32 to vector<8x32xf32>
    %541 = arith.addf %540, %539 : vector<8x32xf32>
    %542 = arith.divf %540, %541 : vector<8x32xf32>
    %543 = vector.extract_strided_slice %502 {offsets = [0, 32], sizes = [8, 32], strides = [1, 1]} : vector<8x96xf32> to vector<8x32xf32>
    %544 = vector.extract_strided_slice %508 {offsets = [0, 32], sizes = [8, 32], strides = [1, 1]} : vector<8x96xf32> to vector<8x32xf32>
    %545 = arith.addf %543, %544 : vector<8x32xf32>
    %546 = arith.negf %545 : vector<8x32xf32>
    %547 = math.exp %546 : vector<8x32xf32>
    %cst_91 = arith.constant 1.000000e+00 : f32
    %548 = vector.broadcast %cst_91 : f32 to vector<8x32xf32>
    %549 = arith.addf %548, %547 : vector<8x32xf32>
    %550 = arith.divf %548, %549 : vector<8x32xf32>
    %551 = vector.extract_strided_slice %502 {offsets = [0, 64], sizes = [8, 32], strides = [1, 1]} : vector<8x96xf32> to vector<8x32xf32>
    %552 = vector.extract_strided_slice %508 {offsets = [0, 64], sizes = [8, 32], strides = [1, 1]} : vector<8x96xf32> to vector<8x32xf32>
    %553 = arith.mulf %542, %552 : vector<8x32xf32>
    %554 = arith.addf %551, %553 : vector<8x32xf32>
    %555 = math.tanh %554 : vector<8x32xf32>
    %cst_92 = arith.constant 1.000000e+00 : f32
    %556 = vector.broadcast %cst_92 : f32 to vector<8x32xf32>
    %557 = arith.subf %556, %550 : vector<8x32xf32>
    %558 = arith.mulf %557, %555 : vector<8x32xf32>
    %559 = arith.mulf %550, %500 : vector<8x32xf32>
    %560 = arith.addf %558, %559 : vector<8x32xf32>
    %561 = vector.extract_strided_slice %9 {offsets = [72, 0], sizes = [8, 96], strides = [1, 1]} : vector<80x96xf32> to vector<8x96xf32>
    %562 = vector.extract_strided_slice %14 {offsets = [0, 0], sizes = [8, 96], strides = [1, 1]} : vector<80x96xf32> to vector<8x96xf32>
    %cst_93 = arith.constant dense<0.000000e+00> : vector<8x96xf32>
    %563 = tpu.matmul %534, %15, %cst_93 {dimension_numbers = #tpu.dot_dimension_numbers<[1], [0], [0], [1], [0, 0, 1, 1], [], []>} : vector<8x32xf32>, vector<32x96xf32>, vector<8x96xf32> -> vector<8x96xf32>
    %564 = vector.broadcast %16 : vector<1x96xf32> to vector<8x96xf32>
    %565 = arith.addf %563, %564 : vector<8x96xf32>
    %cst_94 = arith.constant dense<0.000000e+00> : vector<8x96xf32>
    %566 = tpu.matmul %560, %17, %cst_94 {dimension_numbers = #tpu.dot_dimension_numbers<[1], [0], [0], [1], [0, 0, 1, 1], [], []>} : vector<8x32xf32>, vector<32x96xf32>, vector<8x96xf32> -> vector<8x96xf32>
    %567 = vector.broadcast %18 : vector<1x96xf32> to vector<8x96xf32>
    %568 = arith.addf %566, %567 : vector<8x96xf32>
    %569 = vector.extract_strided_slice %561 {offsets = [0, 0], sizes = [8, 32], strides = [1, 1]} : vector<8x96xf32> to vector<8x32xf32>
    %570 = vector.extract_strided_slice %565 {offsets = [0, 0], sizes = [8, 32], strides = [1, 1]} : vector<8x96xf32> to vector<8x32xf32>
    %571 = arith.addf %569, %570 : vector<8x32xf32>
    %572 = arith.negf %571 : vector<8x32xf32>
    %573 = math.exp %572 : vector<8x32xf32>
    %cst_95 = arith.constant 1.000000e+00 : f32
    %574 = vector.broadcast %cst_95 : f32 to vector<8x32xf32>
    %575 = arith.addf %574, %573 : vector<8x32xf32>
    %576 = arith.divf %574, %575 : vector<8x32xf32>
    %577 = vector.extract_strided_slice %561 {offsets = [0, 32], sizes = [8, 32], strides = [1, 1]} : vector<8x96xf32> to vector<8x32xf32>
    %578 = vector.extract_strided_slice %565 {offsets = [0, 32], sizes = [8, 32], strides = [1, 1]} : vector<8x96xf32> to vector<8x32xf32>
    %579 = arith.addf %577, %578 : vector<8x32xf32>
    %580 = arith.negf %579 : vector<8x32xf32>
    %581 = math.exp %580 : vector<8x32xf32>
    %cst_96 = arith.constant 1.000000e+00 : f32
    %582 = vector.broadcast %cst_96 : f32 to vector<8x32xf32>
    %583 = arith.addf %582, %581 : vector<8x32xf32>
    %584 = arith.divf %582, %583 : vector<8x32xf32>
    %585 = vector.extract_strided_slice %561 {offsets = [0, 64], sizes = [8, 32], strides = [1, 1]} : vector<8x96xf32> to vector<8x32xf32>
    %586 = vector.extract_strided_slice %565 {offsets = [0, 64], sizes = [8, 32], strides = [1, 1]} : vector<8x96xf32> to vector<8x32xf32>
    %587 = arith.mulf %576, %586 : vector<8x32xf32>
    %588 = arith.addf %585, %587 : vector<8x32xf32>
    %589 = math.tanh %588 : vector<8x32xf32>
    %cst_97 = arith.constant 1.000000e+00 : f32
    %590 = vector.broadcast %cst_97 : f32 to vector<8x32xf32>
    %591 = arith.subf %590, %584 : vector<8x32xf32>
    %592 = arith.mulf %591, %589 : vector<8x32xf32>
    %593 = arith.mulf %584, %534 : vector<8x32xf32>
    %594 = arith.addf %592, %593 : vector<8x32xf32>
    %595 = vector.extract_strided_slice %562 {offsets = [0, 0], sizes = [8, 32], strides = [1, 1]} : vector<8x96xf32> to vector<8x32xf32>
    %596 = vector.extract_strided_slice %568 {offsets = [0, 0], sizes = [8, 32], strides = [1, 1]} : vector<8x96xf32> to vector<8x32xf32>
    %597 = arith.addf %595, %596 : vector<8x32xf32>
    %598 = arith.negf %597 : vector<8x32xf32>
    %599 = math.exp %598 : vector<8x32xf32>
    %cst_98 = arith.constant 1.000000e+00 : f32
    %600 = vector.broadcast %cst_98 : f32 to vector<8x32xf32>
    %601 = arith.addf %600, %599 : vector<8x32xf32>
    %602 = arith.divf %600, %601 : vector<8x32xf32>
    %603 = vector.extract_strided_slice %562 {offsets = [0, 32], sizes = [8, 32], strides = [1, 1]} : vector<8x96xf32> to vector<8x32xf32>
    %604 = vector.extract_strided_slice %568 {offsets = [0, 32], sizes = [8, 32], strides = [1, 1]} : vector<8x96xf32> to vector<8x32xf32>
    %605 = arith.addf %603, %604 : vector<8x32xf32>
    %606 = arith.negf %605 : vector<8x32xf32>
    %607 = math.exp %606 : vector<8x32xf32>
    %cst_99 = arith.constant 1.000000e+00 : f32
    %608 = vector.broadcast %cst_99 : f32 to vector<8x32xf32>
    %609 = arith.addf %608, %607 : vector<8x32xf32>
    %610 = arith.divf %608, %609 : vector<8x32xf32>
    %611 = vector.extract_strided_slice %562 {offsets = [0, 64], sizes = [8, 32], strides = [1, 1]} : vector<8x96xf32> to vector<8x32xf32>
    %612 = vector.extract_strided_slice %568 {offsets = [0, 64], sizes = [8, 32], strides = [1, 1]} : vector<8x96xf32> to vector<8x32xf32>
    %613 = arith.mulf %602, %612 : vector<8x32xf32>
    %614 = arith.addf %611, %613 : vector<8x32xf32>
    %615 = math.tanh %614 : vector<8x32xf32>
    %cst_100 = arith.constant 1.000000e+00 : f32
    %616 = vector.broadcast %cst_100 : f32 to vector<8x32xf32>
    %617 = arith.subf %616, %610 : vector<8x32xf32>
    %618 = arith.mulf %617, %615 : vector<8x32xf32>
    %619 = arith.mulf %610, %560 : vector<8x32xf32>
    %620 = arith.addf %618, %619 : vector<8x32xf32>
    %621 = tpu.concatenate %54, %620 in 1 : vector<8x32xf32>, vector<8x32xf32> -> vector<8x64xf32>
    %622 = tpu.concatenate %114, %560 in 1 : vector<8x32xf32>, vector<8x32xf32> -> vector<8x64xf32>
    %623 = tpu.concatenate %174, %500 in 1 : vector<8x32xf32>, vector<8x32xf32> -> vector<8x64xf32>
    %624 = tpu.concatenate %234, %440 in 1 : vector<8x32xf32>, vector<8x32xf32> -> vector<8x64xf32>
    %625 = tpu.concatenate %294, %380 in 1 : vector<8x32xf32>, vector<8x32xf32> -> vector<8x64xf32>
    %626 = tpu.concatenate %354, %320 in 1 : vector<8x32xf32>, vector<8x32xf32> -> vector<8x64xf32>
    %627 = tpu.concatenate %414, %260 in 1 : vector<8x32xf32>, vector<8x32xf32> -> vector<8x64xf32>
    %628 = tpu.concatenate %474, %200 in 1 : vector<8x32xf32>, vector<8x32xf32> -> vector<8x64xf32>
    %629 = tpu.concatenate %534, %140 in 1 : vector<8x32xf32>, vector<8x32xf32> -> vector<8x64xf32>
    %630 = tpu.concatenate %594, %80 in 1 : vector<8x32xf32>, vector<8x32xf32> -> vector<8x64xf32>
    %631 = tpu.concatenate %621, %622, %623, %624, %625, %626, %627, %628, %629, %630 in 0 : vector<8x64xf32>, vector<8x64xf32>, vector<8x64xf32>, vector<8x64xf32>, vector<8x64xf32>, vector<8x64xf32>, vector<8x64xf32>, vector<8x64xf32>, vector<8x64xf32>, vector<8x64xf32> -> vector<80x64xf32>
    %c0_101 = arith.constant 0 : index
    %c0_102 = arith.constant 0 : index
    %632 = vector.load %arg9[%c0_101, %c0_102] : memref<64x96xf32, #tpu.memory_space<vmem>>, vector<64x96xf32>
    %cst_103 = arith.constant dense<0.000000e+00> : vector<80x96xf32>
    %633 = tpu.matmul %631, %632, %cst_103 {dimension_numbers = #tpu.dot_dimension_numbers<[1], [0], [0], [1], [0, 0, 1, 1], [], []>} : vector<80x64xf32>, vector<64x96xf32>, vector<80x96xf32> -> vector<80x96xf32>
    %c0_104 = arith.constant 0 : index
    %c0_105 = arith.constant 0 : index
    %634 = vector.load %arg10[%c0_104, %c0_105] : memref<1x96xf32, #tpu.memory_space<vmem>>, vector<1x96xf32>
    %635 = vector.broadcast %634 : vector<1x96xf32> to vector<80x96xf32>
    %636 = arith.addf %633, %635 : vector<80x96xf32>
    %c0_106 = arith.constant 0 : index
    %c0_107 = arith.constant 0 : index
    %637 = vector.load %arg13[%c0_106, %c0_107] : memref<64x96xf32, #tpu.memory_space<vmem>>, vector<64x96xf32>
    %cst_108 = arith.constant dense<0.000000e+00> : vector<80x96xf32>
    %638 = tpu.matmul %631, %637, %cst_108 {dimension_numbers = #tpu.dot_dimension_numbers<[1], [0], [0], [1], [0, 0, 1, 1], [], []>} : vector<80x64xf32>, vector<64x96xf32>, vector<80x96xf32> -> vector<80x96xf32>
    %c0_109 = arith.constant 0 : index
    %c0_110 = arith.constant 0 : index
    %639 = vector.load %arg14[%c0_109, %c0_110] : memref<1x96xf32, #tpu.memory_space<vmem>>, vector<1x96xf32>
    %640 = vector.broadcast %639 : vector<1x96xf32> to vector<80x96xf32>
    %641 = arith.addf %638, %640 : vector<80x96xf32>
    %c0_111 = arith.constant 0 : index
    %c0_112 = arith.constant 0 : index
    %642 = vector.load %arg11[%c0_111, %c0_112] : memref<32x96xf32, #tpu.memory_space<vmem>>, vector<32x96xf32>
    %c0_113 = arith.constant 0 : index
    %c0_114 = arith.constant 0 : index
    %643 = vector.load %arg12[%c0_113, %c0_114] : memref<1x96xf32, #tpu.memory_space<vmem>>, vector<1x96xf32>
    %c0_115 = arith.constant 0 : index
    %c0_116 = arith.constant 0 : index
    %644 = vector.load %arg15[%c0_115, %c0_116] : memref<32x96xf32, #tpu.memory_space<vmem>>, vector<32x96xf32>
    %c0_117 = arith.constant 0 : index
    %c0_118 = arith.constant 0 : index
    %645 = vector.load %arg16[%c0_117, %c0_118] : memref<1x96xf32, #tpu.memory_space<vmem>>, vector<1x96xf32>
    %cst_119 = arith.constant 0.000000e+00 : f32
    %646 = vector.broadcast %cst_119 : f32 to vector<8x32xf32>
    %cst_120 = arith.constant 0.000000e+00 : f32
    %647 = vector.broadcast %cst_120 : f32 to vector<8x32xf32>
    %648 = vector.extract_strided_slice %636 {offsets = [0, 0], sizes = [8, 96], strides = [1, 1]} : vector<80x96xf32> to vector<8x96xf32>
    %649 = vector.extract_strided_slice %641 {offsets = [72, 0], sizes = [8, 96], strides = [1, 1]} : vector<80x96xf32> to vector<8x96xf32>
    %cst_121 = arith.constant dense<0.000000e+00> : vector<8x96xf32>
    %650 = tpu.matmul %646, %642, %cst_121 {dimension_numbers = #tpu.dot_dimension_numbers<[1], [0], [0], [1], [0, 0, 1, 1], [], []>} : vector<8x32xf32>, vector<32x96xf32>, vector<8x96xf32> -> vector<8x96xf32>
    %651 = vector.broadcast %643 : vector<1x96xf32> to vector<8x96xf32>
    %652 = arith.addf %650, %651 : vector<8x96xf32>
    %cst_122 = arith.constant dense<0.000000e+00> : vector<8x96xf32>
    %653 = tpu.matmul %647, %644, %cst_122 {dimension_numbers = #tpu.dot_dimension_numbers<[1], [0], [0], [1], [0, 0, 1, 1], [], []>} : vector<8x32xf32>, vector<32x96xf32>, vector<8x96xf32> -> vector<8x96xf32>
    %654 = vector.broadcast %645 : vector<1x96xf32> to vector<8x96xf32>
    %655 = arith.addf %653, %654 : vector<8x96xf32>
    %656 = vector.extract_strided_slice %648 {offsets = [0, 0], sizes = [8, 32], strides = [1, 1]} : vector<8x96xf32> to vector<8x32xf32>
    %657 = vector.extract_strided_slice %652 {offsets = [0, 0], sizes = [8, 32], strides = [1, 1]} : vector<8x96xf32> to vector<8x32xf32>
    %658 = arith.addf %656, %657 : vector<8x32xf32>
    %659 = arith.negf %658 : vector<8x32xf32>
    %660 = math.exp %659 : vector<8x32xf32>
    %cst_123 = arith.constant 1.000000e+00 : f32
    %661 = vector.broadcast %cst_123 : f32 to vector<8x32xf32>
    %662 = arith.addf %661, %660 : vector<8x32xf32>
    %663 = arith.divf %661, %662 : vector<8x32xf32>
    %664 = vector.extract_strided_slice %648 {offsets = [0, 32], sizes = [8, 32], strides = [1, 1]} : vector<8x96xf32> to vector<8x32xf32>
    %665 = vector.extract_strided_slice %652 {offsets = [0, 32], sizes = [8, 32], strides = [1, 1]} : vector<8x96xf32> to vector<8x32xf32>
    %666 = arith.addf %664, %665 : vector<8x32xf32>
    %667 = arith.negf %666 : vector<8x32xf32>
    %668 = math.exp %667 : vector<8x32xf32>
    %cst_124 = arith.constant 1.000000e+00 : f32
    %669 = vector.broadcast %cst_124 : f32 to vector<8x32xf32>
    %670 = arith.addf %669, %668 : vector<8x32xf32>
    %671 = arith.divf %669, %670 : vector<8x32xf32>
    %672 = vector.extract_strided_slice %648 {offsets = [0, 64], sizes = [8, 32], strides = [1, 1]} : vector<8x96xf32> to vector<8x32xf32>
    %673 = vector.extract_strided_slice %652 {offsets = [0, 64], sizes = [8, 32], strides = [1, 1]} : vector<8x96xf32> to vector<8x32xf32>
    %674 = arith.mulf %663, %673 : vector<8x32xf32>
    %675 = arith.addf %672, %674 : vector<8x32xf32>
    %676 = math.tanh %675 : vector<8x32xf32>
    %cst_125 = arith.constant 1.000000e+00 : f32
    %677 = vector.broadcast %cst_125 : f32 to vector<8x32xf32>
    %678 = arith.subf %677, %671 : vector<8x32xf32>
    %679 = arith.mulf %678, %676 : vector<8x32xf32>
    %680 = arith.mulf %671, %646 : vector<8x32xf32>
    %681 = arith.addf %679, %680 : vector<8x32xf32>
    %682 = vector.extract_strided_slice %649 {offsets = [0, 0], sizes = [8, 32], strides = [1, 1]} : vector<8x96xf32> to vector<8x32xf32>
    %683 = vector.extract_strided_slice %655 {offsets = [0, 0], sizes = [8, 32], strides = [1, 1]} : vector<8x96xf32> to vector<8x32xf32>
    %684 = arith.addf %682, %683 : vector<8x32xf32>
    %685 = arith.negf %684 : vector<8x32xf32>
    %686 = math.exp %685 : vector<8x32xf32>
    %cst_126 = arith.constant 1.000000e+00 : f32
    %687 = vector.broadcast %cst_126 : f32 to vector<8x32xf32>
    %688 = arith.addf %687, %686 : vector<8x32xf32>
    %689 = arith.divf %687, %688 : vector<8x32xf32>
    %690 = vector.extract_strided_slice %649 {offsets = [0, 32], sizes = [8, 32], strides = [1, 1]} : vector<8x96xf32> to vector<8x32xf32>
    %691 = vector.extract_strided_slice %655 {offsets = [0, 32], sizes = [8, 32], strides = [1, 1]} : vector<8x96xf32> to vector<8x32xf32>
    %692 = arith.addf %690, %691 : vector<8x32xf32>
    %693 = arith.negf %692 : vector<8x32xf32>
    %694 = math.exp %693 : vector<8x32xf32>
    %cst_127 = arith.constant 1.000000e+00 : f32
    %695 = vector.broadcast %cst_127 : f32 to vector<8x32xf32>
    %696 = arith.addf %695, %694 : vector<8x32xf32>
    %697 = arith.divf %695, %696 : vector<8x32xf32>
    %698 = vector.extract_strided_slice %649 {offsets = [0, 64], sizes = [8, 32], strides = [1, 1]} : vector<8x96xf32> to vector<8x32xf32>
    %699 = vector.extract_strided_slice %655 {offsets = [0, 64], sizes = [8, 32], strides = [1, 1]} : vector<8x96xf32> to vector<8x32xf32>
    %700 = arith.mulf %689, %699 : vector<8x32xf32>
    %701 = arith.addf %698, %700 : vector<8x32xf32>
    %702 = math.tanh %701 : vector<8x32xf32>
    %cst_128 = arith.constant 1.000000e+00 : f32
    %703 = vector.broadcast %cst_128 : f32 to vector<8x32xf32>
    %704 = arith.subf %703, %697 : vector<8x32xf32>
    %705 = arith.mulf %704, %702 : vector<8x32xf32>
    %706 = arith.mulf %697, %647 : vector<8x32xf32>
    %707 = arith.addf %705, %706 : vector<8x32xf32>
    %708 = vector.extract_strided_slice %636 {offsets = [8, 0], sizes = [8, 96], strides = [1, 1]} : vector<80x96xf32> to vector<8x96xf32>
    %709 = vector.extract_strided_slice %641 {offsets = [64, 0], sizes = [8, 96], strides = [1, 1]} : vector<80x96xf32> to vector<8x96xf32>
    %cst_129 = arith.constant dense<0.000000e+00> : vector<8x96xf32>
    %710 = tpu.matmul %681, %642, %cst_129 {dimension_numbers = #tpu.dot_dimension_numbers<[1], [0], [0], [1], [0, 0, 1, 1], [], []>} : vector<8x32xf32>, vector<32x96xf32>, vector<8x96xf32> -> vector<8x96xf32>
    %711 = vector.broadcast %643 : vector<1x96xf32> to vector<8x96xf32>
    %712 = arith.addf %710, %711 : vector<8x96xf32>
    %cst_130 = arith.constant dense<0.000000e+00> : vector<8x96xf32>
    %713 = tpu.matmul %707, %644, %cst_130 {dimension_numbers = #tpu.dot_dimension_numbers<[1], [0], [0], [1], [0, 0, 1, 1], [], []>} : vector<8x32xf32>, vector<32x96xf32>, vector<8x96xf32> -> vector<8x96xf32>
    %714 = vector.broadcast %645 : vector<1x96xf32> to vector<8x96xf32>
    %715 = arith.addf %713, %714 : vector<8x96xf32>
    %716 = vector.extract_strided_slice %708 {offsets = [0, 0], sizes = [8, 32], strides = [1, 1]} : vector<8x96xf32> to vector<8x32xf32>
    %717 = vector.extract_strided_slice %712 {offsets = [0, 0], sizes = [8, 32], strides = [1, 1]} : vector<8x96xf32> to vector<8x32xf32>
    %718 = arith.addf %716, %717 : vector<8x32xf32>
    %719 = arith.negf %718 : vector<8x32xf32>
    %720 = math.exp %719 : vector<8x32xf32>
    %cst_131 = arith.constant 1.000000e+00 : f32
    %721 = vector.broadcast %cst_131 : f32 to vector<8x32xf32>
    %722 = arith.addf %721, %720 : vector<8x32xf32>
    %723 = arith.divf %721, %722 : vector<8x32xf32>
    %724 = vector.extract_strided_slice %708 {offsets = [0, 32], sizes = [8, 32], strides = [1, 1]} : vector<8x96xf32> to vector<8x32xf32>
    %725 = vector.extract_strided_slice %712 {offsets = [0, 32], sizes = [8, 32], strides = [1, 1]} : vector<8x96xf32> to vector<8x32xf32>
    %726 = arith.addf %724, %725 : vector<8x32xf32>
    %727 = arith.negf %726 : vector<8x32xf32>
    %728 = math.exp %727 : vector<8x32xf32>
    %cst_132 = arith.constant 1.000000e+00 : f32
    %729 = vector.broadcast %cst_132 : f32 to vector<8x32xf32>
    %730 = arith.addf %729, %728 : vector<8x32xf32>
    %731 = arith.divf %729, %730 : vector<8x32xf32>
    %732 = vector.extract_strided_slice %708 {offsets = [0, 64], sizes = [8, 32], strides = [1, 1]} : vector<8x96xf32> to vector<8x32xf32>
    %733 = vector.extract_strided_slice %712 {offsets = [0, 64], sizes = [8, 32], strides = [1, 1]} : vector<8x96xf32> to vector<8x32xf32>
    %734 = arith.mulf %723, %733 : vector<8x32xf32>
    %735 = arith.addf %732, %734 : vector<8x32xf32>
    %736 = math.tanh %735 : vector<8x32xf32>
    %cst_133 = arith.constant 1.000000e+00 : f32
    %737 = vector.broadcast %cst_133 : f32 to vector<8x32xf32>
    %738 = arith.subf %737, %731 : vector<8x32xf32>
    %739 = arith.mulf %738, %736 : vector<8x32xf32>
    %740 = arith.mulf %731, %681 : vector<8x32xf32>
    %741 = arith.addf %739, %740 : vector<8x32xf32>
    %742 = vector.extract_strided_slice %709 {offsets = [0, 0], sizes = [8, 32], strides = [1, 1]} : vector<8x96xf32> to vector<8x32xf32>
    %743 = vector.extract_strided_slice %715 {offsets = [0, 0], sizes = [8, 32], strides = [1, 1]} : vector<8x96xf32> to vector<8x32xf32>
    %744 = arith.addf %742, %743 : vector<8x32xf32>
    %745 = arith.negf %744 : vector<8x32xf32>
    %746 = math.exp %745 : vector<8x32xf32>
    %cst_134 = arith.constant 1.000000e+00 : f32
    %747 = vector.broadcast %cst_134 : f32 to vector<8x32xf32>
    %748 = arith.addf %747, %746 : vector<8x32xf32>
    %749 = arith.divf %747, %748 : vector<8x32xf32>
    %750 = vector.extract_strided_slice %709 {offsets = [0, 32], sizes = [8, 32], strides = [1, 1]} : vector<8x96xf32> to vector<8x32xf32>
    %751 = vector.extract_strided_slice %715 {offsets = [0, 32], sizes = [8, 32], strides = [1, 1]} : vector<8x96xf32> to vector<8x32xf32>
    %752 = arith.addf %750, %751 : vector<8x32xf32>
    %753 = arith.negf %752 : vector<8x32xf32>
    %754 = math.exp %753 : vector<8x32xf32>
    %cst_135 = arith.constant 1.000000e+00 : f32
    %755 = vector.broadcast %cst_135 : f32 to vector<8x32xf32>
    %756 = arith.addf %755, %754 : vector<8x32xf32>
    %757 = arith.divf %755, %756 : vector<8x32xf32>
    %758 = vector.extract_strided_slice %709 {offsets = [0, 64], sizes = [8, 32], strides = [1, 1]} : vector<8x96xf32> to vector<8x32xf32>
    %759 = vector.extract_strided_slice %715 {offsets = [0, 64], sizes = [8, 32], strides = [1, 1]} : vector<8x96xf32> to vector<8x32xf32>
    %760 = arith.mulf %749, %759 : vector<8x32xf32>
    %761 = arith.addf %758, %760 : vector<8x32xf32>
    %762 = math.tanh %761 : vector<8x32xf32>
    %cst_136 = arith.constant 1.000000e+00 : f32
    %763 = vector.broadcast %cst_136 : f32 to vector<8x32xf32>
    %764 = arith.subf %763, %757 : vector<8x32xf32>
    %765 = arith.mulf %764, %762 : vector<8x32xf32>
    %766 = arith.mulf %757, %707 : vector<8x32xf32>
    %767 = arith.addf %765, %766 : vector<8x32xf32>
    %768 = vector.extract_strided_slice %636 {offsets = [16, 0], sizes = [8, 96], strides = [1, 1]} : vector<80x96xf32> to vector<8x96xf32>
    %769 = vector.extract_strided_slice %641 {offsets = [56, 0], sizes = [8, 96], strides = [1, 1]} : vector<80x96xf32> to vector<8x96xf32>
    %cst_137 = arith.constant dense<0.000000e+00> : vector<8x96xf32>
    %770 = tpu.matmul %741, %642, %cst_137 {dimension_numbers = #tpu.dot_dimension_numbers<[1], [0], [0], [1], [0, 0, 1, 1], [], []>} : vector<8x32xf32>, vector<32x96xf32>, vector<8x96xf32> -> vector<8x96xf32>
    %771 = vector.broadcast %643 : vector<1x96xf32> to vector<8x96xf32>
    %772 = arith.addf %770, %771 : vector<8x96xf32>
    %cst_138 = arith.constant dense<0.000000e+00> : vector<8x96xf32>
    %773 = tpu.matmul %767, %644, %cst_138 {dimension_numbers = #tpu.dot_dimension_numbers<[1], [0], [0], [1], [0, 0, 1, 1], [], []>} : vector<8x32xf32>, vector<32x96xf32>, vector<8x96xf32> -> vector<8x96xf32>
    %774 = vector.broadcast %645 : vector<1x96xf32> to vector<8x96xf32>
    %775 = arith.addf %773, %774 : vector<8x96xf32>
    %776 = vector.extract_strided_slice %768 {offsets = [0, 0], sizes = [8, 32], strides = [1, 1]} : vector<8x96xf32> to vector<8x32xf32>
    %777 = vector.extract_strided_slice %772 {offsets = [0, 0], sizes = [8, 32], strides = [1, 1]} : vector<8x96xf32> to vector<8x32xf32>
    %778 = arith.addf %776, %777 : vector<8x32xf32>
    %779 = arith.negf %778 : vector<8x32xf32>
    %780 = math.exp %779 : vector<8x32xf32>
    %cst_139 = arith.constant 1.000000e+00 : f32
    %781 = vector.broadcast %cst_139 : f32 to vector<8x32xf32>
    %782 = arith.addf %781, %780 : vector<8x32xf32>
    %783 = arith.divf %781, %782 : vector<8x32xf32>
    %784 = vector.extract_strided_slice %768 {offsets = [0, 32], sizes = [8, 32], strides = [1, 1]} : vector<8x96xf32> to vector<8x32xf32>
    %785 = vector.extract_strided_slice %772 {offsets = [0, 32], sizes = [8, 32], strides = [1, 1]} : vector<8x96xf32> to vector<8x32xf32>
    %786 = arith.addf %784, %785 : vector<8x32xf32>
    %787 = arith.negf %786 : vector<8x32xf32>
    %788 = math.exp %787 : vector<8x32xf32>
    %cst_140 = arith.constant 1.000000e+00 : f32
    %789 = vector.broadcast %cst_140 : f32 to vector<8x32xf32>
    %790 = arith.addf %789, %788 : vector<8x32xf32>
    %791 = arith.divf %789, %790 : vector<8x32xf32>
    %792 = vector.extract_strided_slice %768 {offsets = [0, 64], sizes = [8, 32], strides = [1, 1]} : vector<8x96xf32> to vector<8x32xf32>
    %793 = vector.extract_strided_slice %772 {offsets = [0, 64], sizes = [8, 32], strides = [1, 1]} : vector<8x96xf32> to vector<8x32xf32>
    %794 = arith.mulf %783, %793 : vector<8x32xf32>
    %795 = arith.addf %792, %794 : vector<8x32xf32>
    %796 = math.tanh %795 : vector<8x32xf32>
    %cst_141 = arith.constant 1.000000e+00 : f32
    %797 = vector.broadcast %cst_141 : f32 to vector<8x32xf32>
    %798 = arith.subf %797, %791 : vector<8x32xf32>
    %799 = arith.mulf %798, %796 : vector<8x32xf32>
    %800 = arith.mulf %791, %741 : vector<8x32xf32>
    %801 = arith.addf %799, %800 : vector<8x32xf32>
    %802 = vector.extract_strided_slice %769 {offsets = [0, 0], sizes = [8, 32], strides = [1, 1]} : vector<8x96xf32> to vector<8x32xf32>
    %803 = vector.extract_strided_slice %775 {offsets = [0, 0], sizes = [8, 32], strides = [1, 1]} : vector<8x96xf32> to vector<8x32xf32>
    %804 = arith.addf %802, %803 : vector<8x32xf32>
    %805 = arith.negf %804 : vector<8x32xf32>
    %806 = math.exp %805 : vector<8x32xf32>
    %cst_142 = arith.constant 1.000000e+00 : f32
    %807 = vector.broadcast %cst_142 : f32 to vector<8x32xf32>
    %808 = arith.addf %807, %806 : vector<8x32xf32>
    %809 = arith.divf %807, %808 : vector<8x32xf32>
    %810 = vector.extract_strided_slice %769 {offsets = [0, 32], sizes = [8, 32], strides = [1, 1]} : vector<8x96xf32> to vector<8x32xf32>
    %811 = vector.extract_strided_slice %775 {offsets = [0, 32], sizes = [8, 32], strides = [1, 1]} : vector<8x96xf32> to vector<8x32xf32>
    %812 = arith.addf %810, %811 : vector<8x32xf32>
    %813 = arith.negf %812 : vector<8x32xf32>
    %814 = math.exp %813 : vector<8x32xf32>
    %cst_143 = arith.constant 1.000000e+00 : f32
    %815 = vector.broadcast %cst_143 : f32 to vector<8x32xf32>
    %816 = arith.addf %815, %814 : vector<8x32xf32>
    %817 = arith.divf %815, %816 : vector<8x32xf32>
    %818 = vector.extract_strided_slice %769 {offsets = [0, 64], sizes = [8, 32], strides = [1, 1]} : vector<8x96xf32> to vector<8x32xf32>
    %819 = vector.extract_strided_slice %775 {offsets = [0, 64], sizes = [8, 32], strides = [1, 1]} : vector<8x96xf32> to vector<8x32xf32>
    %820 = arith.mulf %809, %819 : vector<8x32xf32>
    %821 = arith.addf %818, %820 : vector<8x32xf32>
    %822 = math.tanh %821 : vector<8x32xf32>
    %cst_144 = arith.constant 1.000000e+00 : f32
    %823 = vector.broadcast %cst_144 : f32 to vector<8x32xf32>
    %824 = arith.subf %823, %817 : vector<8x32xf32>
    %825 = arith.mulf %824, %822 : vector<8x32xf32>
    %826 = arith.mulf %817, %767 : vector<8x32xf32>
    %827 = arith.addf %825, %826 : vector<8x32xf32>
    %828 = vector.extract_strided_slice %636 {offsets = [24, 0], sizes = [8, 96], strides = [1, 1]} : vector<80x96xf32> to vector<8x96xf32>
    %829 = vector.extract_strided_slice %641 {offsets = [48, 0], sizes = [8, 96], strides = [1, 1]} : vector<80x96xf32> to vector<8x96xf32>
    %cst_145 = arith.constant dense<0.000000e+00> : vector<8x96xf32>
    %830 = tpu.matmul %801, %642, %cst_145 {dimension_numbers = #tpu.dot_dimension_numbers<[1], [0], [0], [1], [0, 0, 1, 1], [], []>} : vector<8x32xf32>, vector<32x96xf32>, vector<8x96xf32> -> vector<8x96xf32>
    %831 = vector.broadcast %643 : vector<1x96xf32> to vector<8x96xf32>
    %832 = arith.addf %830, %831 : vector<8x96xf32>
    %cst_146 = arith.constant dense<0.000000e+00> : vector<8x96xf32>
    %833 = tpu.matmul %827, %644, %cst_146 {dimension_numbers = #tpu.dot_dimension_numbers<[1], [0], [0], [1], [0, 0, 1, 1], [], []>} : vector<8x32xf32>, vector<32x96xf32>, vector<8x96xf32> -> vector<8x96xf32>
    %834 = vector.broadcast %645 : vector<1x96xf32> to vector<8x96xf32>
    %835 = arith.addf %833, %834 : vector<8x96xf32>
    %836 = vector.extract_strided_slice %828 {offsets = [0, 0], sizes = [8, 32], strides = [1, 1]} : vector<8x96xf32> to vector<8x32xf32>
    %837 = vector.extract_strided_slice %832 {offsets = [0, 0], sizes = [8, 32], strides = [1, 1]} : vector<8x96xf32> to vector<8x32xf32>
    %838 = arith.addf %836, %837 : vector<8x32xf32>
    %839 = arith.negf %838 : vector<8x32xf32>
    %840 = math.exp %839 : vector<8x32xf32>
    %cst_147 = arith.constant 1.000000e+00 : f32
    %841 = vector.broadcast %cst_147 : f32 to vector<8x32xf32>
    %842 = arith.addf %841, %840 : vector<8x32xf32>
    %843 = arith.divf %841, %842 : vector<8x32xf32>
    %844 = vector.extract_strided_slice %828 {offsets = [0, 32], sizes = [8, 32], strides = [1, 1]} : vector<8x96xf32> to vector<8x32xf32>
    %845 = vector.extract_strided_slice %832 {offsets = [0, 32], sizes = [8, 32], strides = [1, 1]} : vector<8x96xf32> to vector<8x32xf32>
    %846 = arith.addf %844, %845 : vector<8x32xf32>
    %847 = arith.negf %846 : vector<8x32xf32>
    %848 = math.exp %847 : vector<8x32xf32>
    %cst_148 = arith.constant 1.000000e+00 : f32
    %849 = vector.broadcast %cst_148 : f32 to vector<8x32xf32>
    %850 = arith.addf %849, %848 : vector<8x32xf32>
    %851 = arith.divf %849, %850 : vector<8x32xf32>
    %852 = vector.extract_strided_slice %828 {offsets = [0, 64], sizes = [8, 32], strides = [1, 1]} : vector<8x96xf32> to vector<8x32xf32>
    %853 = vector.extract_strided_slice %832 {offsets = [0, 64], sizes = [8, 32], strides = [1, 1]} : vector<8x96xf32> to vector<8x32xf32>
    %854 = arith.mulf %843, %853 : vector<8x32xf32>
    %855 = arith.addf %852, %854 : vector<8x32xf32>
    %856 = math.tanh %855 : vector<8x32xf32>
    %cst_149 = arith.constant 1.000000e+00 : f32
    %857 = vector.broadcast %cst_149 : f32 to vector<8x32xf32>
    %858 = arith.subf %857, %851 : vector<8x32xf32>
    %859 = arith.mulf %858, %856 : vector<8x32xf32>
    %860 = arith.mulf %851, %801 : vector<8x32xf32>
    %861 = arith.addf %859, %860 : vector<8x32xf32>
    %862 = vector.extract_strided_slice %829 {offsets = [0, 0], sizes = [8, 32], strides = [1, 1]} : vector<8x96xf32> to vector<8x32xf32>
    %863 = vector.extract_strided_slice %835 {offsets = [0, 0], sizes = [8, 32], strides = [1, 1]} : vector<8x96xf32> to vector<8x32xf32>
    %864 = arith.addf %862, %863 : vector<8x32xf32>
    %865 = arith.negf %864 : vector<8x32xf32>
    %866 = math.exp %865 : vector<8x32xf32>
    %cst_150 = arith.constant 1.000000e+00 : f32
    %867 = vector.broadcast %cst_150 : f32 to vector<8x32xf32>
    %868 = arith.addf %867, %866 : vector<8x32xf32>
    %869 = arith.divf %867, %868 : vector<8x32xf32>
    %870 = vector.extract_strided_slice %829 {offsets = [0, 32], sizes = [8, 32], strides = [1, 1]} : vector<8x96xf32> to vector<8x32xf32>
    %871 = vector.extract_strided_slice %835 {offsets = [0, 32], sizes = [8, 32], strides = [1, 1]} : vector<8x96xf32> to vector<8x32xf32>
    %872 = arith.addf %870, %871 : vector<8x32xf32>
    %873 = arith.negf %872 : vector<8x32xf32>
    %874 = math.exp %873 : vector<8x32xf32>
    %cst_151 = arith.constant 1.000000e+00 : f32
    %875 = vector.broadcast %cst_151 : f32 to vector<8x32xf32>
    %876 = arith.addf %875, %874 : vector<8x32xf32>
    %877 = arith.divf %875, %876 : vector<8x32xf32>
    %878 = vector.extract_strided_slice %829 {offsets = [0, 64], sizes = [8, 32], strides = [1, 1]} : vector<8x96xf32> to vector<8x32xf32>
    %879 = vector.extract_strided_slice %835 {offsets = [0, 64], sizes = [8, 32], strides = [1, 1]} : vector<8x96xf32> to vector<8x32xf32>
    %880 = arith.mulf %869, %879 : vector<8x32xf32>
    %881 = arith.addf %878, %880 : vector<8x32xf32>
    %882 = math.tanh %881 : vector<8x32xf32>
    %cst_152 = arith.constant 1.000000e+00 : f32
    %883 = vector.broadcast %cst_152 : f32 to vector<8x32xf32>
    %884 = arith.subf %883, %877 : vector<8x32xf32>
    %885 = arith.mulf %884, %882 : vector<8x32xf32>
    %886 = arith.mulf %877, %827 : vector<8x32xf32>
    %887 = arith.addf %885, %886 : vector<8x32xf32>
    %888 = vector.extract_strided_slice %636 {offsets = [32, 0], sizes = [8, 96], strides = [1, 1]} : vector<80x96xf32> to vector<8x96xf32>
    %889 = vector.extract_strided_slice %641 {offsets = [40, 0], sizes = [8, 96], strides = [1, 1]} : vector<80x96xf32> to vector<8x96xf32>
    %cst_153 = arith.constant dense<0.000000e+00> : vector<8x96xf32>
    %890 = tpu.matmul %861, %642, %cst_153 {dimension_numbers = #tpu.dot_dimension_numbers<[1], [0], [0], [1], [0, 0, 1, 1], [], []>} : vector<8x32xf32>, vector<32x96xf32>, vector<8x96xf32> -> vector<8x96xf32>
    %891 = vector.broadcast %643 : vector<1x96xf32> to vector<8x96xf32>
    %892 = arith.addf %890, %891 : vector<8x96xf32>
    %cst_154 = arith.constant dense<0.000000e+00> : vector<8x96xf32>
    %893 = tpu.matmul %887, %644, %cst_154 {dimension_numbers = #tpu.dot_dimension_numbers<[1], [0], [0], [1], [0, 0, 1, 1], [], []>} : vector<8x32xf32>, vector<32x96xf32>, vector<8x96xf32> -> vector<8x96xf32>
    %894 = vector.broadcast %645 : vector<1x96xf32> to vector<8x96xf32>
    %895 = arith.addf %893, %894 : vector<8x96xf32>
    %896 = vector.extract_strided_slice %888 {offsets = [0, 0], sizes = [8, 32], strides = [1, 1]} : vector<8x96xf32> to vector<8x32xf32>
    %897 = vector.extract_strided_slice %892 {offsets = [0, 0], sizes = [8, 32], strides = [1, 1]} : vector<8x96xf32> to vector<8x32xf32>
    %898 = arith.addf %896, %897 : vector<8x32xf32>
    %899 = arith.negf %898 : vector<8x32xf32>
    %900 = math.exp %899 : vector<8x32xf32>
    %cst_155 = arith.constant 1.000000e+00 : f32
    %901 = vector.broadcast %cst_155 : f32 to vector<8x32xf32>
    %902 = arith.addf %901, %900 : vector<8x32xf32>
    %903 = arith.divf %901, %902 : vector<8x32xf32>
    %904 = vector.extract_strided_slice %888 {offsets = [0, 32], sizes = [8, 32], strides = [1, 1]} : vector<8x96xf32> to vector<8x32xf32>
    %905 = vector.extract_strided_slice %892 {offsets = [0, 32], sizes = [8, 32], strides = [1, 1]} : vector<8x96xf32> to vector<8x32xf32>
    %906 = arith.addf %904, %905 : vector<8x32xf32>
    %907 = arith.negf %906 : vector<8x32xf32>
    %908 = math.exp %907 : vector<8x32xf32>
    %cst_156 = arith.constant 1.000000e+00 : f32
    %909 = vector.broadcast %cst_156 : f32 to vector<8x32xf32>
    %910 = arith.addf %909, %908 : vector<8x32xf32>
    %911 = arith.divf %909, %910 : vector<8x32xf32>
    %912 = vector.extract_strided_slice %888 {offsets = [0, 64], sizes = [8, 32], strides = [1, 1]} : vector<8x96xf32> to vector<8x32xf32>
    %913 = vector.extract_strided_slice %892 {offsets = [0, 64], sizes = [8, 32], strides = [1, 1]} : vector<8x96xf32> to vector<8x32xf32>
    %914 = arith.mulf %903, %913 : vector<8x32xf32>
    %915 = arith.addf %912, %914 : vector<8x32xf32>
    %916 = math.tanh %915 : vector<8x32xf32>
    %cst_157 = arith.constant 1.000000e+00 : f32
    %917 = vector.broadcast %cst_157 : f32 to vector<8x32xf32>
    %918 = arith.subf %917, %911 : vector<8x32xf32>
    %919 = arith.mulf %918, %916 : vector<8x32xf32>
    %920 = arith.mulf %911, %861 : vector<8x32xf32>
    %921 = arith.addf %919, %920 : vector<8x32xf32>
    %922 = vector.extract_strided_slice %889 {offsets = [0, 0], sizes = [8, 32], strides = [1, 1]} : vector<8x96xf32> to vector<8x32xf32>
    %923 = vector.extract_strided_slice %895 {offsets = [0, 0], sizes = [8, 32], strides = [1, 1]} : vector<8x96xf32> to vector<8x32xf32>
    %924 = arith.addf %922, %923 : vector<8x32xf32>
    %925 = arith.negf %924 : vector<8x32xf32>
    %926 = math.exp %925 : vector<8x32xf32>
    %cst_158 = arith.constant 1.000000e+00 : f32
    %927 = vector.broadcast %cst_158 : f32 to vector<8x32xf32>
    %928 = arith.addf %927, %926 : vector<8x32xf32>
    %929 = arith.divf %927, %928 : vector<8x32xf32>
    %930 = vector.extract_strided_slice %889 {offsets = [0, 32], sizes = [8, 32], strides = [1, 1]} : vector<8x96xf32> to vector<8x32xf32>
    %931 = vector.extract_strided_slice %895 {offsets = [0, 32], sizes = [8, 32], strides = [1, 1]} : vector<8x96xf32> to vector<8x32xf32>
    %932 = arith.addf %930, %931 : vector<8x32xf32>
    %933 = arith.negf %932 : vector<8x32xf32>
    %934 = math.exp %933 : vector<8x32xf32>
    %cst_159 = arith.constant 1.000000e+00 : f32
    %935 = vector.broadcast %cst_159 : f32 to vector<8x32xf32>
    %936 = arith.addf %935, %934 : vector<8x32xf32>
    %937 = arith.divf %935, %936 : vector<8x32xf32>
    %938 = vector.extract_strided_slice %889 {offsets = [0, 64], sizes = [8, 32], strides = [1, 1]} : vector<8x96xf32> to vector<8x32xf32>
    %939 = vector.extract_strided_slice %895 {offsets = [0, 64], sizes = [8, 32], strides = [1, 1]} : vector<8x96xf32> to vector<8x32xf32>
    %940 = arith.mulf %929, %939 : vector<8x32xf32>
    %941 = arith.addf %938, %940 : vector<8x32xf32>
    %942 = math.tanh %941 : vector<8x32xf32>
    %cst_160 = arith.constant 1.000000e+00 : f32
    %943 = vector.broadcast %cst_160 : f32 to vector<8x32xf32>
    %944 = arith.subf %943, %937 : vector<8x32xf32>
    %945 = arith.mulf %944, %942 : vector<8x32xf32>
    %946 = arith.mulf %937, %887 : vector<8x32xf32>
    %947 = arith.addf %945, %946 : vector<8x32xf32>
    %948 = vector.extract_strided_slice %636 {offsets = [40, 0], sizes = [8, 96], strides = [1, 1]} : vector<80x96xf32> to vector<8x96xf32>
    %949 = vector.extract_strided_slice %641 {offsets = [32, 0], sizes = [8, 96], strides = [1, 1]} : vector<80x96xf32> to vector<8x96xf32>
    %cst_161 = arith.constant dense<0.000000e+00> : vector<8x96xf32>
    %950 = tpu.matmul %921, %642, %cst_161 {dimension_numbers = #tpu.dot_dimension_numbers<[1], [0], [0], [1], [0, 0, 1, 1], [], []>} : vector<8x32xf32>, vector<32x96xf32>, vector<8x96xf32> -> vector<8x96xf32>
    %951 = vector.broadcast %643 : vector<1x96xf32> to vector<8x96xf32>
    %952 = arith.addf %950, %951 : vector<8x96xf32>
    %cst_162 = arith.constant dense<0.000000e+00> : vector<8x96xf32>
    %953 = tpu.matmul %947, %644, %cst_162 {dimension_numbers = #tpu.dot_dimension_numbers<[1], [0], [0], [1], [0, 0, 1, 1], [], []>} : vector<8x32xf32>, vector<32x96xf32>, vector<8x96xf32> -> vector<8x96xf32>
    %954 = vector.broadcast %645 : vector<1x96xf32> to vector<8x96xf32>
    %955 = arith.addf %953, %954 : vector<8x96xf32>
    %956 = vector.extract_strided_slice %948 {offsets = [0, 0], sizes = [8, 32], strides = [1, 1]} : vector<8x96xf32> to vector<8x32xf32>
    %957 = vector.extract_strided_slice %952 {offsets = [0, 0], sizes = [8, 32], strides = [1, 1]} : vector<8x96xf32> to vector<8x32xf32>
    %958 = arith.addf %956, %957 : vector<8x32xf32>
    %959 = arith.negf %958 : vector<8x32xf32>
    %960 = math.exp %959 : vector<8x32xf32>
    %cst_163 = arith.constant 1.000000e+00 : f32
    %961 = vector.broadcast %cst_163 : f32 to vector<8x32xf32>
    %962 = arith.addf %961, %960 : vector<8x32xf32>
    %963 = arith.divf %961, %962 : vector<8x32xf32>
    %964 = vector.extract_strided_slice %948 {offsets = [0, 32], sizes = [8, 32], strides = [1, 1]} : vector<8x96xf32> to vector<8x32xf32>
    %965 = vector.extract_strided_slice %952 {offsets = [0, 32], sizes = [8, 32], strides = [1, 1]} : vector<8x96xf32> to vector<8x32xf32>
    %966 = arith.addf %964, %965 : vector<8x32xf32>
    %967 = arith.negf %966 : vector<8x32xf32>
    %968 = math.exp %967 : vector<8x32xf32>
    %cst_164 = arith.constant 1.000000e+00 : f32
    %969 = vector.broadcast %cst_164 : f32 to vector<8x32xf32>
    %970 = arith.addf %969, %968 : vector<8x32xf32>
    %971 = arith.divf %969, %970 : vector<8x32xf32>
    %972 = vector.extract_strided_slice %948 {offsets = [0, 64], sizes = [8, 32], strides = [1, 1]} : vector<8x96xf32> to vector<8x32xf32>
    %973 = vector.extract_strided_slice %952 {offsets = [0, 64], sizes = [8, 32], strides = [1, 1]} : vector<8x96xf32> to vector<8x32xf32>
    %974 = arith.mulf %963, %973 : vector<8x32xf32>
    %975 = arith.addf %972, %974 : vector<8x32xf32>
    %976 = math.tanh %975 : vector<8x32xf32>
    %cst_165 = arith.constant 1.000000e+00 : f32
    %977 = vector.broadcast %cst_165 : f32 to vector<8x32xf32>
    %978 = arith.subf %977, %971 : vector<8x32xf32>
    %979 = arith.mulf %978, %976 : vector<8x32xf32>
    %980 = arith.mulf %971, %921 : vector<8x32xf32>
    %981 = arith.addf %979, %980 : vector<8x32xf32>
    %982 = vector.extract_strided_slice %949 {offsets = [0, 0], sizes = [8, 32], strides = [1, 1]} : vector<8x96xf32> to vector<8x32xf32>
    %983 = vector.extract_strided_slice %955 {offsets = [0, 0], sizes = [8, 32], strides = [1, 1]} : vector<8x96xf32> to vector<8x32xf32>
    %984 = arith.addf %982, %983 : vector<8x32xf32>
    %985 = arith.negf %984 : vector<8x32xf32>
    %986 = math.exp %985 : vector<8x32xf32>
    %cst_166 = arith.constant 1.000000e+00 : f32
    %987 = vector.broadcast %cst_166 : f32 to vector<8x32xf32>
    %988 = arith.addf %987, %986 : vector<8x32xf32>
    %989 = arith.divf %987, %988 : vector<8x32xf32>
    %990 = vector.extract_strided_slice %949 {offsets = [0, 32], sizes = [8, 32], strides = [1, 1]} : vector<8x96xf32> to vector<8x32xf32>
    %991 = vector.extract_strided_slice %955 {offsets = [0, 32], sizes = [8, 32], strides = [1, 1]} : vector<8x96xf32> to vector<8x32xf32>
    %992 = arith.addf %990, %991 : vector<8x32xf32>
    %993 = arith.negf %992 : vector<8x32xf32>
    %994 = math.exp %993 : vector<8x32xf32>
    %cst_167 = arith.constant 1.000000e+00 : f32
    %995 = vector.broadcast %cst_167 : f32 to vector<8x32xf32>
    %996 = arith.addf %995, %994 : vector<8x32xf32>
    %997 = arith.divf %995, %996 : vector<8x32xf32>
    %998 = vector.extract_strided_slice %949 {offsets = [0, 64], sizes = [8, 32], strides = [1, 1]} : vector<8x96xf32> to vector<8x32xf32>
    %999 = vector.extract_strided_slice %955 {offsets = [0, 64], sizes = [8, 32], strides = [1, 1]} : vector<8x96xf32> to vector<8x32xf32>
    %1000 = arith.mulf %989, %999 : vector<8x32xf32>
    %1001 = arith.addf %998, %1000 : vector<8x32xf32>
    %1002 = math.tanh %1001 : vector<8x32xf32>
    %cst_168 = arith.constant 1.000000e+00 : f32
    %1003 = vector.broadcast %cst_168 : f32 to vector<8x32xf32>
    %1004 = arith.subf %1003, %997 : vector<8x32xf32>
    %1005 = arith.mulf %1004, %1002 : vector<8x32xf32>
    %1006 = arith.mulf %997, %947 : vector<8x32xf32>
    %1007 = arith.addf %1005, %1006 : vector<8x32xf32>
    %1008 = vector.extract_strided_slice %636 {offsets = [48, 0], sizes = [8, 96], strides = [1, 1]} : vector<80x96xf32> to vector<8x96xf32>
    %1009 = vector.extract_strided_slice %641 {offsets = [24, 0], sizes = [8, 96], strides = [1, 1]} : vector<80x96xf32> to vector<8x96xf32>
    %cst_169 = arith.constant dense<0.000000e+00> : vector<8x96xf32>
    %1010 = tpu.matmul %981, %642, %cst_169 {dimension_numbers = #tpu.dot_dimension_numbers<[1], [0], [0], [1], [0, 0, 1, 1], [], []>} : vector<8x32xf32>, vector<32x96xf32>, vector<8x96xf32> -> vector<8x96xf32>
    %1011 = vector.broadcast %643 : vector<1x96xf32> to vector<8x96xf32>
    %1012 = arith.addf %1010, %1011 : vector<8x96xf32>
    %cst_170 = arith.constant dense<0.000000e+00> : vector<8x96xf32>
    %1013 = tpu.matmul %1007, %644, %cst_170 {dimension_numbers = #tpu.dot_dimension_numbers<[1], [0], [0], [1], [0, 0, 1, 1], [], []>} : vector<8x32xf32>, vector<32x96xf32>, vector<8x96xf32> -> vector<8x96xf32>
    %1014 = vector.broadcast %645 : vector<1x96xf32> to vector<8x96xf32>
    %1015 = arith.addf %1013, %1014 : vector<8x96xf32>
    %1016 = vector.extract_strided_slice %1008 {offsets = [0, 0], sizes = [8, 32], strides = [1, 1]} : vector<8x96xf32> to vector<8x32xf32>
    %1017 = vector.extract_strided_slice %1012 {offsets = [0, 0], sizes = [8, 32], strides = [1, 1]} : vector<8x96xf32> to vector<8x32xf32>
    %1018 = arith.addf %1016, %1017 : vector<8x32xf32>
    %1019 = arith.negf %1018 : vector<8x32xf32>
    %1020 = math.exp %1019 : vector<8x32xf32>
    %cst_171 = arith.constant 1.000000e+00 : f32
    %1021 = vector.broadcast %cst_171 : f32 to vector<8x32xf32>
    %1022 = arith.addf %1021, %1020 : vector<8x32xf32>
    %1023 = arith.divf %1021, %1022 : vector<8x32xf32>
    %1024 = vector.extract_strided_slice %1008 {offsets = [0, 32], sizes = [8, 32], strides = [1, 1]} : vector<8x96xf32> to vector<8x32xf32>
    %1025 = vector.extract_strided_slice %1012 {offsets = [0, 32], sizes = [8, 32], strides = [1, 1]} : vector<8x96xf32> to vector<8x32xf32>
    %1026 = arith.addf %1024, %1025 : vector<8x32xf32>
    %1027 = arith.negf %1026 : vector<8x32xf32>
    %1028 = math.exp %1027 : vector<8x32xf32>
    %cst_172 = arith.constant 1.000000e+00 : f32
    %1029 = vector.broadcast %cst_172 : f32 to vector<8x32xf32>
    %1030 = arith.addf %1029, %1028 : vector<8x32xf32>
    %1031 = arith.divf %1029, %1030 : vector<8x32xf32>
    %1032 = vector.extract_strided_slice %1008 {offsets = [0, 64], sizes = [8, 32], strides = [1, 1]} : vector<8x96xf32> to vector<8x32xf32>
    %1033 = vector.extract_strided_slice %1012 {offsets = [0, 64], sizes = [8, 32], strides = [1, 1]} : vector<8x96xf32> to vector<8x32xf32>
    %1034 = arith.mulf %1023, %1033 : vector<8x32xf32>
    %1035 = arith.addf %1032, %1034 : vector<8x32xf32>
    %1036 = math.tanh %1035 : vector<8x32xf32>
    %cst_173 = arith.constant 1.000000e+00 : f32
    %1037 = vector.broadcast %cst_173 : f32 to vector<8x32xf32>
    %1038 = arith.subf %1037, %1031 : vector<8x32xf32>
    %1039 = arith.mulf %1038, %1036 : vector<8x32xf32>
    %1040 = arith.mulf %1031, %981 : vector<8x32xf32>
    %1041 = arith.addf %1039, %1040 : vector<8x32xf32>
    %1042 = vector.extract_strided_slice %1009 {offsets = [0, 0], sizes = [8, 32], strides = [1, 1]} : vector<8x96xf32> to vector<8x32xf32>
    %1043 = vector.extract_strided_slice %1015 {offsets = [0, 0], sizes = [8, 32], strides = [1, 1]} : vector<8x96xf32> to vector<8x32xf32>
    %1044 = arith.addf %1042, %1043 : vector<8x32xf32>
    %1045 = arith.negf %1044 : vector<8x32xf32>
    %1046 = math.exp %1045 : vector<8x32xf32>
    %cst_174 = arith.constant 1.000000e+00 : f32
    %1047 = vector.broadcast %cst_174 : f32 to vector<8x32xf32>
    %1048 = arith.addf %1047, %1046 : vector<8x32xf32>
    %1049 = arith.divf %1047, %1048 : vector<8x32xf32>
    %1050 = vector.extract_strided_slice %1009 {offsets = [0, 32], sizes = [8, 32], strides = [1, 1]} : vector<8x96xf32> to vector<8x32xf32>
    %1051 = vector.extract_strided_slice %1015 {offsets = [0, 32], sizes = [8, 32], strides = [1, 1]} : vector<8x96xf32> to vector<8x32xf32>
    %1052 = arith.addf %1050, %1051 : vector<8x32xf32>
    %1053 = arith.negf %1052 : vector<8x32xf32>
    %1054 = math.exp %1053 : vector<8x32xf32>
    %cst_175 = arith.constant 1.000000e+00 : f32
    %1055 = vector.broadcast %cst_175 : f32 to vector<8x32xf32>
    %1056 = arith.addf %1055, %1054 : vector<8x32xf32>
    %1057 = arith.divf %1055, %1056 : vector<8x32xf32>
    %1058 = vector.extract_strided_slice %1009 {offsets = [0, 64], sizes = [8, 32], strides = [1, 1]} : vector<8x96xf32> to vector<8x32xf32>
    %1059 = vector.extract_strided_slice %1015 {offsets = [0, 64], sizes = [8, 32], strides = [1, 1]} : vector<8x96xf32> to vector<8x32xf32>
    %1060 = arith.mulf %1049, %1059 : vector<8x32xf32>
    %1061 = arith.addf %1058, %1060 : vector<8x32xf32>
    %1062 = math.tanh %1061 : vector<8x32xf32>
    %cst_176 = arith.constant 1.000000e+00 : f32
    %1063 = vector.broadcast %cst_176 : f32 to vector<8x32xf32>
    %1064 = arith.subf %1063, %1057 : vector<8x32xf32>
    %1065 = arith.mulf %1064, %1062 : vector<8x32xf32>
    %1066 = arith.mulf %1057, %1007 : vector<8x32xf32>
    %1067 = arith.addf %1065, %1066 : vector<8x32xf32>
    %1068 = vector.extract_strided_slice %636 {offsets = [56, 0], sizes = [8, 96], strides = [1, 1]} : vector<80x96xf32> to vector<8x96xf32>
    %1069 = vector.extract_strided_slice %641 {offsets = [16, 0], sizes = [8, 96], strides = [1, 1]} : vector<80x96xf32> to vector<8x96xf32>
    %cst_177 = arith.constant dense<0.000000e+00> : vector<8x96xf32>
    %1070 = tpu.matmul %1041, %642, %cst_177 {dimension_numbers = #tpu.dot_dimension_numbers<[1], [0], [0], [1], [0, 0, 1, 1], [], []>} : vector<8x32xf32>, vector<32x96xf32>, vector<8x96xf32> -> vector<8x96xf32>
    %1071 = vector.broadcast %643 : vector<1x96xf32> to vector<8x96xf32>
    %1072 = arith.addf %1070, %1071 : vector<8x96xf32>
    %cst_178 = arith.constant dense<0.000000e+00> : vector<8x96xf32>
    %1073 = tpu.matmul %1067, %644, %cst_178 {dimension_numbers = #tpu.dot_dimension_numbers<[1], [0], [0], [1], [0, 0, 1, 1], [], []>} : vector<8x32xf32>, vector<32x96xf32>, vector<8x96xf32> -> vector<8x96xf32>
    %1074 = vector.broadcast %645 : vector<1x96xf32> to vector<8x96xf32>
    %1075 = arith.addf %1073, %1074 : vector<8x96xf32>
    %1076 = vector.extract_strided_slice %1068 {offsets = [0, 0], sizes = [8, 32], strides = [1, 1]} : vector<8x96xf32> to vector<8x32xf32>
    %1077 = vector.extract_strided_slice %1072 {offsets = [0, 0], sizes = [8, 32], strides = [1, 1]} : vector<8x96xf32> to vector<8x32xf32>
    %1078 = arith.addf %1076, %1077 : vector<8x32xf32>
    %1079 = arith.negf %1078 : vector<8x32xf32>
    %1080 = math.exp %1079 : vector<8x32xf32>
    %cst_179 = arith.constant 1.000000e+00 : f32
    %1081 = vector.broadcast %cst_179 : f32 to vector<8x32xf32>
    %1082 = arith.addf %1081, %1080 : vector<8x32xf32>
    %1083 = arith.divf %1081, %1082 : vector<8x32xf32>
    %1084 = vector.extract_strided_slice %1068 {offsets = [0, 32], sizes = [8, 32], strides = [1, 1]} : vector<8x96xf32> to vector<8x32xf32>
    %1085 = vector.extract_strided_slice %1072 {offsets = [0, 32], sizes = [8, 32], strides = [1, 1]} : vector<8x96xf32> to vector<8x32xf32>
    %1086 = arith.addf %1084, %1085 : vector<8x32xf32>
    %1087 = arith.negf %1086 : vector<8x32xf32>
    %1088 = math.exp %1087 : vector<8x32xf32>
    %cst_180 = arith.constant 1.000000e+00 : f32
    %1089 = vector.broadcast %cst_180 : f32 to vector<8x32xf32>
    %1090 = arith.addf %1089, %1088 : vector<8x32xf32>
    %1091 = arith.divf %1089, %1090 : vector<8x32xf32>
    %1092 = vector.extract_strided_slice %1068 {offsets = [0, 64], sizes = [8, 32], strides = [1, 1]} : vector<8x96xf32> to vector<8x32xf32>
    %1093 = vector.extract_strided_slice %1072 {offsets = [0, 64], sizes = [8, 32], strides = [1, 1]} : vector<8x96xf32> to vector<8x32xf32>
    %1094 = arith.mulf %1083, %1093 : vector<8x32xf32>
    %1095 = arith.addf %1092, %1094 : vector<8x32xf32>
    %1096 = math.tanh %1095 : vector<8x32xf32>
    %cst_181 = arith.constant 1.000000e+00 : f32
    %1097 = vector.broadcast %cst_181 : f32 to vector<8x32xf32>
    %1098 = arith.subf %1097, %1091 : vector<8x32xf32>
    %1099 = arith.mulf %1098, %1096 : vector<8x32xf32>
    %1100 = arith.mulf %1091, %1041 : vector<8x32xf32>
    %1101 = arith.addf %1099, %1100 : vector<8x32xf32>
    %1102 = vector.extract_strided_slice %1069 {offsets = [0, 0], sizes = [8, 32], strides = [1, 1]} : vector<8x96xf32> to vector<8x32xf32>
    %1103 = vector.extract_strided_slice %1075 {offsets = [0, 0], sizes = [8, 32], strides = [1, 1]} : vector<8x96xf32> to vector<8x32xf32>
    %1104 = arith.addf %1102, %1103 : vector<8x32xf32>
    %1105 = arith.negf %1104 : vector<8x32xf32>
    %1106 = math.exp %1105 : vector<8x32xf32>
    %cst_182 = arith.constant 1.000000e+00 : f32
    %1107 = vector.broadcast %cst_182 : f32 to vector<8x32xf32>
    %1108 = arith.addf %1107, %1106 : vector<8x32xf32>
    %1109 = arith.divf %1107, %1108 : vector<8x32xf32>
    %1110 = vector.extract_strided_slice %1069 {offsets = [0, 32], sizes = [8, 32], strides = [1, 1]} : vector<8x96xf32> to vector<8x32xf32>
    %1111 = vector.extract_strided_slice %1075 {offsets = [0, 32], sizes = [8, 32], strides = [1, 1]} : vector<8x96xf32> to vector<8x32xf32>
    %1112 = arith.addf %1110, %1111 : vector<8x32xf32>
    %1113 = arith.negf %1112 : vector<8x32xf32>
    %1114 = math.exp %1113 : vector<8x32xf32>
    %cst_183 = arith.constant 1.000000e+00 : f32
    %1115 = vector.broadcast %cst_183 : f32 to vector<8x32xf32>
    %1116 = arith.addf %1115, %1114 : vector<8x32xf32>
    %1117 = arith.divf %1115, %1116 : vector<8x32xf32>
    %1118 = vector.extract_strided_slice %1069 {offsets = [0, 64], sizes = [8, 32], strides = [1, 1]} : vector<8x96xf32> to vector<8x32xf32>
    %1119 = vector.extract_strided_slice %1075 {offsets = [0, 64], sizes = [8, 32], strides = [1, 1]} : vector<8x96xf32> to vector<8x32xf32>
    %1120 = arith.mulf %1109, %1119 : vector<8x32xf32>
    %1121 = arith.addf %1118, %1120 : vector<8x32xf32>
    %1122 = math.tanh %1121 : vector<8x32xf32>
    %cst_184 = arith.constant 1.000000e+00 : f32
    %1123 = vector.broadcast %cst_184 : f32 to vector<8x32xf32>
    %1124 = arith.subf %1123, %1117 : vector<8x32xf32>
    %1125 = arith.mulf %1124, %1122 : vector<8x32xf32>
    %1126 = arith.mulf %1117, %1067 : vector<8x32xf32>
    %1127 = arith.addf %1125, %1126 : vector<8x32xf32>
    %1128 = vector.extract_strided_slice %636 {offsets = [64, 0], sizes = [8, 96], strides = [1, 1]} : vector<80x96xf32> to vector<8x96xf32>
    %1129 = vector.extract_strided_slice %641 {offsets = [8, 0], sizes = [8, 96], strides = [1, 1]} : vector<80x96xf32> to vector<8x96xf32>
    %cst_185 = arith.constant dense<0.000000e+00> : vector<8x96xf32>
    %1130 = tpu.matmul %1101, %642, %cst_185 {dimension_numbers = #tpu.dot_dimension_numbers<[1], [0], [0], [1], [0, 0, 1, 1], [], []>} : vector<8x32xf32>, vector<32x96xf32>, vector<8x96xf32> -> vector<8x96xf32>
    %1131 = vector.broadcast %643 : vector<1x96xf32> to vector<8x96xf32>
    %1132 = arith.addf %1130, %1131 : vector<8x96xf32>
    %cst_186 = arith.constant dense<0.000000e+00> : vector<8x96xf32>
    %1133 = tpu.matmul %1127, %644, %cst_186 {dimension_numbers = #tpu.dot_dimension_numbers<[1], [0], [0], [1], [0, 0, 1, 1], [], []>} : vector<8x32xf32>, vector<32x96xf32>, vector<8x96xf32> -> vector<8x96xf32>
    %1134 = vector.broadcast %645 : vector<1x96xf32> to vector<8x96xf32>
    %1135 = arith.addf %1133, %1134 : vector<8x96xf32>
    %1136 = vector.extract_strided_slice %1128 {offsets = [0, 0], sizes = [8, 32], strides = [1, 1]} : vector<8x96xf32> to vector<8x32xf32>
    %1137 = vector.extract_strided_slice %1132 {offsets = [0, 0], sizes = [8, 32], strides = [1, 1]} : vector<8x96xf32> to vector<8x32xf32>
    %1138 = arith.addf %1136, %1137 : vector<8x32xf32>
    %1139 = arith.negf %1138 : vector<8x32xf32>
    %1140 = math.exp %1139 : vector<8x32xf32>
    %cst_187 = arith.constant 1.000000e+00 : f32
    %1141 = vector.broadcast %cst_187 : f32 to vector<8x32xf32>
    %1142 = arith.addf %1141, %1140 : vector<8x32xf32>
    %1143 = arith.divf %1141, %1142 : vector<8x32xf32>
    %1144 = vector.extract_strided_slice %1128 {offsets = [0, 32], sizes = [8, 32], strides = [1, 1]} : vector<8x96xf32> to vector<8x32xf32>
    %1145 = vector.extract_strided_slice %1132 {offsets = [0, 32], sizes = [8, 32], strides = [1, 1]} : vector<8x96xf32> to vector<8x32xf32>
    %1146 = arith.addf %1144, %1145 : vector<8x32xf32>
    %1147 = arith.negf %1146 : vector<8x32xf32>
    %1148 = math.exp %1147 : vector<8x32xf32>
    %cst_188 = arith.constant 1.000000e+00 : f32
    %1149 = vector.broadcast %cst_188 : f32 to vector<8x32xf32>
    %1150 = arith.addf %1149, %1148 : vector<8x32xf32>
    %1151 = arith.divf %1149, %1150 : vector<8x32xf32>
    %1152 = vector.extract_strided_slice %1128 {offsets = [0, 64], sizes = [8, 32], strides = [1, 1]} : vector<8x96xf32> to vector<8x32xf32>
    %1153 = vector.extract_strided_slice %1132 {offsets = [0, 64], sizes = [8, 32], strides = [1, 1]} : vector<8x96xf32> to vector<8x32xf32>
    %1154 = arith.mulf %1143, %1153 : vector<8x32xf32>
    %1155 = arith.addf %1152, %1154 : vector<8x32xf32>
    %1156 = math.tanh %1155 : vector<8x32xf32>
    %cst_189 = arith.constant 1.000000e+00 : f32
    %1157 = vector.broadcast %cst_189 : f32 to vector<8x32xf32>
    %1158 = arith.subf %1157, %1151 : vector<8x32xf32>
    %1159 = arith.mulf %1158, %1156 : vector<8x32xf32>
    %1160 = arith.mulf %1151, %1101 : vector<8x32xf32>
    %1161 = arith.addf %1159, %1160 : vector<8x32xf32>
    %1162 = vector.extract_strided_slice %1129 {offsets = [0, 0], sizes = [8, 32], strides = [1, 1]} : vector<8x96xf32> to vector<8x32xf32>
    %1163 = vector.extract_strided_slice %1135 {offsets = [0, 0], sizes = [8, 32], strides = [1, 1]} : vector<8x96xf32> to vector<8x32xf32>
    %1164 = arith.addf %1162, %1163 : vector<8x32xf32>
    %1165 = arith.negf %1164 : vector<8x32xf32>
    %1166 = math.exp %1165 : vector<8x32xf32>
    %cst_190 = arith.constant 1.000000e+00 : f32
    %1167 = vector.broadcast %cst_190 : f32 to vector<8x32xf32>
    %1168 = arith.addf %1167, %1166 : vector<8x32xf32>
    %1169 = arith.divf %1167, %1168 : vector<8x32xf32>
    %1170 = vector.extract_strided_slice %1129 {offsets = [0, 32], sizes = [8, 32], strides = [1, 1]} : vector<8x96xf32> to vector<8x32xf32>
    %1171 = vector.extract_strided_slice %1135 {offsets = [0, 32], sizes = [8, 32], strides = [1, 1]} : vector<8x96xf32> to vector<8x32xf32>
    %1172 = arith.addf %1170, %1171 : vector<8x32xf32>
    %1173 = arith.negf %1172 : vector<8x32xf32>
    %1174 = math.exp %1173 : vector<8x32xf32>
    %cst_191 = arith.constant 1.000000e+00 : f32
    %1175 = vector.broadcast %cst_191 : f32 to vector<8x32xf32>
    %1176 = arith.addf %1175, %1174 : vector<8x32xf32>
    %1177 = arith.divf %1175, %1176 : vector<8x32xf32>
    %1178 = vector.extract_strided_slice %1129 {offsets = [0, 64], sizes = [8, 32], strides = [1, 1]} : vector<8x96xf32> to vector<8x32xf32>
    %1179 = vector.extract_strided_slice %1135 {offsets = [0, 64], sizes = [8, 32], strides = [1, 1]} : vector<8x96xf32> to vector<8x32xf32>
    %1180 = arith.mulf %1169, %1179 : vector<8x32xf32>
    %1181 = arith.addf %1178, %1180 : vector<8x32xf32>
    %1182 = math.tanh %1181 : vector<8x32xf32>
    %cst_192 = arith.constant 1.000000e+00 : f32
    %1183 = vector.broadcast %cst_192 : f32 to vector<8x32xf32>
    %1184 = arith.subf %1183, %1177 : vector<8x32xf32>
    %1185 = arith.mulf %1184, %1182 : vector<8x32xf32>
    %1186 = arith.mulf %1177, %1127 : vector<8x32xf32>
    %1187 = arith.addf %1185, %1186 : vector<8x32xf32>
    %1188 = vector.extract_strided_slice %636 {offsets = [72, 0], sizes = [8, 96], strides = [1, 1]} : vector<80x96xf32> to vector<8x96xf32>
    %1189 = vector.extract_strided_slice %641 {offsets = [0, 0], sizes = [8, 96], strides = [1, 1]} : vector<80x96xf32> to vector<8x96xf32>
    %cst_193 = arith.constant dense<0.000000e+00> : vector<8x96xf32>
    %1190 = tpu.matmul %1161, %642, %cst_193 {dimension_numbers = #tpu.dot_dimension_numbers<[1], [0], [0], [1], [0, 0, 1, 1], [], []>} : vector<8x32xf32>, vector<32x96xf32>, vector<8x96xf32> -> vector<8x96xf32>
    %1191 = vector.broadcast %643 : vector<1x96xf32> to vector<8x96xf32>
    %1192 = arith.addf %1190, %1191 : vector<8x96xf32>
    %cst_194 = arith.constant dense<0.000000e+00> : vector<8x96xf32>
    %1193 = tpu.matmul %1187, %644, %cst_194 {dimension_numbers = #tpu.dot_dimension_numbers<[1], [0], [0], [1], [0, 0, 1, 1], [], []>} : vector<8x32xf32>, vector<32x96xf32>, vector<8x96xf32> -> vector<8x96xf32>
    %1194 = vector.broadcast %645 : vector<1x96xf32> to vector<8x96xf32>
    %1195 = arith.addf %1193, %1194 : vector<8x96xf32>
    %1196 = vector.extract_strided_slice %1188 {offsets = [0, 0], sizes = [8, 32], strides = [1, 1]} : vector<8x96xf32> to vector<8x32xf32>
    %1197 = vector.extract_strided_slice %1192 {offsets = [0, 0], sizes = [8, 32], strides = [1, 1]} : vector<8x96xf32> to vector<8x32xf32>
    %1198 = arith.addf %1196, %1197 : vector<8x32xf32>
    %1199 = arith.negf %1198 : vector<8x32xf32>
    %1200 = math.exp %1199 : vector<8x32xf32>
    %cst_195 = arith.constant 1.000000e+00 : f32
    %1201 = vector.broadcast %cst_195 : f32 to vector<8x32xf32>
    %1202 = arith.addf %1201, %1200 : vector<8x32xf32>
    %1203 = arith.divf %1201, %1202 : vector<8x32xf32>
    %1204 = vector.extract_strided_slice %1188 {offsets = [0, 32], sizes = [8, 32], strides = [1, 1]} : vector<8x96xf32> to vector<8x32xf32>
    %1205 = vector.extract_strided_slice %1192 {offsets = [0, 32], sizes = [8, 32], strides = [1, 1]} : vector<8x96xf32> to vector<8x32xf32>
    %1206 = arith.addf %1204, %1205 : vector<8x32xf32>
    %1207 = arith.negf %1206 : vector<8x32xf32>
    %1208 = math.exp %1207 : vector<8x32xf32>
    %cst_196 = arith.constant 1.000000e+00 : f32
    %1209 = vector.broadcast %cst_196 : f32 to vector<8x32xf32>
    %1210 = arith.addf %1209, %1208 : vector<8x32xf32>
    %1211 = arith.divf %1209, %1210 : vector<8x32xf32>
    %1212 = vector.extract_strided_slice %1188 {offsets = [0, 64], sizes = [8, 32], strides = [1, 1]} : vector<8x96xf32> to vector<8x32xf32>
    %1213 = vector.extract_strided_slice %1192 {offsets = [0, 64], sizes = [8, 32], strides = [1, 1]} : vector<8x96xf32> to vector<8x32xf32>
    %1214 = arith.mulf %1203, %1213 : vector<8x32xf32>
    %1215 = arith.addf %1212, %1214 : vector<8x32xf32>
    %1216 = math.tanh %1215 : vector<8x32xf32>
    %cst_197 = arith.constant 1.000000e+00 : f32
    %1217 = vector.broadcast %cst_197 : f32 to vector<8x32xf32>
    %1218 = arith.subf %1217, %1211 : vector<8x32xf32>
    %1219 = arith.mulf %1218, %1216 : vector<8x32xf32>
    %1220 = arith.mulf %1211, %1161 : vector<8x32xf32>
    %1221 = arith.addf %1219, %1220 : vector<8x32xf32>
    %1222 = vector.extract_strided_slice %1189 {offsets = [0, 0], sizes = [8, 32], strides = [1, 1]} : vector<8x96xf32> to vector<8x32xf32>
    %1223 = vector.extract_strided_slice %1195 {offsets = [0, 0], sizes = [8, 32], strides = [1, 1]} : vector<8x96xf32> to vector<8x32xf32>
    %1224 = arith.addf %1222, %1223 : vector<8x32xf32>
    %1225 = arith.negf %1224 : vector<8x32xf32>
    %1226 = math.exp %1225 : vector<8x32xf32>
    %cst_198 = arith.constant 1.000000e+00 : f32
    %1227 = vector.broadcast %cst_198 : f32 to vector<8x32xf32>
    %1228 = arith.addf %1227, %1226 : vector<8x32xf32>
    %1229 = arith.divf %1227, %1228 : vector<8x32xf32>
    %1230 = vector.extract_strided_slice %1189 {offsets = [0, 32], sizes = [8, 32], strides = [1, 1]} : vector<8x96xf32> to vector<8x32xf32>
    %1231 = vector.extract_strided_slice %1195 {offsets = [0, 32], sizes = [8, 32], strides = [1, 1]} : vector<8x96xf32> to vector<8x32xf32>
    %1232 = arith.addf %1230, %1231 : vector<8x32xf32>
    %1233 = arith.negf %1232 : vector<8x32xf32>
    %1234 = math.exp %1233 : vector<8x32xf32>
    %cst_199 = arith.constant 1.000000e+00 : f32
    %1235 = vector.broadcast %cst_199 : f32 to vector<8x32xf32>
    %1236 = arith.addf %1235, %1234 : vector<8x32xf32>
    %1237 = arith.divf %1235, %1236 : vector<8x32xf32>
    %1238 = vector.extract_strided_slice %1189 {offsets = [0, 64], sizes = [8, 32], strides = [1, 1]} : vector<8x96xf32> to vector<8x32xf32>
    %1239 = vector.extract_strided_slice %1195 {offsets = [0, 64], sizes = [8, 32], strides = [1, 1]} : vector<8x96xf32> to vector<8x32xf32>
    %1240 = arith.mulf %1229, %1239 : vector<8x32xf32>
    %1241 = arith.addf %1238, %1240 : vector<8x32xf32>
    %1242 = math.tanh %1241 : vector<8x32xf32>
    %cst_200 = arith.constant 1.000000e+00 : f32
    %1243 = vector.broadcast %cst_200 : f32 to vector<8x32xf32>
    %1244 = arith.subf %1243, %1237 : vector<8x32xf32>
    %1245 = arith.mulf %1244, %1242 : vector<8x32xf32>
    %1246 = arith.mulf %1237, %1187 : vector<8x32xf32>
    %1247 = arith.addf %1245, %1246 : vector<8x32xf32>
    %1248 = tpu.concatenate %681, %1247 in 1 : vector<8x32xf32>, vector<8x32xf32> -> vector<8x64xf32>
    %1249 = tpu.concatenate %741, %1187 in 1 : vector<8x32xf32>, vector<8x32xf32> -> vector<8x64xf32>
    %1250 = tpu.concatenate %801, %1127 in 1 : vector<8x32xf32>, vector<8x32xf32> -> vector<8x64xf32>
    %1251 = tpu.concatenate %861, %1067 in 1 : vector<8x32xf32>, vector<8x32xf32> -> vector<8x64xf32>
    %1252 = tpu.concatenate %921, %1007 in 1 : vector<8x32xf32>, vector<8x32xf32> -> vector<8x64xf32>
    %1253 = tpu.concatenate %981, %947 in 1 : vector<8x32xf32>, vector<8x32xf32> -> vector<8x64xf32>
    %1254 = tpu.concatenate %1041, %887 in 1 : vector<8x32xf32>, vector<8x32xf32> -> vector<8x64xf32>
    %1255 = tpu.concatenate %1101, %827 in 1 : vector<8x32xf32>, vector<8x32xf32> -> vector<8x64xf32>
    %1256 = tpu.concatenate %1161, %767 in 1 : vector<8x32xf32>, vector<8x32xf32> -> vector<8x64xf32>
    %1257 = tpu.concatenate %1221, %707 in 1 : vector<8x32xf32>, vector<8x32xf32> -> vector<8x64xf32>
    %1258 = tpu.concatenate %1248, %1249, %1250, %1251, %1252, %1253, %1254, %1255, %1256, %1257 in 0 : vector<8x64xf32>, vector<8x64xf32>, vector<8x64xf32>, vector<8x64xf32>, vector<8x64xf32>, vector<8x64xf32>, vector<8x64xf32>, vector<8x64xf32>, vector<8x64xf32>, vector<8x64xf32> -> vector<80x64xf32>
    %c0_201 = arith.constant 0 : index
    %c0_202 = arith.constant 0 : index
    %1259 = vector.load %arg17[%c0_201, %c0_202] : memref<64x16xf32, #tpu.memory_space<vmem>>, vector<64x16xf32>
    %cst_203 = arith.constant dense<0.000000e+00> : vector<80x16xf32>
    %1260 = tpu.matmul %1258, %1259, %cst_203 {dimension_numbers = #tpu.dot_dimension_numbers<[1], [0], [0], [1], [0, 0, 1, 1], [], []>} : vector<80x64xf32>, vector<64x16xf32>, vector<80x16xf32> -> vector<80x16xf32>
    %c0_204 = arith.constant 0 : index
    %c0_205 = arith.constant 0 : index
    %1261 = vector.load %arg18[%c0_204, %c0_205] : memref<1x16xf32, #tpu.memory_space<vmem>>, vector<1x16xf32>
    %1262 = vector.broadcast %1261 : vector<1x16xf32> to vector<80x16xf32>
    %1263 = arith.addf %1260, %1262 : vector<80x16xf32>
    %1264 = vector.extract_strided_slice %1263 {offsets = [32, 0], sizes = [16, 16], strides = [1, 1]} : vector<80x16xf32> to vector<16x16xf32>
    %1265 = vector.extract_strided_slice %0 {offsets = [32, 0], sizes = [16, 16], strides = [1, 1]} : vector<80x16xf32> to vector<16x16xf32>
    %1266 = arith.subf %1264, %1265 : vector<16x16xf32>
    %1267 = arith.mulf %1266, %1266 : vector<16x16xf32>
    %1268 = vector.shape_cast %1267 : vector<16x16xf32> to vector<1x16x16xf32>
    %cst_206 = arith.constant dense<0.000000e+00> : vector<1xf32>
    %1269 = vector.multi_reduction <add>, %1268, %cst_206 [1, 2] : vector<1x16x16xf32> to vector<1xf32>
    %1270 = vector.shape_cast %1269 : vector<1xf32> to vector<1x1x1xf32>
    %1271 = vector.extract %1270[0, 0, 0] : f32 from vector<1x1x1xf32>
    %cst_207 = arith.constant 1.280000e+03 : f32
    %1272 = arith.divf %1271, %cst_207 : f32
    %c0_208 = arith.constant 0 : index
    %c0_209 = arith.constant 0 : index
    %1273 = memref.load %arg19[%c0_208, %c0_209] : memref<1x1xf32, #tpu.memory_space<smem>>
    memref.store %1272, %arg19[%c0_208, %c0_209] : memref<1x1xf32, #tpu.memory_space<smem>>
    return
  }
}

</mosaic_0001>

<bundles_post_ra>
// kernel: tpu_custom_call.1
= control target key start
LH: loop header
LB: loop body
LE: loop exit
PB: predicated region body
PF: predicated region fallthrough
CT: control target
= control target key end

     0   :  { %s8228_s0 = inlined_call_operand.vmem [shape: f32[80,16], index: 0, kind: input, shape index: {}]   ;;  %s8229_s1 = inlined_call_operand.hbm [shape: f32[16,96], index: 1, kind: input, shape index: {}]   ;;  %s8230_s2 = inlined_call_operand.hbm [shape: f32[1,96], index: 2, kind: input, shape index: {}]   ;;  %s8231_s3 = inlined_call_operand.vmem [shape: f32[32,96], index: 3, kind: input, shape index: {}]   ;;  %s8232_s4 = inlined_call_operand.hbm [shape: f32[1,96], index: 4, kind: input, shape index: {}]   ;;  %s8233_s5 = inlined_call_operand.hbm [shape: f32[16,96], index: 5, kind: input, shape index: {}]   ;;  %s8234_s6 = inlined_call_operand.hbm [shape: f32[1,96], index: 6, kind: input, shape index: {}]   ;;  %s8235_s7 = inlined_call_operand.vmem [shape: f32[32,96], index: 7, kind: input, shape index: {}]   ;;  %s8236_s8 = inlined_call_operand.hbm [shape: f32[1,96], index: 8, kind: input, shape index: {}]   ;;  %s8237_s9 = inlined_call_operand.vmem [shape: f32[64,96], index: 9, kind: input, shape index: {}]   ;;  %s8238_s10 = inlined_call_operand.hbm [shape: f32[1,96], index: 10, kind: input, shape index: {}]   ;;  %s8239_s11 = inlined_call_operand.hbm [shape: f32[32,96], index: 11, kind: input, shape index: {}]   ;;  %s8240_s12 = inlined_call_operand.hbm [shape: f32[1,96], index: 12, kind: input, shape index: {}]   ;;  %s8241_s13 = inlined_call_operand.vmem [shape: f32[64,96], index: 13, kind: input, shape index: {}]   ;;  %s8242_s14 = inlined_call_operand.hbm [shape: f32[1,96], index: 14, kind: input, shape index: {}]   ;;  %s8243_s15 = inlined_call_operand.vmem [shape: f32[32,96], index: 15, kind: input, shape index: {}]   ;;  %s8244_s16 = inlined_call_operand.hbm [shape: f32[1,96], index: 16, kind: input, shape index: {}]   ;;  %s8245_s17 = inlined_call_operand.vmem [shape: f32[64,16], index: 17, kind: input, shape index: {}]   ;;  %s8246_s18 = inlined_call_operand.vmem [shape: f32[1,16], index: 18, kind: input, shape index: {}]   ;;  %s8247_s19 = inlined_call_operand.hbm [shape: f32[1,1], index: 19, kind: output, shape index: {}]  }
   0x1   :  { %8252 = sst [smem:[#allocation28_spill]] %s8228_s0 }
   0x2   :  { %8253 = sst [smem:[#allocation29_spill]] %s8229_s1 }
   0x3   :  { %8254 = sst [smem:[#allocation30_spill]] %s8230_s2 }
   0x4   :  { %8255 = sst [smem:[#allocation31_spill]] %s8231_s3 }
   0x5   :  { %24 = vsyncpa [#allocation3], 0 }
   0x6   :  { %25 = vsyncpa [#allocation6], 0 }
   0x7   :  { %26 = vsyncpa [#allocation9], 0 }
   0x8   :  { %27 = vsyncpa [#allocation12], 0 }
   0x9   :  { %28 = vsyncpa [#allocation15], 0 }
   0xa   :  { %29 = vsyncpa [#allocation18], 0 }
   0xb   :  { %30 = vsyncpa [#allocation4], 0  ;;  %s6887_s0 = smov [#allocation5]   ;;  %s8256_s1 = sld [smem:[#allocation30_spill]] }
   0xc   :  { %s51_s30 = sshll.u32 %s6887_s0, 4  ;;  %s52_s30 = int_to_ptr.vmem [resolvable:$true] %s51_s30 }
  0x11   :  { %s6621_s22 = scalar_lea.hbm %s8256_s1, 16 }
  0x12   :  { %p6622_p0 = scmp.ne.s32.totalorder %s8256_s1, %s6621_s22  ;;  %p6625_p1 = scmp.lt.u32.totalorder %s6621_s22, %s8256_s1 }
  0x14   :  { %p6627_p2 = pnand %p6625_p1, %p6622_p0 }
  0x16   :  { %6630 = shalt.err (!%p6627_p2)
}
  0x17   :  { %s6631_s3 = scalar_lea.vmem %s52_s30, 16  ;;  %s6635_s26 = scalar_lea.vmem %s52_s30, 32 }
  0x18   :  { %p6632_p3 = scmp.ne.s32.totalorder %s52_s30, %s6631_s3  ;;  %p6636_p4 = scmp.lt.s32.totalorder %s52_s30, %s52_s30 }
  0x19   :  { %p6637_p5 = scmp.lt.s32.totalorder %s6635_s26, %s6631_s3 }
  0x1b   :  { %p6638_p6 = por %p6637_p5, %p6636_p4 }
  0x1d   :  { %p6639_p7 = pnand %p6638_p6, %p6632_p3 }
  0x1f   :  { %6642 = shalt.err (!%p6639_p7)
}
  0x20   :  { %54 = dma.hbm_to_vmem [thread:$0]  %s8256_s1, 16, %s52_s30, [#allocation6]  }
  0x21   :  { %s6888_s29 = smov [#allocation8]   ;;  %s6889_s20 = smov [#allocation11]  }
  0x22   :  { %s72_s0 = sshll.u32 %s6888_s29, 4  ;;  %s97_s21 = sshll.u32 %s6889_s20, 4  ;;  %s73_s0 = int_to_ptr.vmem [resolvable:$true] %s72_s0  ;;  %s98_s21 = int_to_ptr.vmem [resolvable:$true] %s97_s21 }
  0x23   :  { %s6643_s23 = scalar_lea.hbm %s8233_s5, 256 }
  0x24   :  { %p6644_p8 = scmp.ne.s32.totalorder %s8233_s5, %s6643_s23  ;;  %p6647_p9 = scmp.lt.u32.totalorder %s6643_s23, %s8233_s5 }
  0x26   :  { %p6649_p10 = pnand %p6647_p9, %p6644_p8 }
  0x28   :  { %6652 = shalt.err (!%p6649_p10)
}
  0x29   :  { %s6653_s30 = scalar_lea.vmem %s73_s0, 256  ;;  %p6658_p12 = scmp.lt.s32.totalorder %s73_s0, %s73_s0 }
  0x2a   :  { %p6654_p11 = scmp.ne.s32.totalorder %s73_s0, %s6653_s30  ;;  %p6659_p13 = scmp.lt.s32.totalorder %s6653_s30, %s6653_s30 }
  0x2c   :  { %p6660_p0 = por %p6659_p13, %p6658_p12 }
  0x2e   :  { %p6661_p1 = pnand %p6660_p0, %p6654_p11 }
  0x30   :  { %6664 = shalt.err (!%p6661_p1)
}
  0x31   :  { %s6890_s1 = smov 128   ;;  %s6891_s27 = smov 8  }
  0x32   :  { %78 = dma.hbm_to_vmem [thread:$0]  %s8233_s5, 256, %s73_s0, [#allocation9], %s6890_s1, %s6890_s1, %s6891_s27  }
  0x33   :  { %s6665_s2 = scalar_lea.hbm %s8236_s8, 16 }
  0x34   :  { %p6666_p2 = scmp.ne.s32.totalorder %s8236_s8, %s6665_s2  ;;  %p6669_p3 = scmp.lt.u32.totalorder %s6665_s2, %s8236_s8 }
  0x36   :  { %p6671_p4 = pnand %p6669_p3, %p6666_p2 }
  0x38   :  { %6674 = shalt.err (!%p6671_p4)
}
  0x39   :  { %s6675_s26 = scalar_lea.vmem %s98_s21, 16  ;;  %s6679_s30 = scalar_lea.vmem %s98_s21, 32 }
  0x3a   :  { %p6676_p5 = scmp.ne.s32.totalorder %s98_s21, %s6675_s26  ;;  %p6680_p6 = scmp.lt.s32.totalorder %s98_s21, %s98_s21 }
  0x3b   :  { %p6681_p7 = scmp.lt.s32.totalorder %s6679_s30, %s6675_s26 }
  0x3d   :  { %p6682_p8 = por %p6681_p7, %p6680_p6 }
  0x3f   :  { %p6683_p9 = pnand %p6682_p8, %p6676_p5 }
  0x41   :  { %6686 = shalt.err (!%p6683_p9)
}
  0x42   :  { %100 = dma.hbm_to_vmem [thread:$0]  %s8236_s8, 16, %s98_s21, [#allocation12]  }
  0x43   :  { %s6892_s28 = smov [#allocation14]   ;;  %s6893_s20 = smov [#allocation17]  }
  0x44   :  { %s118_s29 = sshll.u32 %s6892_s28, 4  ;;  %s143_s22 = sshll.u32 %s6893_s20, 4  ;;  %s119_s29 = int_to_ptr.vmem [resolvable:$true] %s118_s29  ;;  %s144_s22 = int_to_ptr.vmem [resolvable:$true] %s143_s22 }
  0x45   :  { %s6687_s24 = scalar_lea.hbm %s8239_s11, 512 }
  0x46   :  { %p6688_p10 = scmp.ne.s32.totalorder %s8239_s11, %s6687_s24  ;;  %p6691_p11 = scmp.lt.u32.totalorder %s6687_s24, %s8239_s11 }
  0x48   :  { %p6693_p12 = pnand %p6691_p11, %p6688_p10 }
  0x4a   :  { %6696 = shalt.err (!%p6693_p12)
}
  0x4b   :  { %s6697_s8 = scalar_lea.vmem %s119_s29, 512  ;;  %p6702_p0 = scmp.lt.s32.totalorder %s119_s29, %s119_s29 }
  0x4c   :  { %p6698_p13 = scmp.ne.s32.totalorder %s119_s29, %s6697_s8  ;;  %p6703_p1 = scmp.lt.s32.totalorder %s6697_s8, %s6697_s8 }
  0x4e   :  { %p6704_p2 = por %p6703_p1, %p6702_p0 }
  0x50   :  { %p6705_p3 = pnand %p6704_p2, %p6698_p13 }
  0x52   :  { %6708 = shalt.err (!%p6705_p3)
}
  0x53   :  { %124 = dma.hbm_to_vmem [thread:$0]  %s8239_s11, 512, %s119_s29, [#allocation15], %s6890_s1, %s6890_s1, %s6891_s27  }
  0x54   :  { %s6709_s20 = scalar_lea.hbm %s8242_s14, 16 }
  0x55   :  { %p6710_p4 = scmp.ne.s32.totalorder %s8242_s14, %s6709_s20  ;;  %p6713_p5 = scmp.lt.u32.totalorder %s6709_s20, %s8242_s14 }
  0x57   :  { %p6715_p6 = pnand %p6713_p5, %p6710_p4 }
  0x59   :  { %6718 = shalt.err (!%p6715_p6)
}
  0x5a   :  { %s6719_s3 = scalar_lea.vmem %s144_s22, 16  ;;  %s6723_s26 = scalar_lea.vmem %s144_s22, 32 }
  0x5b   :  { %p6720_p7 = scmp.ne.s32.totalorder %s144_s22, %s6719_s3  ;;  %p6724_p8 = scmp.lt.s32.totalorder %s144_s22, %s144_s22 }
  0x5c   :  { %p6725_p9 = scmp.lt.s32.totalorder %s6723_s26, %s6719_s3 }
  0x5e   :  { %p6726_p10 = por %p6725_p9, %p6724_p8 }
  0x60   :  { %p6727_p11 = pnand %p6726_p10, %p6720_p7 }
  0x62   :  { %6730 = shalt.err (!%p6727_p11)
}
  0x63   :  { %146 = dma.hbm_to_vmem [thread:$0]  %s8242_s14, 16, %s144_s22, [#allocation18]  }
  0x64   :  { %s6894_s30 = smov [#allocation2]   ;;  %s6895_s21 = smov [#allocation7]  }
  0x65   :  { %s38_s8 = sshll.u32 %s6894_s30, 4  ;;  %s63_s5 = sshll.u32 %s6895_s21, 4  ;;  %s39_s8 = int_to_ptr.vmem [resolvable:$true] %s38_s8  ;;  %s64_s5 = int_to_ptr.vmem [resolvable:$true] %s63_s5 }
  0x66   :  { %s8257_s20 = sld [smem:[#allocation29_spill]] }
  0x6c   :  { %s6731_s2 = scalar_lea.hbm %s8257_s20, 256 }
  0x6d   :  { %p6732_p12 = scmp.ne.s32.totalorder %s8257_s20, %s6731_s2  ;;  %p6735_p13 = scmp.lt.u32.totalorder %s6731_s2, %s8257_s20 }
  0x6f   :  { %p6737_p0 = pnand %p6735_p13, %p6732_p12 }
  0x71   :  { %6740 = shalt.err (!%p6737_p0)
}
  0x72   :  { %s6741_s14 = scalar_lea.vmem %s39_s8, 256  ;;  %p6746_p2 = scmp.lt.s32.totalorder %s39_s8, %s39_s8 }
  0x73   :  { %p6742_p1 = scmp.ne.s32.totalorder %s39_s8, %s6741_s14  ;;  %p6747_p3 = scmp.lt.s32.totalorder %s6741_s14, %s6741_s14 }
  0x75   :  { %p6748_p4 = por %p6747_p3, %p6746_p2 }
  0x77   :  { %p6749_p5 = pnand %p6748_p4, %p6742_p1 }
  0x79   :  { %6752 = shalt.err (!%p6749_p5)
}
  0x7a   :  { %44 = dma.hbm_to_vmem [thread:$0]  %s8257_s20, 256, %s39_s8, [#allocation3], %s6890_s1, %s6890_s1, %s6891_s27  }
  0x7b   :  { %s6753_s30 = scalar_lea.hbm %s8232_s4, 16 }
  0x7c   :  { %p6754_p6 = scmp.ne.s32.totalorder %s8232_s4, %s6753_s30  ;;  %p6757_p7 = scmp.lt.u32.totalorder %s6753_s30, %s8232_s4 }
  0x7e   :  { %p6759_p8 = pnand %p6757_p7, %p6754_p6 }
  0x80   :  { %6762 = shalt.err (!%p6759_p8)
}
  0x81   :  { %s6763_s23 = scalar_lea.vmem %s64_s5, 16  ;;  %s6767_s24 = scalar_lea.vmem %s64_s5, 32 }
  0x82   :  { %p6764_p9 = scmp.ne.s32.totalorder %s64_s5, %s6763_s23  ;;  %p6768_p10 = scmp.lt.s32.totalorder %s64_s5, %s64_s5 }
  0x83   :  { %p6769_p11 = scmp.lt.s32.totalorder %s6767_s24, %s6763_s23 }
  0x85   :  { %p6770_p12 = por %p6769_p11, %p6768_p10 }
  0x87   :  { %p6771_p13 = pnand %p6770_p12, %p6764_p9 }
  0x89   :  { %6774 = shalt.err (!%p6771_p13)
}
  0x8a   :  { %66 = dma.hbm_to_vmem [thread:$0]  %s8232_s4, 16, %s64_s5, [#allocation6]  }
  0x8b   :  { %s6896_s8 = smov [#allocation10]   ;;  %s6897_s25 = smov [#allocation13]  }
  0x8c   :  { %s85_s20 = sshll.u32 %s6896_s8, 4  ;;  %s109_s3 = sshll.u32 %s6897_s25, 4  ;;  %s86_s20 = int_to_ptr.vmem [resolvable:$true] %s85_s20  ;;  %s110_s3 = int_to_ptr.vmem [resolvable:$true] %s109_s3 }
  0x8d   :  { %s6775_s26 = scalar_lea.hbm %s8234_s6, 16 }
  0x8e   :  { %p6776_p0 = scmp.ne.s32.totalorder %s8234_s6, %s6775_s26  ;;  %p6779_p1 = scmp.lt.u32.totalorder %s6775_s26, %s8234_s6 }
  0x90   :  { %p6781_p2 = pnand %p6779_p1, %p6776_p0 }
  0x92   :  { %6784 = shalt.err (!%p6781_p2)
}
  0x93   :  { %s6785_s4 = scalar_lea.vmem %s86_s20, 16  ;;  %s6789_s5 = scalar_lea.vmem %s86_s20, 32 }
  0x94   :  { %p6786_p3 = scmp.ne.s32.totalorder %s86_s20, %s6785_s4  ;;  %p6790_p4 = scmp.lt.s32.totalorder %s86_s20, %s86_s20 }
  0x95   :  { %p6791_p5 = scmp.lt.s32.totalorder %s6789_s5, %s6785_s4 }
  0x97   :  { %p6792_p6 = por %p6791_p5, %p6790_p4 }
  0x99   :  { %p6793_p7 = pnand %p6792_p6, %p6786_p3 }
  0x9b   :  { %6796 = shalt.err (!%p6793_p7)
}
  0x9c   :  { %88 = dma.hbm_to_vmem [thread:$0]  %s8234_s6, 16, %s86_s20, [#allocation9]  }
  0x9d   :  { %s6797_s24 = scalar_lea.hbm %s8238_s10, 16 }
  0x9e   :  { %p6798_p8 = scmp.ne.s32.totalorder %s8238_s10, %s6797_s24  ;;  %p6801_p9 = scmp.lt.u32.totalorder %s6797_s24, %s8238_s10 }
  0xa0   :  { %p6803_p10 = pnand %p6801_p9, %p6798_p8 }
  0xa2   :  { %6806 = shalt.err (!%p6803_p10)
}
  0xa3   :  { %s6807_s14 = scalar_lea.vmem %s110_s3, 16  ;;  %s6811_s22 = scalar_lea.vmem %s110_s3, 32 }
  0xa4   :  { %p6808_p11 = scmp.ne.s32.totalorder %s110_s3, %s6807_s14  ;;  %p6812_p12 = scmp.lt.s32.totalorder %s110_s3, %s110_s3 }
  0xa5   :  { %p6813_p13 = scmp.lt.s32.totalorder %s6811_s22, %s6807_s14 }
  0xa7   :  { %p6814_p0 = por %p6813_p13, %p6812_p12 }
  0xa9   :  { %p6815_p1 = pnand %p6814_p0, %p6808_p11 }
  0xab   :  { %6818 = shalt.err (!%p6815_p1)
}
  0xac   :  { %112 = dma.hbm_to_vmem [thread:$0]  %s8238_s10, 16, %s110_s3, [#allocation12]  }
  0xad   :  { %s6898_s26 = smov [#allocation16]   ;;  %s6899_s29 = smov [#allocation19]  }
  0xae   :  { %s131_s11 = sshll.u32 %s6898_s26, 4  ;;  %s155_s30 = sshll.u32 %s6899_s29, 4  ;;  %s132_s11 = int_to_ptr.vmem [resolvable:$true] %s131_s11  ;;  %s156_s30 = int_to_ptr.vmem [resolvable:$true] %s155_s30 }
  0xaf   :  { %s6819_s5 = scalar_lea.hbm %s8240_s12, 16 }
  0xb0   :  { %p6820_p2 = scmp.ne.s32.totalorder %s8240_s12, %s6819_s5  ;;  %p6823_p3 = scmp.lt.u32.totalorder %s6819_s5, %s8240_s12 }
  0xb2   :  { %p6825_p4 = pnand %p6823_p3, %p6820_p2 }
  0xb4   :  { %6828 = shalt.err (!%p6825_p4)
}
  0xb5   :  { %s6829_s10 = scalar_lea.vmem %s132_s11, 16  ;;  %s6833_s3 = scalar_lea.vmem %s132_s11, 32 }
  0xb6   :  { %p6830_p5 = scmp.ne.s32.totalorder %s132_s11, %s6829_s10  ;;  %p6834_p6 = scmp.lt.s32.totalorder %s132_s11, %s132_s11 }
  0xb7   :  { %p6835_p7 = scmp.lt.s32.totalorder %s6833_s3, %s6829_s10 }
  0xb9   :  { %p6836_p8 = por %p6835_p7, %p6834_p6 }
  0xbb   :  { %p6837_p9 = pnand %p6836_p8, %p6830_p5 }
  0xbd   :  { %6840 = shalt.err (!%p6837_p9)
}
  0xbe   :  { %134 = dma.hbm_to_vmem [thread:$0]  %s8240_s12, 16, %s132_s11, [#allocation15]  }
  0xbf   :  { %s6841_s25 = scalar_lea.hbm %s8244_s16, 16 }
  0xc0   :  { %p6842_p10 = scmp.ne.s32.totalorder %s8244_s16, %s6841_s25  ;;  %p6845_p11 = scmp.lt.u32.totalorder %s6841_s25, %s8244_s16 }
  0xc2   :  { %p6847_p12 = pnand %p6845_p11, %p6842_p10 }
  0xc4   :  { %6850 = shalt.err (!%p6847_p12)
}
  0xc5   :  { %s6851_s26 = scalar_lea.vmem %s156_s30, 16  ;;  %s6855_s29 = scalar_lea.vmem %s156_s30, 32 }
  0xc6   :  { %p6852_p13 = scmp.ne.s32.totalorder %s156_s30, %s6851_s26  ;;  %p6856_p0 = scmp.lt.s32.totalorder %s156_s30, %s156_s30 }
  0xc7   :  { %p6857_p1 = scmp.lt.s32.totalorder %s6855_s29, %s6851_s26 }
  0xc9   :  { %p6858_p2 = por %p6857_p1, %p6856_p0 }
  0xcb   :  { %p6859_p3 = pnand %p6858_p2, %p6852_p13 }
  0xcd   :  { %6862 = shalt.err (!%p6859_p3)
}
  0xce   :  { %158 = dma.hbm_to_vmem [thread:$0]  %s8244_s16, 16, %s156_s30, [#allocation18]  }
  0xcf   :  { %6873 = dma.done.wait [#allocation3], 256  }
  0xd0   :  { %6874 = vsyncadd [#allocation3], 4294967040 }
  0xd1   :  { %6875 = dma.done.wait [#allocation6], 32  }
  0xd2   :  { %6876 = vsyncadd [#allocation6], 4294967264 }
  0xd3   :  { %6877 = dma.done.wait [#allocation9], 272  }
  0xd4   :  { %6878 = vsyncadd [#allocation9], 4294967024 }
  0xd5   :  { %6879 = dma.done.wait [#allocation12], 32  }
  0xd6   :  { %6880 = vsyncadd [#allocation12], 4294967264 }
  0xd7   :  { %6881 = dma.done.wait [#allocation15], 528  }
  0xd8   :  { %6882 = vsyncadd [#allocation15], 4294966768 }
  0xd9   :  { %6883 = dma.done.wait [#allocation18], 32  }
  0xda   :  { %6884 = vsyncadd [#allocation18], 4294967264  ;;  %v6900_v0 = vmov 0.0|0.0   ;;  %vm6901_vm0 = vmmov 0   ;;  %v6902_v1 = vmov 0.0   ;;  %vm215_vm1 = vcmask 130048  }
  0xdb   :  { %6066 = vmatprep.subr.bf16.mxu0 %v6900_v0  ;;  %5533 = vmatprep.mubr.msk.f32.mxu0 %vm6901_vm0, %v6902_v1  ;;  %v206_v2 = vld [vmem:[#allocation2] sm:$0xff]  ;;  %v207_v3 = vld [vmem:[#allocation2 + $0x8] sm:$0xff]  ;;  %s8258_s21 = sld [smem:[#allocation31_spill]]  ;;  %s8259_s2 = sld [smem:[#allocation28_spill]]  ;;  %v358_v13 = vld [vmem:[#allocation8] sm:$0xff]  ;;  %vm498_vm2 = vcmask 261120  }
  0xdc   :  { %v6058_v5 = vpack.c.bf16 %v207_v3, %v206_v2  ;;  %v359_v15 = vld [vmem:[#allocation8 + $0x8] sm:$0xff]  ;;  %v488_v23 = vld [vmem:[%s8235_s7 + $0x8] sm:$0xff]  ;;  %v489_v25 = vld [vmem:[%s8235_s7 + $0x10] sm:$0xff]  ;;  %s6904_s24 = smov 96   ;;  %vm2555_vm3 = vcmask 523264   ;;  %s6863_s16 = scalar_lea.hbm %s8247_s19, 16 }
  0xdd   :  { %v6062_v16 = vpack.c.bf16 %v359_v15, %v358_v13  ;;  %v487_v22 = vld [vmem:[%s8235_s7] sm:$0xff]  ;;  %v490_v26 = vld [vmem:[%s8235_s7 + $0x18] sm:$0xff]  ;;  %v5078_v29 = vld [vmem:[#allocation5] ss:$0 sm:$0xff]  ;;  %s6903_s7 = smov 64   ;;  %p6864_p4 = scmp.ne.s32.totalorder %s8247_s19, %s6863_s16 }
  0xde   :  { %6059 = vmatprep.subr.bf16.mxu1 %v6058_v5  ;;  %v7219_v24 = vpack.c.bf16 %v488_v23, %v487_v22  ;;  %v7230_v27 = vpack.c.bf16 %v490_v26, %v489_v25  ;;  %v7253_v32 = vld [vmem:[#allocation7] ss:$0 sm:$0xff]  ;;  %v5087_v52 = vld [vmem:[#allocation10] ss:$0 sm:$0xff]  ;;  %p6867_p5 = scmp.lt.u32.totalorder %s6863_s16, %s8247_s19 }
  0xdf   :  { %6061 = vmatpush3.bf16.msra.mxu1 %v6058_v5 }
  0xe0   :  { %6063 = vmatprep.subr.bf16.mxu1 %v6062_v16  ;;  %p6869_p6 = pnand %p6867_p5, %p6864_p4 }
  0xe1   :  { %v482_v4 = vld [vmem:[%s8258_s21] sm:$0xff]  ;;  %v483_v6 = vld [vmem:[%s8258_s21 + $0x8] sm:$0xff]  ;;  %v484_v9 = vld [vmem:[%s8258_s21 + $0x10] sm:$0xff] }
  0xe2   :  { %v196_v7 = vld [vmem:[%s8259_s2] sm:$0xff]  ;;  %v7159_v8 = vpack.c.bf16 %v483_v6, %v482_v4  ;;  %v485_v10 = vld [vmem:[%s8258_s21 + $0x18] sm:$0xff]  ;;  %v197_v11 = vld [vmem:[%s8259_s2 + $0x8] sm:$0xff] }
  0xe3   :  { %5491 = vmatprep.mubr.msk.f32.mxu1 %vm215_vm1, %v196_v7  ;;  %v7172_v12 = vpack.c.bf16 %v485_v10, %v484_v9  ;;  %v198_v14 = vld [vmem:[%s8259_s2 + $0x10] sm:$0xff]  ;;  %v199_v17 = vld [vmem:[%s8259_s2 + $0x18] sm:$0xff]  ;;  %v204_v20 = vld [vmem:[%s8259_s2 + $0x40] sm:$0xff] }
  0xe4   :  { %6068 = vmatpush3.bf16.msra.mxu0 %v7159_v8  ;;  %5492 = vmatmul.mubr.msk.f32.vlgmr.msra.gmra.mrb[0].mxu1 %vm215_vm1, %v197_v11  ;;  %v202_v18 = vld [vmem:[%s8259_s2 + $0x30] sm:$0xff]  ;;  %v203_v19 = vld [vmem:[%s8259_s2 + $0x38] sm:$0xff]  ;;  %v205_v21 = vld [vmem:[%s8259_s2 + $0x48] sm:$0xff] }
  0xe5   :  { %6069 = vmatprep.subr.bf16.mxu0 %v6900_v0  ;;  %5494 = vmatprep.mubr.msk.f32.mxu1 %vm215_vm1, %v198_v14 }
  0xe6   :  { %6065 = vmatpush3.bf16.msra.mxu1 %v6062_v16 }
  0xe7   :  { %6072 = vmatprep.subr.bf16.mxu1 %v6900_v0 }
  0xe8   :  { %6071 = vmatpush3.bf16.msra.mxu0 %v7172_v12  ;;  %5495 = vmatmul.mubr.msk.f32.gmra.mrb[2].mxu1 %vm215_vm1, %v199_v17 }
  0xe9   :  { %6078 = vmatprep.subr.bf16.mxu0 %v6900_v0  ;;  %5497 = vmatprep.mubr.f32.mxu1 %v6902_v1 }
  0xeb   :  { %5534 = vmatmul.mubr.f32.vlgmr.msra.gmra.mrb[0].mxu0 %v6902_v1 }
  0xec   :  { %6080 = vmatpush3.bf16.msra.mxu0 %v7159_v8  ;;  %5555 = vmatprep.mubr.msk.f32.mxu0 %vm6901_vm0, %v6902_v1 }
  0xed   :  { %6081 = vmatprep.subr.bf16.mxu0 %v6900_v0  ;;  %5498 = vmatmul.mubr.f32.gmra.mrb[4].mxu1 %v6902_v1 }
  0xee   :  { %5500 = vmatprep.mubr.msk.f32.mxu1 %vm215_vm1, %v202_v18 }
  0xf0   :  { %6083 = vmatpush3.bf16.msra.mxu0 %v7172_v12 }
  0xf1   :  { %6090 = vmatprep.subr.bf16.mxu0 %v6900_v0  ;;  %5501 = vmatmul.mubr.msk.f32.gmra.mrb[6].mxu1 %vm215_vm1, %v203_v19 }
  0xf2   :  { %5503 = vmatprep.mubr.msk.f32.mxu1 %vm215_vm1, %v204_v20 }
  0xf5   :  { %5504 = vmatmul.mubr.msk.f32.gmra.mrb[8].mxu1 %vm215_vm1, %v205_v21 }
  0xf6   :  { %5510 = vmatprep.mubr.msk.f32.mxu1 %vm215_vm1, %v196_v7 }
  0xf9   :  { %5511 = vmatmul.mubr.msk.f32.vlgmr.msra.gmra.mrb[10].mxu1 %vm215_vm1, %v197_v11  ;;  %v7291_v11 = vld [vmem:[#allocation11] ss:$0 sm:$0xff] }
  0xfa   :  { %5513 = vmatprep.mubr.msk.f32.mxu1 %vm215_vm1, %v198_v14  ;;  %6074 = vmatpush3.bf16.msra.mxu1 %v7219_v24 }
  0xfb   :  { %6075 = vmatprep.subr.bf16.mxu1 %v6900_v0 }
  0xfd   :  { %5514 = vmatmul.mubr.msk.f32.gmra.mrb[12].mxu1 %vm215_vm1, %v199_v17 }
  0xfe   :  { %5516 = vmatprep.mubr.f32.mxu1 %v6902_v1  ;;  %6077 = vmatpush3.bf16.msra.mxu1 %v7230_v27 }
  0xff   :  { %6084 = vmatprep.subr.bf16.mxu1 %v6900_v0 }
 0x101   :  { %5517 = vmatmul.mubr.f32.gmra.mrb[14].mxu1 %v6902_v1 }
 0x102   :  { %5519 = vmatprep.mubr.msk.f32.mxu1 %vm215_vm1, %v202_v18 }
 0x105   :  { %5520 = vmatmul.mubr.msk.f32.gmra.mrb[16].mxu1 %vm215_vm1, %v203_v19 }
 0x106   :  { %5522 = vmatprep.mubr.msk.f32.mxu1 %vm215_vm1, %v204_v20 }
 0x109   :  { %5523 = vmatmul.mubr.msk.f32.gmra.mrb[18].mxu1 %vm215_vm1, %v205_v21 }
 0x10a   :  { %5544 = vmatprep.mubr.msk.f32.mxu1 %vm6901_vm0, %v6902_v1 }
 0x10d   :  { %5545 = vmatmul.mubr.f32.vlgmr.msra.gmra.mrb[20].mxu1 %v6902_v1 }
 0x10e   :  { %6086 = vmatpush3.bf16.msra.mxu1 %v7219_v24  ;;  %5566 = vmatprep.mubr.msk.f32.mxu1 %vm6901_vm0, %v6902_v1 }
 0x10f   :  { %6087 = vmatprep.subr.bf16.mxu1 %v6900_v0 }
 0x112   :  { %6089 = vmatpush3.bf16.msra.mxu1 %v7230_v27 }
 0x113   :  { %6096 = vmatprep.subr.bf16.mxu1 %v6900_v0 }
 0x1b7   :  { %v5493_v28 = vpop.f32.mrb[0].mxu1 }
 0x1b8   :  { %v7251_v30 = vadd.f32 %v5493_v28, %v5078_v29  ;;  %v309_v31 = vpop.f32.mrb[1].mxu1 }
 0x1b9   :  { %v310_v16 = vadd.f32 %v5078_v29, %v309_v31 }
 0x1bb   :  { %v5496_v34 = vpop.f32.mrb[2].mxu1 }
 0x1bc   :  { %v7256_v37 = vadd.f32 %v5496_v34, %v5078_v29  ;;  %v319_v38 = vpop.f32.mrb[3].mxu1 }
 0x1bd   :  { %v7258_v39 = vadd.f32 %v5078_v29, %v319_v38 }
 0x1be   :  { %v567_v33 = vpop.f32.mrb[0].mxu0 }
 0x1bf   :  { %v568_v35 = vadd.f32 %v7253_v32, %v567_v33  ;;  %v5535_v36 = vpop.f32.mrb[1].mxu0 }
 0x1c0   :  { %v5499_v40 = vpop.f32.mrb[4].mxu1 }
 0x1c1   :  { %655 = vrot.lane.b32.xlu0 %v568_v35, %s6903_s7  ;;  %v7261_v41 = vadd.f32 %v5499_v40, %v5078_v29  ;;  %v329_v42 = vpop.f32.mrb[5].mxu1  ;;  %v647_v17 = vadd.f32 %v568_v35, %v310_v16 }
 0x1c2   :  { %v7263_v43 = vadd.f32 %v5078_v29, %v329_v42 }
 0x1c3   :  { %v5098_v18 = vmul.f32 -1.442695, %v647_v17 }
 0x1c4   :  { %v5502_v44 = vpop.f32.mrb[6].mxu1 }
 0x1c5   :  { %v7265_v45 = vadd.f32 %v5502_v44, %v5078_v29  ;;  %v339_v46 = vpop.f32.mrb[7].mxu1  ;;  %6375 = vpow2.f32 %v5098_v18 }
 0x1c6   :  { %v7267_v47 = vadd.f32 %v5078_v29, %v339_v46 }
 0x1c8   :  { %v5505_v48 = vpop.f32.mrb[8].mxu1 }
 0x1c9   :  { %v7269_v49 = vadd.f32 %v5505_v48, %v5078_v29  ;;  %v349_v50 = vpop.f32.mrb[9].mxu1 }
 0x1ca   :  { %v7271_v51 = vadd.f32 %v5078_v29, %v349_v50 }
 0x1cc   :  { %v5512_v53 = vpop.f32.mrb[10].mxu1 }
 0x1cd   :  { %v7273_v54 = vadd.f32 %v5512_v53, %v5087_v52  ;;  %v433_v55 = vpop.f32.mrb[11].mxu1 }
 0x1ce   :  { %v7275_v56 = vadd.f32 %v5087_v52, %v433_v55 }
 0x1cf   :  { %v6376_v19 = vpop.eup %6375 }
 0x1d0   :  { %v5515_v57 = vpop.f32.mrb[12].mxu1  ;;  %v651_v20 = vadd.f32 1.0, %v6376_v19 }
 0x1d1   :  { %v7277_v58 = vadd.f32 %v5515_v57, %v5087_v52  ;;  %v443_v59 = vpop.f32.mrb[13].mxu1 }
 0x1d2   :  { %v7279_v60 = vadd.f32 %v5087_v52, %v443_v59  ;;  %6377 = vrcp.f32 %v651_v20 }
 0x1d4   :  { %v5518_v61 = vpop.f32.mrb[14].mxu1 }
 0x1d5   :  { %v7281_v62 = vadd.f32 %v5518_v61, %v5087_v52  ;;  %v453_v63 = vpop.f32.mrb[15].mxu1 }
 0x1d6   :  { %v7283_v2 = vadd.f32 %v5087_v52, %v453_v63 }
 0x1d8   :  { %v5521_v3 = vpop.f32.mrb[16].mxu1 }
 0x1d9   :  { %v7285_v4 = vadd.f32 %v5521_v3, %v5087_v52  ;;  %v463_v5 = vpop.f32.mrb[17].mxu1 }
 0x1da   :  { %v7287_v6 = vadd.f32 %v5087_v52, %v463_v5 }
 0x1dc   :  { %v5524_v7 = vpop.f32.mrb[18].mxu1  ;;  %v6378_v22 = vpop.eup %6377 }
 0x1dd   :  { %v473_v9 = vpop.f32.mrb[19].mxu1  ;;  %v479_v21 = vadd.f32 %v5524_v7, %v5087_v52  ;;  %v665_v48 = vsub.f32 1.0, %v6378_v22 }
 0x1de   :  { %v7289_v10 = vadd.f32 %v5087_v52, %v473_v9  ;;  %v671_v52 = vmul.f32 0.0, %v6378_v22 }
 0x1e0   :  { %v643_v13 = vpop.f32.mrb[20].mxu1 }
 0x1e1   :  { %v644_v14 = vadd.f32 %v7291_v11, %v643_v13  ;;  %v5546_v15 = vpop.f32.mrb[21].mxu1 }
 0x1e3   :  { %681 = vrot.lane.b32.xlu0 %v644_v14, %s6903_s7  ;;  %v673_v25 = vadd.f32 %v644_v14, %v479_v21 }
 0x1e5   :  { %v5099_v28 = vmul.f32 -1.442695, %v673_v25 }
 0x1e7   :  { %6379 = vpow2.f32 %v5099_v28 }
 0x1f1   :  { %v6380_v33 = vpop.eup %6379 }
 0x1f2   :  { %v677_v34 = vadd.f32 1.0, %v6380_v33 }
 0x1f4   :  { %6381 = vrcp.f32 %v677_v34 }
 0x1fe   :  { %v6382_v36 = vpop.eup %6381 }
 0x1ff   :  { %v691_v57 = vsub.f32 1.0, %v6382_v36  ;;  %v697_v61 = vmul.f32 0.0, %v6382_v36 }
 0x233   :  { %v656_v23 = vpop.permute.xlu0 %655 }
 0x234   :  { %v658_v26 = vmul.f32 %v6378_v22, %v656_v23 }
 0x236   :  { %660 = vrot.lane.b32.xlu1 %v658_v26, %s6903_s7 }
 0x255   :  { %v682_v29 = vpop.permute.xlu0 %681 }
 0x256   :  { %v684_v31 = vmul.f32 %v6382_v36, %v682_v29 }
 0x258   :  { %686 = vrot.lane.b32.xlu1 %v684_v31, %s6903_s7 }
 0x2a8   :  { %v661_v35 = vpop.permute.xlu1 %660 }
 0x2a9   :  { %v663_v38 = vadd.f32 %v661_v35, %v310_v16 }
 0x2ab   :  { %6383 = vtanh.f32 %v663_v38 }
 0x2b5   :  { %v6384_v40 = vpop.eup %6383 }
 0x2b6   :  { %667 = vrot.lane.b32.xlu0 %v6384_v40, %s6904_s24 }
 0x2ca   :  { %v687_v42 = vpop.permute.xlu1 %686 }
 0x2cb   :  { %v689_v44 = vadd.f32 %v687_v42, %v479_v21 }
 0x2cd   :  { %6385 = vtanh.f32 %v689_v44 }
 0x2d7   :  { %v6386_v46 = vpop.eup %6385 }
 0x2d8   :  { %693 = vrot.lane.b32.xlu1 %v6386_v46, %s6904_s24 }
 0x328   :  { %v668_v50 = vpop.permute.xlu0 %667 }
 0x329   :  { %v670_v53 = vmul.f32 %v668_v50, %v665_v48 }
 0x32b   :  { %v7299_v55 = vadd.f32 %v671_v52, %v670_v53 }
 0x32d   :  { %700 = vrot.lane.b32.xlu0 %v7299_v55, %s6904_s24 }
 0x34a   :  { %v694_v59 = vpop.permute.xlu1 %693 }
 0x34b   :  { %v696_v63 = vmul.f32 %v694_v59, %v691_v57 }
 0x34d   :  { %v7303_v3 = vadd.f32 %v697_v61, %v696_v63 }
 0x34f   :  { %775 = vrot.lane.b32.xlu1 %v7303_v3, %s6904_s24 }
 0x39f   :  { %v7307_v5 = vpop.permute.xlu0 %700 }
 0x3a0   :  { %5556 = vmatmul.mubr.msk.f32.vlgmr.msra.gmra.mrb[2].mxu0 %vm498_vm2, %v7307_v5 }
 0x3a1   :  { %6092 = vmatpush3.bf16.msra.mxu0 %v7159_v8  ;;  %5577 = vmatprep.mubr.msk.f32.mxu0 %vm6901_vm0, %v6902_v1 }
 0x3a2   :  { %6093 = vmatprep.subr.bf16.mxu0 %v6900_v0 }
 0x3a5   :  { %6095 = vmatpush3.bf16.msra.mxu0 %v7172_v12 }
 0x3a6   :  { %6102 = vmatprep.subr.bf16.mxu0 %v6900_v0 }
 0x3c1   :  { %v776_v7 = vpop.permute.xlu1 %775 }
 0x3c2   :  { %5567 = vmatmul.mubr.msk.f32.vlgmr.msra.gmra.mrb[22].mxu1 %vm498_vm2, %v776_v7 }
 0x3c3   :  { %6098 = vmatpush3.bf16.msra.mxu1 %v7219_v24  ;;  %5588 = vmatprep.mubr.msk.f32.mxu1 %vm6901_vm0, %v6902_v1 }
 0x3c4   :  { %6099 = vmatprep.subr.bf16.mxu1 %v6900_v0 }
 0x3c7   :  { %6101 = vmatpush3.bf16.msra.mxu1 %v7230_v27 }
 0x3c8   :  { %6108 = vmatprep.subr.bf16.mxu1 %v6900_v0 }
 0x473   :  { %v770_v9 = vpop.f32.mrb[2].mxu0 }
 0x474   :  { %v771_v13 = vadd.f32 %v7253_v32, %v770_v9  ;;  %v5557_v14 = vpop.f32.mrb[3].mxu0 }
 0x476   :  { %857 = vrot.lane.b32.xlu0 %v771_v13, %s6903_s7  ;;  %v849_v18 = vadd.f32 %v771_v13, %v7251_v30 }
 0x478   :  { %v5102_v19 = vmul.f32 -1.442695, %v849_v18 }
 0x47a   :  { %6387 = vpow2.f32 %v5102_v19 }
 0x484   :  { %v6388_v20 = vpop.eup %6387 }
 0x485   :  { %v853_v21 = vadd.f32 1.0, %v6388_v20 }
 0x487   :  { %6389 = vrcp.f32 %v853_v21 }
 0x491   :  { %v6390_v22 = vpop.eup %6389 }
 0x492   :  { %v867_v48 = vsub.f32 1.0, %v6390_v22  ;;  %v873_v52 = vmul.f32 %v6390_v22, %v7299_v55 }
 0x495   :  { %v845_v15 = vpop.f32.mrb[22].mxu1 }
 0x496   :  { %v846_v16 = vadd.f32 %v7291_v11, %v845_v15  ;;  %v5568_v17 = vpop.f32.mrb[23].mxu1 }
 0x498   :  { %883 = vrot.lane.b32.xlu1 %v846_v16, %s6903_s7  ;;  %v875_v25 = vadd.f32 %v846_v16, %v7289_v10 }
 0x49a   :  { %v5103_v28 = vmul.f32 -1.442695, %v875_v25 }
 0x49c   :  { %6391 = vpow2.f32 %v5103_v28 }
 0x4a6   :  { %v6392_v33 = vpop.eup %6391 }
 0x4a7   :  { %v879_v34 = vadd.f32 1.0, %v6392_v33 }
 0x4a9   :  { %6393 = vrcp.f32 %v879_v34 }
 0x4b3   :  { %v6394_v36 = vpop.eup %6393 }
 0x4b4   :  { %v899_v61 = vmul.f32 %v6394_v36, %v7303_v3 }
 0x4e8   :  { %v858_v23 = vpop.permute.xlu0 %857 }
 0x4e9   :  { %v860_v26 = vmul.f32 %v6390_v22, %v858_v23 }
 0x4eb   :  { %862 = vrot.lane.b32.xlu0 %v860_v26, %s6903_s7 }
 0x50a   :  { %v884_v29 = vpop.permute.xlu1 %883 }
 0x50b   :  { %v886_v31 = vmul.f32 %v6394_v36, %v884_v29 }
 0x50d   :  { %888 = vrot.lane.b32.xlu1 %v886_v31, %s6903_s7 }
 0x55d   :  { %v863_v35 = vpop.permute.xlu0 %862 }
 0x55e   :  { %v865_v38 = vadd.f32 %v863_v35, %v7251_v30  ;;  %v893_v30 = vsub.f32 1.0, %v6394_v36 }
 0x560   :  { %6395 = vtanh.f32 %v865_v38 }
 0x56a   :  { %v6396_v40 = vpop.eup %6395 }
 0x56b   :  { %869 = vrot.lane.b32.xlu0 %v6396_v40, %s6904_s24 }
 0x57f   :  { %v889_v42 = vpop.permute.xlu1 %888 }
 0x580   :  { %v891_v44 = vadd.f32 %v889_v42, %v7289_v10 }
 0x582   :  { %6397 = vtanh.f32 %v891_v44 }
 0x58c   :  { %v6398_v46 = vpop.eup %6397 }
 0x58d   :  { %895 = vrot.lane.b32.xlu1 %v6398_v46, %s6904_s24 }
 0x5dd   :  { %v870_v50 = vpop.permute.xlu0 %869 }
 0x5de   :  { %v872_v53 = vmul.f32 %v870_v50, %v867_v48 }
 0x5e0   :  { %v874_v57 = vadd.f32 %v873_v52, %v872_v53 }
 0x5e2   :  { %902 = vrot.lane.b32.xlu0 %v874_v57, %s6904_s24 }
 0x5ff   :  { %v896_v59 = vpop.permute.xlu1 %895 }
 0x600   :  { %v898_v63 = vmul.f32 %v896_v59, %v893_v30 }
 0x602   :  { %v7339_v7 = vadd.f32 %v899_v61, %v898_v63 }
 0x604   :  { %977 = vrot.lane.b32.xlu1 %v7339_v7, %s6904_s24 }
 0x654   :  { %v7343_v10 = vpop.permute.xlu0 %902 }
 0x655   :  { %5578 = vmatmul.mubr.msk.f32.vlgmr.msra.gmra.mrb[4].mxu0 %vm498_vm2, %v7343_v10 }
 0x656   :  { %6104 = vmatpush3.bf16.msra.mxu0 %v7159_v8  ;;  %5599 = vmatprep.mubr.msk.f32.mxu0 %vm6901_vm0, %v6902_v1 }
 0x657   :  { %6105 = vmatprep.subr.bf16.mxu0 %v6900_v0 }
 0x65a   :  { %6107 = vmatpush3.bf16.msra.mxu0 %v7172_v12 }
 0x65b   :  { %6114 = vmatprep.subr.bf16.mxu0 %v6900_v0 }
 0x676   :  { %v978_v55 = vpop.permute.xlu1 %977 }
 0x677   :  { %5589 = vmatmul.mubr.msk.f32.vlgmr.msra.gmra.mrb[24].mxu1 %vm498_vm2, %v978_v55 }
 0x678   :  { %6110 = vmatpush3.bf16.msra.mxu1 %v7219_v24  ;;  %5610 = vmatprep.mubr.msk.f32.mxu1 %vm6901_vm0, %v6902_v1 }
 0x679   :  { %6111 = vmatprep.subr.bf16.mxu1 %v6900_v0 }
 0x67c   :  { %6113 = vmatpush3.bf16.msra.mxu1 %v7230_v27 }
 0x67d   :  { %6120 = vmatprep.subr.bf16.mxu1 %v6900_v0 }
 0x728   :  { %v972_v9 = vpop.f32.mrb[4].mxu0 }
 0x729   :  { %v973_v13 = vadd.f32 %v7253_v32, %v972_v9  ;;  %v5579_v14 = vpop.f32.mrb[5].mxu0 }
 0x72b   :  { %1059 = vrot.lane.b32.xlu0 %v973_v13, %s6903_s7  ;;  %v1051_v18 = vadd.f32 %v973_v13, %v7258_v39 }
 0x72d   :  { %v5106_v19 = vmul.f32 -1.442695, %v1051_v18 }
 0x72f   :  { %6399 = vpow2.f32 %v5106_v19 }
 0x739   :  { %v6400_v20 = vpop.eup %6399 }
 0x73a   :  { %v1055_v21 = vadd.f32 1.0, %v6400_v20 }
 0x73c   :  { %6401 = vrcp.f32 %v1055_v21 }
 0x746   :  { %v6402_v22 = vpop.eup %6401 }
 0x747   :  { %v1069_v48 = vsub.f32 1.0, %v6402_v22  ;;  %v1075_v52 = vmul.f32 %v6402_v22, %v874_v57 }
 0x74a   :  { %v1047_v15 = vpop.f32.mrb[24].mxu1 }
 0x74b   :  { %v1048_v16 = vadd.f32 %v7291_v11, %v1047_v15  ;;  %v5590_v17 = vpop.f32.mrb[25].mxu1 }
 0x74d   :  { %1085 = vrot.lane.b32.xlu1 %v1048_v16, %s6903_s7  ;;  %v1077_v25 = vadd.f32 %v1048_v16, %v7285_v4 }
 0x74f   :  { %v5107_v28 = vmul.f32 -1.442695, %v1077_v25 }
 0x751   :  { %6403 = vpow2.f32 %v5107_v28 }
 0x75b   :  { %v6404_v33 = vpop.eup %6403 }
 0x75c   :  { %v1081_v34 = vadd.f32 1.0, %v6404_v33 }
 0x75e   :  { %6405 = vrcp.f32 %v1081_v34 }
 0x768   :  { %v6406_v36 = vpop.eup %6405 }
 0x769   :  { %v1095_v59 = vsub.f32 1.0, %v6406_v36  ;;  %v1101_v61 = vmul.f32 %v6406_v36, %v7339_v7 }
 0x79d   :  { %v1060_v23 = vpop.permute.xlu0 %1059 }
 0x79e   :  { %v1062_v26 = vmul.f32 %v6402_v22, %v1060_v23 }
 0x7a0   :  { %1064 = vrot.lane.b32.xlu0 %v1062_v26, %s6903_s7 }
 0x7bf   :  { %v1086_v29 = vpop.permute.xlu1 %1085 }
 0x7c0   :  { %v1088_v31 = vmul.f32 %v6406_v36, %v1086_v29 }
 0x7c2   :  { %1090 = vrot.lane.b32.xlu1 %v1088_v31, %s6903_s7 }
 0x812   :  { %v1065_v35 = vpop.permute.xlu0 %1064 }
 0x813   :  { %v1067_v38 = vadd.f32 %v1065_v35, %v7258_v39 }
 0x815   :  { %6407 = vtanh.f32 %v1067_v38 }
 0x81f   :  { %v6408_v40 = vpop.eup %6407 }
 0x820   :  { %1071 = vrot.lane.b32.xlu0 %v6408_v40, %s6904_s24 }
 0x834   :  { %v1091_v42 = vpop.permute.xlu1 %1090 }
 0x835   :  { %v1093_v44 = vadd.f32 %v1091_v42, %v7285_v4 }
 0x837   :  { %6409 = vtanh.f32 %v1093_v44 }
 0x841   :  { %v6410_v46 = vpop.eup %6409 }
 0x842   :  { %1097 = vrot.lane.b32.xlu1 %v6410_v46, %s6904_s24 }
 0x892   :  { %v1072_v50 = vpop.permute.xlu0 %1071 }
 0x893   :  { %v1074_v53 = vmul.f32 %v1072_v50, %v1069_v48 }
 0x895   :  { %v1076_v30 = vadd.f32 %v1075_v52, %v1074_v53 }
 0x897   :  { %1104 = vrot.lane.b32.xlu0 %v1076_v30, %s6904_s24 }
 0x8b4   :  { %v1098_v39 = vpop.permute.xlu1 %1097 }
 0x8b5   :  { %v1100_v63 = vmul.f32 %v1098_v39, %v1095_v59 }
 0x8b7   :  { %v7374_v55 = vadd.f32 %v1101_v61, %v1100_v63 }
 0x8b9   :  { %1179 = vrot.lane.b32.xlu1 %v7374_v55, %s6904_s24 }
 0x909   :  { %v7378_v4 = vpop.permute.xlu0 %1104 }
 0x90a   :  { %5600 = vmatmul.mubr.msk.f32.vlgmr.msra.gmra.mrb[6].mxu0 %vm498_vm2, %v7378_v4 }
 0x90b   :  { %6116 = vmatpush3.bf16.msra.mxu0 %v7159_v8  ;;  %5621 = vmatprep.mubr.msk.f32.mxu0 %vm6901_vm0, %v6902_v1 }
 0x90c   :  { %6117 = vmatprep.subr.bf16.mxu0 %v6900_v0 }
 0x90f   :  { %6119 = vmatpush3.bf16.msra.mxu0 %v7172_v12 }
 0x910   :  { %6126 = vmatprep.subr.bf16.mxu0 %v6900_v0 }
 0x92b   :  { %v1180_v57 = vpop.permute.xlu1 %1179 }
 0x92c   :  { %5611 = vmatmul.mubr.msk.f32.vlgmr.msra.gmra.mrb[26].mxu1 %vm498_vm2, %v1180_v57 }
 0x92d   :  { %6122 = vmatpush3.bf16.msra.mxu1 %v7219_v24  ;;  %5632 = vmatprep.mubr.msk.f32.mxu1 %vm6901_vm0, %v6902_v1 }
 0x92e   :  { %6123 = vmatprep.subr.bf16.mxu1 %v6900_v0 }
 0x931   :  { %6125 = vmatpush3.bf16.msra.mxu1 %v7230_v27 }
 0x932   :  { %6132 = vmatprep.subr.bf16.mxu1 %v6900_v0 }
 0x9dd   :  { %v1174_v9 = vpop.f32.mrb[6].mxu0 }
 0x9de   :  { %v1175_v13 = vadd.f32 %v7253_v32, %v1174_v9  ;;  %v5601_v14 = vpop.f32.mrb[7].mxu0 }
 0x9e0   :  { %1261 = vrot.lane.b32.xlu0 %v1175_v13, %s6903_s7  ;;  %v1253_v18 = vadd.f32 %v1175_v13, %v7256_v37 }
 0x9e2   :  { %v5110_v19 = vmul.f32 -1.442695, %v1253_v18 }
 0x9e4   :  { %6411 = vpow2.f32 %v5110_v19 }
 0x9ee   :  { %v6412_v20 = vpop.eup %6411 }
 0x9ef   :  { %v1257_v21 = vadd.f32 1.0, %v6412_v20 }
 0x9f1   :  { %6413 = vrcp.f32 %v1257_v21 }
 0x9fb   :  { %v6414_v22 = vpop.eup %6413 }
 0x9fc   :  { %v1271_v48 = vsub.f32 1.0, %v6414_v22  ;;  %v1277_v52 = vmul.f32 %v6414_v22, %v1076_v30 }
 0x9ff   :  { %v1249_v15 = vpop.f32.mrb[26].mxu1 }
 0xa00   :  { %v1250_v16 = vadd.f32 %v7291_v11, %v1249_v15  ;;  %v5612_v17 = vpop.f32.mrb[27].mxu1 }
 0xa02   :  { %1287 = vrot.lane.b32.xlu1 %v1250_v16, %s6903_s7  ;;  %v1279_v25 = vadd.f32 %v1250_v16, %v7287_v6 }
 0xa04   :  { %v5111_v28 = vmul.f32 -1.442695, %v1279_v25 }
 0xa06   :  { %6415 = vpow2.f32 %v5111_v28 }
 0xa10   :  { %v6416_v33 = vpop.eup %6415 }
 0xa11   :  { %v1283_v34 = vadd.f32 1.0, %v6416_v33 }
 0xa13   :  { %6417 = vrcp.f32 %v1283_v34 }
 0xa1d   :  { %v6418_v36 = vpop.eup %6417 }
 0xa1e   :  { %v1297_v39 = vsub.f32 1.0, %v6418_v36  ;;  %v1303_v61 = vmul.f32 %v6418_v36, %v7374_v55 }
 0xa52   :  { %v1262_v23 = vpop.permute.xlu0 %1261 }
 0xa53   :  { %v1264_v26 = vmul.f32 %v6414_v22, %v1262_v23 }
 0xa55   :  { %1266 = vrot.lane.b32.xlu0 %v1264_v26, %s6903_s7 }
 0xa74   :  { %v1288_v29 = vpop.permute.xlu1 %1287 }
 0xa75   :  { %v1290_v31 = vmul.f32 %v6418_v36, %v1288_v29 }
 0xa77   :  { %1292 = vrot.lane.b32.xlu1 %v1290_v31, %s6903_s7 }
 0xac7   :  { %v1267_v35 = vpop.permute.xlu0 %1266 }
 0xac8   :  { %v1269_v38 = vadd.f32 %v1267_v35, %v7256_v37 }
 0xaca   :  { %6419 = vtanh.f32 %v1269_v38 }
 0xad4   :  { %v6420_v40 = vpop.eup %6419 }
 0xad5   :  { %1273 = vrot.lane.b32.xlu0 %v6420_v40, %s6904_s24 }
 0xae9   :  { %v1293_v42 = vpop.permute.xlu1 %1292 }
 0xaea   :  { %v1295_v44 = vadd.f32 %v1293_v42, %v7287_v6 }
 0xaec   :  { %6421 = vtanh.f32 %v1295_v44 }
 0xaf6   :  { %v6422_v46 = vpop.eup %6421 }
 0xaf7   :  { %1299 = vrot.lane.b32.xlu1 %v6422_v46, %s6904_s24 }
 0xb47   :  { %v1274_v50 = vpop.permute.xlu0 %1273 }
 0xb48   :  { %v1276_v53 = vmul.f32 %v1274_v50, %v1271_v48 }
 0xb4a   :  { %v1278_v59 = vadd.f32 %v1277_v52, %v1276_v53 }
 0xb4c   :  { %1306 = vrot.lane.b32.xlu0 %v1278_v59, %s6904_s24 }
 0xb69   :  { %v1300_v37 = vpop.permute.xlu1 %1299 }
 0xb6a   :  { %v1302_v63 = vmul.f32 %v1300_v37, %v1297_v39 }
 0xb6c   :  { %v7409_v57 = vadd.f32 %v1303_v61, %v1302_v63 }
 0xb6e   :  { %1381 = vrot.lane.b32.xlu1 %v7409_v57, %s6904_s24 }
 0xbbe   :  { %v7413_v6 = vpop.permute.xlu0 %1306 }
 0xbbf   :  { %5622 = vmatmul.mubr.msk.f32.vlgmr.msra.gmra.mrb[8].mxu0 %vm498_vm2, %v7413_v6 }
 0xbc0   :  { %6128 = vmatpush3.bf16.msra.mxu0 %v7159_v8  ;;  %5643 = vmatprep.mubr.msk.f32.mxu0 %vm6901_vm0, %v6902_v1 }
 0xbc1   :  { %6129 = vmatprep.subr.bf16.mxu0 %v6900_v0 }
 0xbc4   :  { %6131 = vmatpush3.bf16.msra.mxu0 %v7172_v12 }
 0xbc5   :  { %6138 = vmatprep.subr.bf16.mxu0 %v6900_v0 }
 0xbe0   :  { %v1382_v30 = vpop.permute.xlu1 %1381 }
 0xbe1   :  { %5633 = vmatmul.mubr.msk.f32.vlgmr.msra.gmra.mrb[28].mxu1 %vm498_vm2, %v1382_v30 }
 0xbe2   :  { %6134 = vmatpush3.bf16.msra.mxu1 %v7219_v24  ;;  %5654 = vmatprep.mubr.msk.f32.mxu1 %vm6901_vm0, %v6902_v1 }
 0xbe3   :  { %6135 = vmatprep.subr.bf16.mxu1 %v6900_v0 }
 0xbe6   :  { %6137 = vmatpush3.bf16.msra.mxu1 %v7230_v27 }
 0xbe7   :  { %6144 = vmatprep.subr.bf16.mxu1 %v6900_v0 }
 0xc92   :  { %v1376_v9 = vpop.f32.mrb[8].mxu0 }
 0xc93   :  { %v1377_v13 = vadd.f32 %v7253_v32, %v1376_v9  ;;  %v5623_v14 = vpop.f32.mrb[9].mxu0 }
 0xc95   :  { %1463 = vrot.lane.b32.xlu0 %v1377_v13, %s6903_s7  ;;  %v1455_v18 = vadd.f32 %v1377_v13, %v7263_v43 }
 0xc97   :  { %v5114_v19 = vmul.f32 -1.442695, %v1455_v18 }
 0xc99   :  { %6423 = vpow2.f32 %v5114_v19 }
 0xca3   :  { %v6424_v20 = vpop.eup %6423 }
 0xca4   :  { %v1459_v21 = vadd.f32 1.0, %v6424_v20 }
 0xca6   :  { %6425 = vrcp.f32 %v1459_v21 }
 0xcb0   :  { %v6426_v22 = vpop.eup %6425 }
 0xcb1   :  { %v1473_v48 = vsub.f32 1.0, %v6426_v22  ;;  %v1479_v52 = vmul.f32 %v6426_v22, %v1278_v59 }
 0xcb4   :  { %v1451_v15 = vpop.f32.mrb[28].mxu1 }
 0xcb5   :  { %v1452_v16 = vadd.f32 %v7291_v11, %v1451_v15  ;;  %v5634_v17 = vpop.f32.mrb[29].mxu1 }
 0xcb7   :  { %1489 = vrot.lane.b32.xlu1 %v1452_v16, %s6903_s7  ;;  %v1481_v25 = vadd.f32 %v1452_v16, %v7281_v62 }
 0xcb9   :  { %v5115_v28 = vmul.f32 -1.442695, %v1481_v25 }
 0xcbb   :  { %6427 = vpow2.f32 %v5115_v28 }
 0xcc5   :  { %v6428_v33 = vpop.eup %6427 }
 0xcc6   :  { %v1485_v34 = vadd.f32 1.0, %v6428_v33 }
 0xcc8   :  { %6429 = vrcp.f32 %v1485_v34 }
 0xcd2   :  { %v6430_v36 = vpop.eup %6429 }
 0xcd3   :  { %v1499_v37 = vsub.f32 1.0, %v6430_v36  ;;  %v1505_v61 = vmul.f32 %v6430_v36, %v7409_v57 }
 0xd07   :  { %v1464_v23 = vpop.permute.xlu0 %1463 }
 0xd08   :  { %v1466_v26 = vmul.f32 %v6426_v22, %v1464_v23 }
 0xd0a   :  { %1468 = vrot.lane.b32.xlu0 %v1466_v26, %s6903_s7 }
 0xd29   :  { %v1490_v29 = vpop.permute.xlu1 %1489 }
 0xd2a   :  { %v1492_v31 = vmul.f32 %v6430_v36, %v1490_v29 }
 0xd2c   :  { %1494 = vrot.lane.b32.xlu1 %v1492_v31, %s6903_s7 }
 0xd7c   :  { %v1469_v35 = vpop.permute.xlu0 %1468 }
 0xd7d   :  { %v1471_v38 = vadd.f32 %v1469_v35, %v7263_v43 }
 0xd7f   :  { %6431 = vtanh.f32 %v1471_v38 }
 0xd89   :  { %v6432_v40 = vpop.eup %6431 }
 0xd8a   :  { %1475 = vrot.lane.b32.xlu0 %v6432_v40, %s6904_s24 }
 0xd9e   :  { %v1495_v42 = vpop.permute.xlu1 %1494 }
 0xd9f   :  { %v1497_v44 = vadd.f32 %v1495_v42, %v7281_v62 }
 0xda1   :  { %6433 = vtanh.f32 %v1497_v44 }
 0xdab   :  { %v6434_v46 = vpop.eup %6433 }
 0xdac   :  { %1501 = vrot.lane.b32.xlu1 %v6434_v46, %s6904_s24 }
 0xdfc   :  { %v1476_v50 = vpop.permute.xlu0 %1475 }
 0xdfd   :  { %v1478_v53 = vmul.f32 %v1476_v50, %v1473_v48 }
 0xdff   :  { %v1480_v39 = vadd.f32 %v1479_v52, %v1478_v53 }
 0xe01   :  { %1508 = vrot.lane.b32.xlu0 %v1480_v39, %s6904_s24 }
 0xe1e   :  { %v1502_v43 = vpop.permute.xlu1 %1501 }
 0xe1f   :  { %v1504_v63 = vmul.f32 %v1502_v43, %v1499_v37 }
 0xe21   :  { %v7444_v30 = vadd.f32 %v1505_v61, %v1504_v63 }
 0xe23   :  { %1583 = vrot.lane.b32.xlu1 %v7444_v30, %s6904_s24 }
 0xe73   :  { %v7448_v62 = vpop.permute.xlu0 %1508 }
 0xe74   :  { %5644 = vmatmul.mubr.msk.f32.vlgmr.msra.gmra.mrb[10].mxu0 %vm498_vm2, %v7448_v62 }
 0xe75   :  { %6140 = vmatpush3.bf16.msra.mxu0 %v7159_v8  ;;  %5665 = vmatprep.mubr.msk.f32.mxu0 %vm6901_vm0, %v6902_v1 }
 0xe76   :  { %6141 = vmatprep.subr.bf16.mxu0 %v6900_v0 }
 0xe79   :  { %6143 = vmatpush3.bf16.msra.mxu0 %v7172_v12 }
 0xe7a   :  { %6150 = vmatprep.subr.bf16.mxu0 %v6900_v0 }
 0xe95   :  { %v1584_v59 = vpop.permute.xlu1 %1583 }
 0xe96   :  { %5655 = vmatmul.mubr.msk.f32.vlgmr.msra.gmra.mrb[30].mxu1 %vm498_vm2, %v1584_v59 }
 0xe97   :  { %6146 = vmatpush3.bf16.msra.mxu1 %v7219_v24  ;;  %5676 = vmatprep.mubr.msk.f32.mxu1 %vm6901_vm0, %v6902_v1 }
 0xe98   :  { %6147 = vmatprep.subr.bf16.mxu1 %v6900_v0 }
 0xe9b   :  { %6149 = vmatpush3.bf16.msra.mxu1 %v7230_v27 }
 0xe9c   :  { %6156 = vmatprep.subr.bf16.mxu1 %v6900_v0 }
 0xf47   :  { %v1578_v9 = vpop.f32.mrb[10].mxu0 }
 0xf48   :  { %v1579_v13 = vadd.f32 %v7253_v32, %v1578_v9  ;;  %v5645_v14 = vpop.f32.mrb[11].mxu0 }
 0xf4a   :  { %1665 = vrot.lane.b32.xlu0 %v1579_v13, %s6903_s7  ;;  %v1657_v18 = vadd.f32 %v1579_v13, %v7261_v41 }
 0xf4c   :  { %v5118_v19 = vmul.f32 -1.442695, %v1657_v18 }
 0xf4e   :  { %6435 = vpow2.f32 %v5118_v19 }
 0xf58   :  { %v6436_v20 = vpop.eup %6435 }
 0xf59   :  { %v1661_v21 = vadd.f32 1.0, %v6436_v20 }
 0xf5b   :  { %6437 = vrcp.f32 %v1661_v21 }
 0xf65   :  { %v6438_v22 = vpop.eup %6437 }
 0xf66   :  { %v1675_v48 = vsub.f32 1.0, %v6438_v22  ;;  %v1681_v52 = vmul.f32 %v6438_v22, %v1480_v39 }
 0xf69   :  { %v1653_v15 = vpop.f32.mrb[30].mxu1 }
 0xf6a   :  { %v1654_v16 = vadd.f32 %v7291_v11, %v1653_v15  ;;  %v5656_v17 = vpop.f32.mrb[31].mxu1 }
 0xf6c   :  { %1691 = vrot.lane.b32.xlu1 %v1654_v16, %s6903_s7  ;;  %v1683_v25 = vadd.f32 %v1654_v16, %v7283_v2 }
 0xf6e   :  { %v5119_v28 = vmul.f32 -1.442695, %v1683_v25 }
 0xf70   :  { %6439 = vpow2.f32 %v5119_v28 }
 0xf7a   :  { %v6440_v33 = vpop.eup %6439 }
 0xf7b   :  { %v1687_v34 = vadd.f32 1.0, %v6440_v33 }
 0xf7d   :  { %6441 = vrcp.f32 %v1687_v34 }
 0xf87   :  { %v6442_v36 = vpop.eup %6441 }
 0xf88   :  { %v1701_v43 = vsub.f32 1.0, %v6442_v36  ;;  %v1707_v61 = vmul.f32 %v6442_v36, %v7444_v30 }
 0xfbc   :  { %v1666_v23 = vpop.permute.xlu0 %1665 }
 0xfbd   :  { %v1668_v26 = vmul.f32 %v6438_v22, %v1666_v23 }
 0xfbf   :  { %1670 = vrot.lane.b32.xlu0 %v1668_v26, %s6903_s7 }
 0xfde   :  { %v1692_v29 = vpop.permute.xlu1 %1691 }
 0xfdf   :  { %v1694_v31 = vmul.f32 %v6442_v36, %v1692_v29 }
 0xfe1   :  { %1696 = vrot.lane.b32.xlu1 %v1694_v31, %s6903_s7 }
0x1031   :  { %v1671_v35 = vpop.permute.xlu0 %1670 }
0x1032   :  { %v1673_v38 = vadd.f32 %v1671_v35, %v7261_v41 }
0x1034   :  { %6443 = vtanh.f32 %v1673_v38 }
0x103e   :  { %v6444_v40 = vpop.eup %6443 }
0x103f   :  { %1677 = vrot.lane.b32.xlu0 %v6444_v40, %s6904_s24 }
0x1053   :  { %v1697_v42 = vpop.permute.xlu1 %1696 }
0x1054   :  { %v1699_v44 = vadd.f32 %v1697_v42, %v7283_v2 }
0x1056   :  { %6445 = vtanh.f32 %v1699_v44 }
0x1060   :  { %v6446_v46 = vpop.eup %6445 }
0x1061   :  { %1703 = vrot.lane.b32.xlu1 %v6446_v46, %s6904_s24 }
0x10b1   :  { %v1678_v50 = vpop.permute.xlu0 %1677 }
0x10b2   :  { %v1680_v53 = vmul.f32 %v1678_v50, %v1675_v48 }
0x10b4   :  { %v1682_v37 = vadd.f32 %v1681_v52, %v1680_v53 }
0x10b6   :  { %1710 = vrot.lane.b32.xlu0 %v1682_v37, %s6904_s24 }
0x10d3   :  { %v1704_v41 = vpop.permute.xlu1 %1703 }
0x10d4   :  { %v1706_v63 = vmul.f32 %v1704_v41, %v1701_v43 }
0x10d6   :  { %v7479_v59 = vadd.f32 %v1707_v61, %v1706_v63 }
0x10d8   :  { %1785 = vrot.lane.b32.xlu1 %v7479_v59, %s6904_s24 }
0x1128   :  { %v7483_v2 = vpop.permute.xlu0 %1710 }
0x1129   :  { %5666 = vmatmul.mubr.msk.f32.vlgmr.msra.gmra.mrb[12].mxu0 %vm498_vm2, %v7483_v2 }
0x112a   :  { %6152 = vmatpush3.bf16.msra.mxu0 %v7159_v8  ;;  %5687 = vmatprep.mubr.msk.f32.mxu0 %vm6901_vm0, %v6902_v1 }
0x112b   :  { %6153 = vmatprep.subr.bf16.mxu0 %v6900_v0 }
0x112e   :  { %6155 = vmatpush3.bf16.msra.mxu0 %v7172_v12 }
0x112f   :  { %6162 = vmatprep.subr.bf16.mxu0 %v6900_v0 }
0x114a   :  { %v1786_v39 = vpop.permute.xlu1 %1785 }
0x114b   :  { %5677 = vmatmul.mubr.msk.f32.vlgmr.msra.gmra.mrb[32].mxu1 %vm498_vm2, %v1786_v39 }
0x114c   :  { %6158 = vmatpush3.bf16.msra.mxu1 %v7219_v24  ;;  %5698 = vmatprep.mubr.msk.f32.mxu1 %vm6901_vm0, %v6902_v1 }
0x114d   :  { %6159 = vmatprep.subr.bf16.mxu1 %v6900_v0 }
0x1150   :  { %6161 = vmatpush3.bf16.msra.mxu1 %v7230_v27 }
0x1151   :  { %6168 = vmatprep.subr.bf16.mxu1 %v6900_v0 }
0x11fc   :  { %v1780_v9 = vpop.f32.mrb[12].mxu0 }
0x11fd   :  { %v1781_v13 = vadd.f32 %v7253_v32, %v1780_v9  ;;  %v5667_v14 = vpop.f32.mrb[13].mxu0 }
0x11ff   :  { %1867 = vrot.lane.b32.xlu0 %v1781_v13, %s6903_s7  ;;  %v1859_v18 = vadd.f32 %v1781_v13, %v7267_v47 }
0x1201   :  { %v5122_v19 = vmul.f32 -1.442695, %v1859_v18 }
0x1203   :  { %6447 = vpow2.f32 %v5122_v19 }
0x120d   :  { %v6448_v20 = vpop.eup %6447 }
0x120e   :  { %v1863_v21 = vadd.f32 1.0, %v6448_v20 }
0x1210   :  { %6449 = vrcp.f32 %v1863_v21 }
0x121a   :  { %v6450_v22 = vpop.eup %6449 }
0x121b   :  { %v1877_v48 = vsub.f32 1.0, %v6450_v22  ;;  %v1883_v52 = vmul.f32 %v6450_v22, %v1682_v37 }
0x121e   :  { %v1855_v15 = vpop.f32.mrb[32].mxu1 }
0x121f   :  { %v1856_v16 = vadd.f32 %v7291_v11, %v1855_v15  ;;  %v5678_v17 = vpop.f32.mrb[33].mxu1 }
0x1221   :  { %1893 = vrot.lane.b32.xlu1 %v1856_v16, %s6903_s7  ;;  %v1885_v25 = vadd.f32 %v1856_v16, %v7277_v58 }
0x1223   :  { %v5123_v28 = vmul.f32 -1.442695, %v1885_v25 }
0x1225   :  { %6451 = vpow2.f32 %v5123_v28 }
0x122f   :  { %v6452_v33 = vpop.eup %6451 }
0x1230   :  { %v1889_v34 = vadd.f32 1.0, %v6452_v33 }
0x1232   :  { %6453 = vrcp.f32 %v1889_v34 }
0x123c   :  { %v6454_v36 = vpop.eup %6453 }
0x123d   :  { %v1903_v41 = vsub.f32 1.0, %v6454_v36  ;;  %v1909_v61 = vmul.f32 %v6454_v36, %v7479_v59 }
0x1271   :  { %v1868_v23 = vpop.permute.xlu0 %1867 }
0x1272   :  { %v1870_v26 = vmul.f32 %v6450_v22, %v1868_v23 }
0x1274   :  { %1872 = vrot.lane.b32.xlu0 %v1870_v26, %s6903_s7 }
0x1293   :  { %v1894_v29 = vpop.permute.xlu1 %1893 }
0x1294   :  { %v1896_v31 = vmul.f32 %v6454_v36, %v1894_v29 }
0x1296   :  { %1898 = vrot.lane.b32.xlu1 %v1896_v31, %s6903_s7 }
0x12e6   :  { %v1873_v35 = vpop.permute.xlu0 %1872 }
0x12e7   :  { %v1875_v38 = vadd.f32 %v1873_v35, %v7267_v47 }
0x12e9   :  { %6455 = vtanh.f32 %v1875_v38 }
0x12f3   :  { %v6456_v40 = vpop.eup %6455 }
0x12f4   :  { %1879 = vrot.lane.b32.xlu0 %v6456_v40, %s6904_s24 }
0x1308   :  { %v1899_v42 = vpop.permute.xlu1 %1898 }
0x1309   :  { %v1901_v44 = vadd.f32 %v1899_v42, %v7277_v58 }
0x130b   :  { %6457 = vtanh.f32 %v1901_v44 }
0x1315   :  { %v6458_v46 = vpop.eup %6457 }
0x1316   :  { %1905 = vrot.lane.b32.xlu1 %v6458_v46, %s6904_s24 }
0x1366   :  { %v1880_v50 = vpop.permute.xlu0 %1879 }
0x1367   :  { %v1882_v53 = vmul.f32 %v1880_v50, %v1877_v48 }
0x1369   :  { %v1884_v43 = vadd.f32 %v1883_v52, %v1882_v53 }
0x136b   :  { %1912 = vrot.lane.b32.xlu0 %v1884_v43, %s6904_s24 }
0x1388   :  { %v1906_v47 = vpop.permute.xlu1 %1905 }
0x1389   :  { %v1908_v63 = vmul.f32 %v1906_v47, %v1903_v41 }
0x138b   :  { %v7514_v39 = vadd.f32 %v1909_v61, %v1908_v63  ;;  %v6615_v63 = vld [vmem:[#allocation7] ss:$0 sm:$0xff] }
0x138d   :  { %1987 = vrot.lane.b32.xlu1 %v7514_v39, %s6904_s24 }
0x13dd   :  { %v7518_v58 = vpop.permute.xlu0 %1912 }
0x13de   :  { %5688 = vmatmul.mubr.msk.f32.vlgmr.msra.gmra.mrb[14].mxu0 %vm498_vm2, %v7518_v58 }
0x13df   :  { %6164 = vmatpush3.bf16.msra.mxu0 %v7159_v8  ;;  %5709 = vmatprep.mubr.msk.f32.mxu0 %vm6901_vm0, %v6902_v1 }
0x13e0   :  { %6165 = vmatprep.subr.bf16.mxu0 %v6900_v0 }
0x13e3   :  { %6167 = vmatpush3.bf16.msra.mxu0 %v7172_v12 }
0x13e4   :  { %6174 = vmatprep.subr.bf16.mxu0 %v6900_v0 }
0x13ff   :  { %v1988_v37 = vpop.permute.xlu1 %1987 }
0x1400   :  { %5699 = vmatmul.mubr.msk.f32.vlgmr.msra.gmra.mrb[34].mxu1 %vm498_vm2, %v1988_v37 }
0x1401   :  { %6170 = vmatpush3.bf16.msra.mxu1 %v7219_v24  ;;  %5720 = vmatprep.mubr.msk.f32.mxu1 %vm6901_vm0, %v6902_v1 }
0x1402   :  { %6171 = vmatprep.subr.bf16.mxu1 %v6900_v0 }
0x1405   :  { %6173 = vmatpush3.bf16.msra.mxu1 %v7230_v27 }
0x1406   :  { %6180 = vmatprep.subr.bf16.mxu1 %v6900_v0 }
0x14b1   :  { %v1982_v9 = vpop.f32.mrb[14].mxu0 }
0x14b2   :  { %v1983_v13 = vadd.f32 %v7253_v32, %v1982_v9  ;;  %v5689_v14 = vpop.f32.mrb[15].mxu0 }
0x14b4   :  { %2069 = vrot.lane.b32.xlu0 %v1983_v13, %s6903_s7  ;;  %v2061_v18 = vadd.f32 %v1983_v13, %v7265_v45 }
0x14b6   :  { %v5126_v19 = vmul.f32 -1.442695, %v2061_v18 }
0x14b8   :  { %6459 = vpow2.f32 %v5126_v19 }
0x14c2   :  { %v6460_v20 = vpop.eup %6459 }
0x14c3   :  { %v2065_v21 = vadd.f32 1.0, %v6460_v20 }
0x14c5   :  { %6461 = vrcp.f32 %v2065_v21 }
0x14cf   :  { %v6462_v22 = vpop.eup %6461 }
0x14d0   :  { %v2079_v44 = vsub.f32 1.0, %v6462_v22  ;;  %v2085_v48 = vmul.f32 %v6462_v22, %v1884_v43 }
0x14d3   :  { %v2057_v15 = vpop.f32.mrb[34].mxu1 }
0x14d4   :  { %v2058_v16 = vadd.f32 %v7291_v11, %v2057_v15  ;;  %v5700_v17 = vpop.f32.mrb[35].mxu1 }
0x14d6   :  { %2095 = vrot.lane.b32.xlu1 %v2058_v16, %s6903_s7  ;;  %v2087_v32 = vadd.f32 %v2058_v16, %v7279_v60 }
0x14d8   :  { %v5127_v26 = vmul.f32 -1.442695, %v2087_v32 }
0x14da   :  { %6463 = vpow2.f32 %v5127_v26 }
0x14e4   :  { %v6464_v11 = vpop.eup %6463 }
0x14e5   :  { %v2091_v28 = vadd.f32 1.0, %v6464_v11 }
0x14e7   :  { %6465 = vrcp.f32 %v2091_v28 }
0x14f1   :  { %v6466_v33 = vpop.eup %6465 }
0x14f2   :  { %v2105_v53 = vsub.f32 1.0, %v6466_v33  ;;  %v2111_v41 = vmul.f32 %v6466_v33, %v7514_v39 }
0x1526   :  { %v2070_v23 = vpop.permute.xlu0 %2069 }
0x1527   :  { %v2072_v25 = vmul.f32 %v6462_v22, %v2070_v23 }
0x1529   :  { %2074 = vrot.lane.b32.xlu0 %v2072_v25, %s6903_s7 }
0x1548   :  { %v2096_v34 = vpop.permute.xlu1 %2095 }
0x1549   :  { %v2098_v36 = vmul.f32 %v6466_v33, %v2096_v34 }
0x154b   :  { %2100 = vrot.lane.b32.xlu1 %v2098_v36, %s6903_s7 }
0x159b   :  { %v2075_v29 = vpop.permute.xlu0 %2074 }
0x159c   :  { %v2077_v31 = vadd.f32 %v2075_v29, %v7265_v45 }
0x159e   :  { %6467 = vtanh.f32 %v2077_v31 }
0x15a8   :  { %v6468_v35 = vpop.eup %6467 }
0x15a9   :  { %2081 = vrot.lane.b32.xlu0 %v6468_v35, %s6904_s24 }
0x15bd   :  { %v2101_v38 = vpop.permute.xlu1 %2100 }
0x15be   :  { %v2103_v40 = vadd.f32 %v2101_v38, %v7279_v60 }
0x15c0   :  { %6469 = vtanh.f32 %v2103_v40 }
0x15ca   :  { %v6470_v42 = vpop.eup %6469 }
0x15cb   :  { %2107 = vrot.lane.b32.xlu1 %v6470_v42, %s6904_s24 }
0x161b   :  { %v2082_v46 = vpop.permute.xlu0 %2081 }
0x161c   :  { %v2084_v50 = vmul.f32 %v2082_v46, %v2079_v44 }
0x161e   :  { %v2086_v52 = vadd.f32 %v2085_v48, %v2084_v50 }
0x1620   :  { %2114 = vrot.lane.b32.xlu0 %v2086_v52, %s6904_s24 }
0x163d   :  { %v2108_v45 = vpop.permute.xlu1 %2107 }
0x163e   :  { %v2110_v47 = vmul.f32 %v2108_v45, %v2105_v53 }
0x1640   :  { %v7549_v61 = vadd.f32 %v2111_v41, %v2110_v47 }
0x1642   :  { %2189 = vrot.lane.b32.xlu1 %v7549_v61, %s6904_s24 }
0x1692   :  { %v7553_v60 = vpop.permute.xlu0 %2114 }
0x1693   :  { %5710 = vmatmul.mubr.msk.f32.vlgmr.msra.gmra.mrb[16].mxu0 %vm498_vm2, %v7553_v60 }
0x1694   :  { %6176 = vmatpush3.bf16.msra.mxu0 %v7159_v8  ;;  %5731 = vmatprep.mubr.msk.f32.mxu0 %vm6901_vm0, %v6902_v1 }
0x1695   :  { %6177 = vmatprep.subr.bf16.mxu0 %v6900_v0 }
0x1698   :  { %6179 = vmatpush3.bf16.msra.mxu0 %v7172_v12  ;;  %v6616_v12 = vld [vmem:[#allocation11] ss:$0 sm:$0xff] }
0x16b4   :  { %v2190_v43 = vpop.permute.xlu1 %2189 }
0x16b5   :  { %5721 = vmatmul.mubr.msk.f32.vlgmr.msra.gmra.mrb[36].mxu1 %vm498_vm2, %v2190_v43 }
0x16b6   :  { %6182 = vmatpush3.bf16.msra.mxu1 %v7219_v24  ;;  %5742 = vmatprep.mubr.msk.f32.mxu1 %vm6901_vm0, %v6902_v1 }
0x16b7   :  { %6183 = vmatprep.subr.bf16.mxu1 %v6900_v0 }
0x16ba   :  { %6185 = vmatpush3.bf16.msra.mxu1 %v7230_v27 }
0x1766   :  { %v2184_v8 = vpop.f32.mrb[16].mxu0 }
0x1767   :  { %v2185_v37 = vadd.f32 %v6615_v63, %v2184_v8  ;;  %v5711_v9 = vpop.f32.mrb[17].mxu0 }
0x1769   :  { %2271 = vrot.lane.b32.xlu0 %v2185_v37, %s6903_s7  ;;  %v2263_v24 = vadd.f32 %v2185_v37, %v7271_v51 }
0x176b   :  { %v5130_v16 = vmul.f32 -1.442695, %v2263_v24 }
0x176d   :  { %6471 = vpow2.f32 %v5130_v16 }
0x1777   :  { %v6472_v17 = vpop.eup %6471 }
0x1778   :  { %v2267_v18 = vadd.f32 1.0, %v6472_v17 }
0x177a   :  { %6473 = vrcp.f32 %v2267_v18 }
0x1784   :  { %v6474_v27 = vpop.eup %6473 }
0x1785   :  { %v2281_v35 = vsub.f32 1.0, %v6474_v27  ;;  %v2287_v40 = vmul.f32 %v6474_v27, %v2086_v52 }
0x1788   :  { %v2259_v13 = vpop.f32.mrb[36].mxu1 }
0x1789   :  { %v2260_v14 = vadd.f32 %v6616_v12, %v2259_v13  ;;  %v5722_v15 = vpop.f32.mrb[37].mxu1 }
0x178b   :  { %2297 = vrot.lane.b32.xlu1 %v2260_v14, %s6903_s7  ;;  %v2289_v20 = vadd.f32 %v2260_v14, %v7273_v54 }
0x178d   :  { %v5131_v22 = vmul.f32 -1.442695, %v2289_v20 }
0x178f   :  { %6475 = vpow2.f32 %v5131_v22 }
0x1799   :  { %v6476_v23 = vpop.eup %6475 }
0x179a   :  { %v2293_v32 = vadd.f32 1.0, %v6476_v23 }
0x179c   :  { %6477 = vrcp.f32 %v2293_v32  ;;  %v2540_v32 = vld [vmem:[%s8237_s9] sm:$0xff] }
0x17a6   :  { %v6478_v25 = vpop.eup %6477 }
0x17a7   :  { %v2313_v48 = vmul.f32 %v6478_v25, %v7549_v61 }
0x17db   :  { %v2272_v19 = vpop.permute.xlu0 %2271 }
0x17dc   :  { %v2274_v21 = vmul.f32 %v6474_v27, %v2272_v19 }
0x17de   :  { %2276 = vrot.lane.b32.xlu0 %v2274_v21, %s6903_s7 }
0x17fd   :  { %v2298_v26 = vpop.permute.xlu1 %2297 }
0x17fe   :  { %v2300_v11 = vmul.f32 %v6478_v25, %v2298_v26  ;;  %v2701_v26 = vld [vmem:[%s8241_s13] sm:$0xff] }
0x1800   :  { %2302 = vrot.lane.b32.xlu1 %v2300_v11, %s6903_s7 }
0x1850   :  { %v2277_v28 = vpop.permute.xlu0 %2276 }
0x1851   :  { %v2279_v33 = vadd.f32 %v2277_v28, %v7271_v51  ;;  %v2307_v51 = vsub.f32 1.0, %v6478_v25  ;;  %v2541_v25 = vld [vmem:[%s8237_s9 + $0x8] sm:$0xff] }
0x1852   :  { %v6186_v11 = vpack.c.bf16 %v2541_v25, %v2540_v32  ;;  %v2702_v28 = vld [vmem:[%s8241_s13 + $0x8] sm:$0xff] }
0x1853   :  { %6479 = vtanh.f32 %v2279_v33  ;;  %v2543_v33 = vld [vmem:[%s8237_s9 + $0x18] sm:$0xff] }
0x1854   :  { %6187 = vmatprep.subr.bf16.mxu0 %v6186_v11 }
0x185d   :  { %v6480_v34 = vpop.eup %6479 }
0x185e   :  { %2283 = vrot.lane.b32.xlu0 %v6480_v34, %s6904_s24  ;;  %v6202_v34 = vpack.c.bf16 %v2702_v28, %v2701_v26  ;;  %v2834_v28 = vld [vmem:[#allocation14 + $0x18] sm:$0xff] }
0x1860   :  { %6203 = vmatprep.subr.bf16.mxu1 %v6202_v34 }
0x1872   :  { %v2303_v36 = vpop.permute.xlu1 %2302 }
0x1873   :  { %v2305_v29 = vadd.f32 %v2303_v36, %v7273_v54 }
0x1875   :  { %6481 = vtanh.f32 %v2305_v29  ;;  %v2703_v29 = vld [vmem:[%s8241_s13 + $0x10] sm:$0xff] }
0x187f   :  { %v6482_v31 = vpop.eup %6481 }
0x1880   :  { %2309 = vrot.lane.b32.xlu1 %v6482_v31, %s6904_s24  ;;  %v2704_v31 = vld [vmem:[%s8241_s13 + $0x18] sm:$0xff] }
0x18d0   :  { %v2284_v38 = vpop.permute.xlu0 %2283 }
0x18d1   :  { %v2286_v42 = vmul.f32 %v2284_v38, %v2281_v35  ;;  %v2544_v35 = vld [vmem:[%s8237_s9 + $0x20] sm:$0xff]  ;;  %v6206_v38 = vpack.c.bf16 %v2704_v31, %v2703_v29 }
0x18d3   :  { %v7578_v44 = vadd.f32 %v2287_v40, %v2286_v42  ;;  %v2545_v40 = vld [vmem:[%s8237_s9 + $0x28] sm:$0xff]  ;;  %v2705_v42 = vld [vmem:[%s8241_s13 + $0x20] sm:$0xff] }
0x18d5   :  { %2316 = vrot.lane.b32.xlu0 %v7578_v44, %s6904_s24 }
0x18f2   :  { %v2310_v46 = vpop.permute.xlu1 %2309 }
0x18f3   :  { %v2312_v50 = vmul.f32 %v2310_v46, %v2307_v51  ;;  %v2706_v51 = vld [vmem:[%s8241_s13 + $0x28] sm:$0xff]  ;;  %v6194_v46 = vpack.c.bf16 %v2545_v40, %v2544_v35 }
0x18f5   :  { %v7583_v53 = vadd.f32 %v2313_v48, %v2312_v50  ;;  %v6210_v48 = vpack.c.bf16 %v2706_v51, %v2705_v42 }
0x18f7   :  { %2391 = vrot.lane.b32.xlu1 %v7583_v53, %s6904_s24  ;;  %v2520_v26 = vsel %vm498_vm2, %v7343_v10, %v7583_v53 }
0x1947   :  { %v7587_v54 = vpop.permute.xlu0 %2316 }
0x1948   :  { %5732 = vmatmul.mubr.msk.f32.vlgmr.msra.gmra.mrb[18].mxu0 %vm498_vm2, %v7587_v54 }
0x1949   :  { %6189 = vmatpush3.bf16.msra.mxu0 %v6186_v11  ;;  %v2833_v11 = vld [vmem:[#allocation14 + $0x10] sm:$0xff] }
0x1969   :  { %v2392_v52 = vpop.permute.xlu1 %2391 }
0x196a   :  { %5743 = vmatmul.mubr.msk.f32.vlgmr.msra.gmra.mrb[38].mxu1 %vm498_vm2, %v2392_v52 }
0x196b   :  { %6205 = vmatpush3.bf16.msra.mxu1 %v6202_v34 }
0x196c   :  { %6207 = vmatprep.subr.bf16.mxu1 %v6206_v38 }
0x196f   :  { %6209 = vmatpush3.bf16.msra.mxu1 %v6206_v38 }
0x1970   :  { %6211 = vmatprep.subr.bf16.mxu1 %v6210_v48 }
0x1973   :  { %6213 = vmatpush3.bf16.msra.mxu1 %v6210_v48 }
0x1a1b   :  { %v2386_v45 = vpop.f32.mrb[18].mxu0 }
0x1a1c   :  { %v2387_v41 = vadd.f32 %v6615_v63, %v2386_v45  ;;  %v5733_v47 = vpop.f32.mrb[19].mxu0 }
0x1a1d   :  { %v2547_v47 = vld [vmem:[%s8237_s9 + $0x38] sm:$0xff] }
0x1a1e   :  { %2473 = vrot.lane.b32.xlu0 %v2387_v41, %s6903_s7  ;;  %v2465_v9 = vadd.f32 %v2387_v41, %v7269_v49  ;;  %v2546_v41 = vld [vmem:[%s8237_s9 + $0x30] sm:$0xff] }
0x1a20   :  { %v5134_v13 = vmul.f32 -1.442695, %v2465_v9 }
0x1a22   :  { %6483 = vpow2.f32 %v5134_v13 }
0x1a2c   :  { %v6484_v14 = vpop.eup %6483 }
0x1a2d   :  { %v2469_v15 = vadd.f32 1.0, %v6484_v14 }
0x1a2f   :  { %6485 = vrcp.f32 %v2469_v15 }
0x1a39   :  { %v7595_v24 = vpop.eup %6485 }
0x1a3a   :  { %v2483_v13 = vsub.f32 1.0, %v7595_v24  ;;  %v2489_v15 = vmul.f32 %v7595_v24, %v7578_v44  ;;  %v2831_v44 = vld [vmem:[#allocation14] sm:$0xff] }
0x1a3d   :  { %v2461_v43 = vpop.f32.mrb[38].mxu1 }
0x1a3e   :  { %v2462_v8 = vadd.f32 %v6616_v12, %v2461_v43  ;;  %v5744_v37 = vpop.f32.mrb[39].mxu1  ;;  %v2707_v43 = vld [vmem:[%s8241_s13 + $0x30] sm:$0xff] }
0x1a3f   :  { %v2708_v37 = vld [vmem:[%s8241_s13 + $0x38] sm:$0xff] }
0x1a40   :  { %2499 = vrot.lane.b32.xlu1 %v2462_v8, %s6903_s7  ;;  %v2491_v63 = vadd.f32 %v2462_v8, %v7275_v56  ;;  %v6198_v8 = vpack.c.bf16 %v2547_v47, %v2546_v41  ;;  %v6214_v9 = vpack.c.bf16 %v2708_v37, %v2707_v43  ;;  %v7798_v37 = vld [vmem:[#allocation16] ss:$0 sm:$0xff] }
0x1a42   :  { %v5135_v12 = vmul.f32 -1.442695, %v2491_v63  ;;  %6215 = vmatprep.subr.bf16.mxu1 %v6214_v9 }
0x1a43   :  { %6217 = vmatpush3.bf16.msra.mxu1 %v6214_v9 }
0x1a44   :  { %6487 = vpow2.f32 %v5135_v12  ;;  %6224 = vmatprep.subr.bf16.mxu1 %v6900_v0 }
0x1a4e   :  { %v6488_v18 = vpop.eup %6487 }
0x1a4f   :  { %v2495_v27 = vadd.f32 1.0, %v6488_v18 }
0x1a51   :  { %6489 = vrcp.f32 %v2495_v27 }
0x1a5b   :  { %v7600_v19 = vpop.eup %6489 }
0x1a5c   :  { %v2515_v18 = vmul.f32 %v7600_v19, %v7583_v53  ;;  %v7699_v53 = vpack.c.bf16 %v2834_v28, %v2833_v11 }
0x1a90   :  { %v2474_v16 = vpop.permute.xlu0 %2473 }
0x1a91   :  { %v2476_v17 = vmul.f32 %v7595_v24, %v2474_v16  ;;  %v2832_v24 = vld [vmem:[#allocation14 + $0x8] sm:$0xff] }
0x1a92   :  { %v7678_v25 = vpack.c.bf16 %v2832_v24, %v2831_v44 }
0x1a93   :  { %2478 = vrot.lane.b32.xlu0 %v2476_v17, %s6903_s7  ;;  %v2509_v17 = vsub.f32 1.0, %v7600_v19 }
0x1ab2   :  { %v2500_v20 = vpop.permute.xlu1 %2499 }
0x1ab3   :  { %v2502_v21 = vmul.f32 %v7600_v19, %v2500_v20  ;;  %v2836_v20 = vld [vmem:[%s8243_s15] sm:$0xff]  ;;  %v2838_v19 = vld [vmem:[%s8243_s15 + $0x10] sm:$0xff] }
0x1ab5   :  { %2504 = vrot.lane.b32.xlu1 %v2502_v21, %s6903_s7  ;;  %v2837_v21 = vld [vmem:[%s8243_s15 + $0x8] sm:$0xff] }
0x1ab6   :  { %v7673_v32 = vpack.c.bf16 %v2837_v21, %v2836_v20 }
0x1b05   :  { %v2479_v22 = vpop.permute.xlu0 %2478 }
0x1b06   :  { %v2481_v23 = vadd.f32 %v2479_v22, %v7269_v49  ;;  %v2542_v49 = vld [vmem:[%s8237_s9 + $0x10] sm:$0xff] }
0x1b07   :  { %v6190_v36 = vpack.c.bf16 %v2543_v33, %v2542_v49  ;;  %v2522_v49 = vsel %vm498_vm2, %v7378_v4, %v7549_v61  ;;  %v2524_v33 = vsel %vm498_vm2, %v7413_v6, %v7514_v39  ;;  %v2526_v4 = vsel %vm498_vm2, %v7448_v62, %v7479_v59 }
0x1b08   :  { %6491 = vtanh.f32 %v2481_v23  ;;  %v2528_v6 = vsel %vm498_vm2, %v7483_v2, %v7444_v30  ;;  %v2530_v62 = vsel %vm498_vm2, %v7518_v58, %v7409_v57  ;;  %v2532_v30 = vsel %vm498_vm2, %v7553_v60, %v7374_v55 }
0x1b09   :  { %6191 = vmatprep.subr.bf16.mxu0 %v6190_v36  ;;  %v2534_v59 = vsel %vm498_vm2, %v7587_v54, %v7339_v7 }
0x1b0a   :  { %6193 = vmatpush3.bf16.msra.mxu0 %v6190_v36 }
0x1b0b   :  { %6195 = vmatprep.subr.bf16.mxu0 %v6194_v46 }
0x1b0e   :  { %6197 = vmatpush3.bf16.msra.mxu0 %v6194_v46 }
0x1b0f   :  { %6199 = vmatprep.subr.bf16.mxu0 %v6198_v8 }
0x1b12   :  { %v6492_v50 = vpop.eup %6491  ;;  %6201 = vmatpush3.bf16.msra.mxu0 %v6198_v8 }
0x1b13   :  { %2485 = vrot.lane.b32.xlu0 %v6492_v50, %s6904_s24  ;;  %6218 = vmatprep.subr.bf16.mxu0 %v6900_v0 }
0x1b27   :  { %v2505_v52 = vpop.permute.xlu1 %2504 }
0x1b28   :  { %v2507_v45 = vadd.f32 %v2505_v52, %v7275_v56  ;;  %v7795_v52 = vld [vmem:[#allocation19] ss:$0 sm:$0xff] }
0x1b2a   :  { %6493 = vtanh.f32 %v2507_v45 }
0x1b34   :  { %v6494_v56 = vpop.eup %6493 }
0x1b35   :  { %2511 = vrot.lane.b32.xlu1 %v6494_v56, %s6904_s24  ;;  %v7803_v56 = vld [vmem:[#allocation17] ss:$0 sm:$0xff] }
0x1b85   :  { %v2486_v14 = vpop.permute.xlu0 %2485 }
0x1b86   :  { %v2488_v16 = vmul.f32 %v2486_v14, %v2483_v13  ;;  %v7806_v14 = vld [vmem:[#allocation13] ss:$0 sm:$0xff] }
0x1b88   :  { %v2490_v63 = vadd.f32 %v2489_v15, %v2488_v16 }
0x1b8a   :  { %2536 = vrot.lane.b32.xlu0 %v2490_v63, %s6904_s24 }
0x1ba7   :  { %v2512_v12 = vpop.permute.xlu1 %2511 }
0x1ba8   :  { %v2514_v27 = vmul.f32 %v2512_v12, %v2509_v17 }
0x1baa   :  { %v2516_v22 = vadd.f32 %v2515_v18, %v2514_v27 }
0x1bac   :  { %v2518_v23 = vsel %vm498_vm2, %v7307_v5, %v2516_v22  ;;  %v2839_v5 = vld [vmem:[%s8243_s15 + $0x18] sm:$0xff] }
0x1bad   :  { %5761 = vmatprep.mubr.msk.f32.mxu0 %vm2555_vm3, %v2518_v23  ;;  %5792 = vmatprep.mubr.msk.f32.mxu1 %vm2555_vm3, %v2518_v23  ;;  %v7696_v10 = vpack.c.bf16 %v2839_v5, %v2838_v19 }
0x1bae   :  { %5762 = vmatmul.mubr.msk.f32.vlgmr.msra.gmra.mrb[20].mxu0 %vm2555_vm3, %v2520_v26  ;;  %5793 = vmatmul.mubr.msk.f32.vlgmr.msra.gmra.mrb[40].mxu1 %vm2555_vm3, %v2520_v26 }
0x1baf   :  { %5764 = vmatprep.mubr.msk.f32.mxu0 %vm2555_vm3, %v2522_v49  ;;  %5795 = vmatprep.mubr.msk.f32.mxu1 %vm2555_vm3, %v2522_v49 }
0x1bb0   :  { %6226 = vmatpush3.bf16.msra.mxu1 %v7673_v32  ;;  %6220 = vmatpush3.bf16.msra.mxu0 %v7678_v25 }
0x1bb1   :  { %6227 = vmatprep.subr.bf16.mxu1 %v6900_v0  ;;  %6221 = vmatprep.subr.bf16.mxu0 %v6900_v0 }
0x1bb2   :  { %5765 = vmatmul.mubr.msk.f32.gmra.mrb[22].mxu0 %vm2555_vm3, %v2524_v33  ;;  %5796 = vmatmul.mubr.msk.f32.gmra.mrb[42].mxu1 %vm2555_vm3, %v2524_v33 }
0x1bb3   :  { %5767 = vmatprep.mubr.msk.f32.mxu0 %vm2555_vm3, %v2526_v4  ;;  %5798 = vmatprep.mubr.msk.f32.mxu1 %vm2555_vm3, %v2526_v4 }
0x1bb4   :  { %6229 = vmatpush3.bf16.msra.mxu1 %v7696_v10  ;;  %6223 = vmatpush3.bf16.msra.mxu0 %v7699_v53 }
0x1bb5   :  { %6236 = vmatprep.subr.bf16.mxu1 %v6900_v0  ;;  %6230 = vmatprep.subr.bf16.mxu0 %v6900_v0 }
0x1bb6   :  { %5768 = vmatmul.mubr.msk.f32.gmra.mrb[24].mxu0 %vm2555_vm3, %v2528_v6  ;;  %5799 = vmatmul.mubr.msk.f32.gmra.mrb[44].mxu1 %vm2555_vm3, %v2528_v6 }
0x1bb7   :  { %5770 = vmatprep.mubr.msk.f32.mxu0 %vm2555_vm3, %v2530_v62  ;;  %5801 = vmatprep.mubr.msk.f32.mxu1 %vm2555_vm3, %v2530_v62 }
0x1bba   :  { %5771 = vmatmul.mubr.msk.f32.gmra.mrb[26].mxu0 %vm2555_vm3, %v2532_v30  ;;  %5802 = vmatmul.mubr.msk.f32.gmra.mrb[46].mxu1 %vm2555_vm3, %v2532_v30 }
0x1bbb   :  { %5773 = vmatprep.mubr.msk.f32.mxu0 %vm2555_vm3, %v2534_v59  ;;  %5804 = vmatprep.mubr.msk.f32.mxu1 %vm2555_vm3, %v2534_v59 }
0x1bfc   :  { %v2537_v57 = vpop.permute.xlu0 %2536 }
0x1bfd   :  { %v2539_v2 = vsel %vm498_vm2, %v2537_v57, %v7303_v3 }
0x1bfe   :  { %5774 = vmatmul.mubr.msk.f32.gmra.mrb[28].mxu0 %vm2555_vm3, %v2539_v2  ;;  %5805 = vmatmul.mubr.msk.f32.gmra.mrb[48].mxu1 %vm2555_vm3, %v2539_v2 }
0x1bff   :  { %5815 = vmatprep.mubr.msk.f32.mxu0 %vm6901_vm0, %v6902_v1  ;;  %5826 = vmatprep.mubr.msk.f32.mxu1 %vm6901_vm0, %v6902_v1 }
0x1c02   :  { %5816 = vmatmul.mubr.f32.vlgmr.msra.gmra.mrb[30].mxu0 %v6902_v1  ;;  %5827 = vmatmul.mubr.f32.vlgmr.msra.gmra.mrb[50].mxu1 %v6902_v1 }
0x1c03   :  { %6238 = vmatpush3.bf16.msra.mxu1 %v7673_v32  ;;  %6232 = vmatpush3.bf16.msra.mxu0 %v7678_v25 }
0x1c04   :  { %6239 = vmatprep.subr.bf16.mxu1 %v6900_v0  ;;  %5848 = vmatprep.mubr.msk.f32.mxu1 %vm6901_vm0, %v6902_v1 }
0x1c05   :  { %6233 = vmatprep.subr.bf16.mxu0 %v6900_v0  ;;  %5837 = vmatprep.mubr.msk.f32.mxu0 %vm6901_vm0, %v6902_v1 }
0x1c07   :  { %6241 = vmatpush3.bf16.msra.mxu1 %v7696_v10  ;;  %6235 = vmatpush3.bf16.msra.mxu0 %v7699_v53 }
0x1c08   :  { %6248 = vmatprep.subr.bf16.mxu1 %v6900_v0  ;;  %6242 = vmatprep.subr.bf16.mxu0 %v6900_v0 }
0x1c81   :  { %v7759_v3 = vpop.f32.mrb[20].mxu0  ;;  %v7761_v7 = vpop.f32.mrb[40].mxu1 }
0x1c82   :  { %v2652_v55 = vpop.f32.mrb[21].mxu0  ;;  %v7763_v39 = vpop.f32.mrb[41].mxu1 }
0x1c83   :  { %v2653_v16 = vadd.f32 %v7806_v14, %v2652_v55 }
0x1c85   :  { %v7765_v58 = vpop.f32.mrb[22].mxu0  ;;  %v7767_v61 = vpop.f32.mrb[42].mxu1 }
0x1c86   :  { %v7769_v60 = vpop.f32.mrb[23].mxu0  ;;  %v7771_v54 = vpop.f32.mrb[43].mxu1 }
0x1c89   :  { %v7773_v34 = vpop.f32.mrb[24].mxu0  ;;  %v7775_v36 = vpop.f32.mrb[44].mxu1 }
0x1c8a   :  { %v7777_v29 = vpop.f32.mrb[25].mxu0  ;;  %v7779_v31 = vpop.f32.mrb[45].mxu1 }
0x1c8d   :  { %v7781_v35 = vpop.f32.mrb[26].mxu0  ;;  %v7783_v38 = vpop.f32.mrb[46].mxu1 }
0x1c8e   :  { %v7785_v40 = vpop.f32.mrb[27].mxu0  ;;  %v7787_v42 = vpop.f32.mrb[47].mxu1 }
0x1cd1   :  { %v7789_v51 = vpop.f32.mrb[28].mxu0  ;;  %v5806_v46 = vpop.f32.mrb[48].mxu1 }
0x1cd2   :  { %v7791_v48 = vpop.f32.mrb[29].mxu0  ;;  %v7793_v50 = vpop.f32.mrb[49].mxu1  ;;  %v2828_v13 = vadd.f32 %v5806_v46, %v7803_v56 }
0x1cd5   :  { %v2913_v45 = vpop.f32.mrb[30].mxu0  ;;  %v2989_v41 = vpop.f32.mrb[50].mxu1 }
0x1cd6   :  { %v2990_v47 = vadd.f32 %v7795_v52, %v2989_v41  ;;  %v5828_v43 = vpop.f32.mrb[51].mxu1  ;;  %v5817_v8 = vpop.f32.mrb[31].mxu0  ;;  %v2914_v9 = vadd.f32 %v7798_v37, %v2913_v45 }
0x1cd8   :  { %3027 = vrot.lane.b32.xlu1 %v2990_v47, %s6903_s7  ;;  %v3019_v15 = vadd.f32 %v2990_v47, %v2828_v13  ;;  %v2993_v63 = vadd.f32 %v2914_v9, %v2653_v16 }
0x1cda   :  { %v5161_v17 = vmul.f32 -1.442695, %v3019_v15  ;;  %v5160_v12 = vmul.f32 -1.442695, %v2993_v63 }
0x1cdc   :  { %3001 = vrot.lane.b32.xlu1 %v2914_v9, %s6903_s7  ;;  %6495 = vpow2.f32 %v5161_v17  ;;  %v2823_v17 = vadd.f32 %v7803_v56, %v7793_v50 }
0x1cdd   :  { %6497 = vpow2.f32 %v5160_v12 }
0x1ce6   :  { %v6496_v18 = vpop.eup %6495 }
0x1ce7   :  { %v3023_v27 = vadd.f32 1.0, %v6496_v18  ;;  %v6498_v20 = vpop.eup %6497  ;;  %v2658_v18 = vadd.f32 %v7759_v3, %v7806_v14 }
0x1ce8   :  { %v2997_v21 = vadd.f32 1.0, %v6498_v20 }
0x1ce9   :  { %6499 = vrcp.f32 %v3023_v27 }
0x1cea   :  { %6501 = vrcp.f32 %v2997_v21 }
0x1cf3   :  { %v6500_v44 = vpop.eup %6499 }
0x1cf4   :  { %v6502_v23 = vpop.eup %6501  ;;  %v3037_v6 = vsub.f32 1.0, %v6500_v44  ;;  %v3043_v30 = vmul.f32 0.0, %v6500_v44 }
0x1cf5   :  { %v3011_v2 = vsub.f32 1.0, %v6502_v23  ;;  %v3017_v46 = vmul.f32 0.0, %v6502_v23 }
0x1d4a   :  { %v3028_v24 = vpop.permute.xlu1 %3027 }
0x1d4b   :  { %v3030_v22 = vmul.f32 %v6500_v44, %v3028_v24 }
0x1d4d   :  { %3032 = vrot.lane.b32.xlu0 %v3030_v22, %s6903_s7 }
0x1d4e   :  { %v3002_v19 = vpop.permute.xlu1 %3001 }
0x1d4f   :  { %v3004_v26 = vmul.f32 %v6502_v23, %v3002_v19 }
0x1d51   :  { %3006 = vrot.lane.b32.xlu1 %v3004_v26, %s6903_s7 }
0x1dbf   :  { %v3033_v5 = vpop.permute.xlu0 %3032 }
0x1dc0   :  { %v3035_v11 = vadd.f32 %v3033_v5, %v2828_v13 }
0x1dc2   :  { %6503 = vtanh.f32 %v3035_v11 }
0x1dc3   :  { %v3007_v28 = vpop.permute.xlu1 %3006 }
0x1dc4   :  { %v3009_v49 = vadd.f32 %v3007_v28, %v2653_v16 }
0x1dc6   :  { %6505 = vtanh.f32 %v3009_v49 }
0x1dcc   :  { %v6504_v33 = vpop.eup %6503 }
0x1dcd   :  { %3039 = vrot.lane.b32.xlu0 %v6504_v33, %s6904_s24 }
0x1dd0   :  { %v6506_v4 = vpop.eup %6505 }
0x1dd1   :  { %3013 = vrot.lane.b32.xlu1 %v6506_v4, %s6904_s24 }
0x1e3f   :  { %v3040_v62 = vpop.permute.xlu0 %3039 }
0x1e40   :  { %v3042_v59 = vmul.f32 %v3040_v62, %v3037_v6 }
0x1e42   :  { %v7813_v57 = vadd.f32 %v3043_v30, %v3042_v59 }
0x1e43   :  { %v3014_v55 = vpop.permute.xlu1 %3013 }
0x1e44   :  { %v3016_v45 = vmul.f32 %v3014_v55, %v3011_v2  ;;  %3121 = vrot.lane.b32.xlu0 %v7813_v57, %s6904_s24 }
0x1e46   :  { %v7817_v41 = vadd.f32 %v3017_v46, %v3016_v45 }
0x1e48   :  { %3046 = vrot.lane.b32.xlu0 %v7817_v41, %s6904_s24 }
0x1eb6   :  { %v3122_v47 = vpop.permute.xlu0 %3121 }
0x1eb7   :  { %5849 = vmatmul.mubr.msk.f32.vlgmr.msra.gmra.mrb[52].mxu1 %vm498_vm2, %v3122_v47 }
0x1eb8   :  { %6250 = vmatpush3.bf16.msra.mxu1 %v7673_v32  ;;  %5870 = vmatprep.mubr.msk.f32.mxu1 %vm6901_vm0, %v6902_v1 }
0x1eb9   :  { %6251 = vmatprep.subr.bf16.mxu1 %v6900_v0 }
0x1eba   :  { %v7826_v43 = vpop.permute.xlu0 %3046 }
0x1ebb   :  { %5838 = vmatmul.mubr.msk.f32.vlgmr.msra.gmra.mrb[32].mxu0 %vm498_vm2, %v7826_v43 }
0x1ebc   :  { %6244 = vmatpush3.bf16.msra.mxu0 %v7678_v25  ;;  %6253 = vmatpush3.bf16.msra.mxu1 %v7696_v10 }
0x1ebd   :  { %6245 = vmatprep.subr.bf16.mxu0 %v6900_v0  ;;  %5859 = vmatprep.mubr.msk.f32.mxu0 %vm6901_vm0, %v6902_v1 }
0x1ebe   :  { %6260 = vmatprep.subr.bf16.mxu1 %v6900_v0 }
0x1ec0   :  { %6247 = vmatpush3.bf16.msra.mxu0 %v7699_v53 }
0x1ec1   :  { %6254 = vmatprep.subr.bf16.mxu0 %v6900_v0 }
0x1f8a   :  { %v3191_v8 = vpop.f32.mrb[52].mxu1 }
0x1f8b   :  { %v3192_v9 = vadd.f32 %v7795_v52, %v3191_v8  ;;  %v5850_v13 = vpop.f32.mrb[53].mxu1 }
0x1f8d   :  { %3229 = vrot.lane.b32.xlu1 %v3192_v9, %s6903_s7  ;;  %v3221_v12 = vadd.f32 %v3192_v9, %v2823_v17 }
0x1f8e   :  { %v3116_v15 = vpop.f32.mrb[32].mxu0 }
0x1f8f   :  { %v3117_v16 = vadd.f32 %v7798_v37, %v3116_v15  ;;  %v5839_v63 = vpop.f32.mrb[33].mxu0  ;;  %v5165_v27 = vmul.f32 -1.442695, %v3221_v12 }
0x1f91   :  { %3203 = vrot.lane.b32.xlu1 %v3117_v16, %s6903_s7  ;;  %v3195_v20 = vadd.f32 %v3117_v16, %v2658_v18  ;;  %6507 = vpow2.f32 %v5165_v27 }
0x1f93   :  { %v5164_v21 = vmul.f32 -1.442695, %v3195_v20  ;;  %v2818_v20 = vadd.f32 %v7783_v38, %v7803_v56 }
0x1f95   :  { %6509 = vpow2.f32 %v5164_v21 }
0x1f9b   :  { %v6508_v44 = vpop.eup %6507 }
0x1f9c   :  { %v3225_v24 = vadd.f32 1.0, %v6508_v44  ;;  %v2663_v44 = vadd.f32 %v7806_v14, %v7769_v60 }
0x1f9e   :  { %6511 = vrcp.f32 %v3225_v24 }
0x1f9f   :  { %v6510_v22 = vpop.eup %6509 }
0x1fa0   :  { %v3199_v23 = vadd.f32 1.0, %v6510_v22 }
0x1fa2   :  { %6513 = vrcp.f32 %v3199_v23 }
0x1fa8   :  { %v6512_v19 = vpop.eup %6511 }
0x1fa9   :  { %v3239_v30 = vsub.f32 1.0, %v6512_v19  ;;  %v3245_v2 = vmul.f32 %v6512_v19, %v7813_v57 }
0x1fac   :  { %v6514_v50 = vpop.eup %6513 }
0x1fad   :  { %v3213_v45 = vsub.f32 1.0, %v6514_v50  ;;  %v3219_v8 = vmul.f32 %v6514_v50, %v7817_v41 }
0x1fff   :  { %v3230_v26 = vpop.permute.xlu1 %3229 }
0x2000   :  { %v3232_v5 = vmul.f32 %v6512_v19, %v3230_v26 }
0x2002   :  { %3234 = vrot.lane.b32.xlu0 %v3232_v5, %s6903_s7 }
0x2003   :  { %v3204_v11 = vpop.permute.xlu1 %3203 }
0x2004   :  { %v3206_v28 = vmul.f32 %v6514_v50, %v3204_v11 }
0x2006   :  { %3208 = vrot.lane.b32.xlu1 %v3206_v28, %s6903_s7 }
0x2074   :  { %v3235_v3 = vpop.permute.xlu0 %3234 }
0x2075   :  { %v3237_v49 = vadd.f32 %v3235_v3, %v2823_v17 }
0x2077   :  { %6515 = vtanh.f32 %v3237_v49 }
0x2078   :  { %v3209_v33 = vpop.permute.xlu1 %3208 }
0x2079   :  { %v3211_v4 = vadd.f32 %v3209_v33, %v2658_v18 }
0x207b   :  { %6517 = vtanh.f32 %v3211_v4 }
0x2081   :  { %v6516_v6 = vpop.eup %6515 }
0x2082   :  { %3241 = vrot.lane.b32.xlu0 %v6516_v6, %s6904_s24 }
0x2085   :  { %v6518_v62 = vpop.eup %6517 }
0x2086   :  { %3215 = vrot.lane.b32.xlu1 %v6518_v62, %s6904_s24 }
0x20f4   :  { %v3242_v59 = vpop.permute.xlu0 %3241 }
0x20f5   :  { %v3244_v55 = vmul.f32 %v3242_v59, %v3239_v30 }
0x20f7   :  { %v7851_v46 = vadd.f32 %v3245_v2, %v3244_v55 }
0x20f8   :  { %v3216_v47 = vpop.permute.xlu1 %3215 }
0x20f9   :  { %v3218_v9 = vmul.f32 %v3216_v47, %v3213_v45  ;;  %3323 = vrot.lane.b32.xlu0 %v7851_v46, %s6904_s24 }
0x20fb   :  { %v7856_v13 = vadd.f32 %v3219_v8, %v3218_v9 }
0x20fd   :  { %3248 = vrot.lane.b32.xlu0 %v7856_v13, %s6904_s24 }
0x216b   :  { %v3324_v15 = vpop.permute.xlu0 %3323 }
0x216c   :  { %5871 = vmatmul.mubr.msk.f32.vlgmr.msra.gmra.mrb[54].mxu1 %vm498_vm2, %v3324_v15 }
0x216d   :  { %6262 = vmatpush3.bf16.msra.mxu1 %v7673_v32  ;;  %5892 = vmatprep.mubr.msk.f32.mxu1 %vm6901_vm0, %v6902_v1 }
0x216e   :  { %6263 = vmatprep.subr.bf16.mxu1 %v6900_v0 }
0x216f   :  { %v7865_v41 = vpop.permute.xlu0 %3248 }
0x2170   :  { %5860 = vmatmul.mubr.msk.f32.vlgmr.msra.gmra.mrb[34].mxu0 %vm498_vm2, %v7865_v41 }
0x2171   :  { %6256 = vmatpush3.bf16.msra.mxu0 %v7678_v25  ;;  %6265 = vmatpush3.bf16.msra.mxu1 %v7696_v10 }
0x2172   :  { %6257 = vmatprep.subr.bf16.mxu0 %v6900_v0  ;;  %5881 = vmatprep.mubr.msk.f32.mxu0 %vm6901_vm0, %v6902_v1 }
0x2173   :  { %6272 = vmatprep.subr.bf16.mxu1 %v6900_v0 }
0x2175   :  { %6259 = vmatpush3.bf16.msra.mxu0 %v7699_v53 }
0x2176   :  { %6266 = vmatprep.subr.bf16.mxu0 %v6900_v0 }
0x223f   :  { %v3393_v16 = vpop.f32.mrb[54].mxu1 }
0x2240   :  { %v3394_v63 = vadd.f32 %v7795_v52, %v3393_v16  ;;  %v5872_v17 = vpop.f32.mrb[55].mxu1 }
0x2242   :  { %3431 = vrot.lane.b32.xlu1 %v3394_v63, %s6903_s7  ;;  %v3423_v21 = vadd.f32 %v3394_v63, %v2818_v20 }
0x2243   :  { %v3318_v12 = vpop.f32.mrb[34].mxu0 }
0x2244   :  { %v3319_v18 = vadd.f32 %v7798_v37, %v3318_v12  ;;  %v5861_v27 = vpop.f32.mrb[35].mxu0  ;;  %v5169_v24 = vmul.f32 -1.442695, %v3423_v21 }
0x2246   :  { %3405 = vrot.lane.b32.xlu1 %v3319_v18, %s6903_s7  ;;  %v3397_v22 = vadd.f32 %v3319_v18, %v2663_v44  ;;  %6519 = vpow2.f32 %v5169_v24 }
0x2248   :  { %v5168_v23 = vmul.f32 -1.442695, %v3397_v22  ;;  %v2813_v22 = vadd.f32 %v7803_v56, %v7787_v42 }
0x224a   :  { %6521 = vpow2.f32 %v5168_v23 }
0x2250   :  { %v6520_v19 = vpop.eup %6519 }
0x2251   :  { %v3427_v26 = vadd.f32 1.0, %v6520_v19  ;;  %v2668_v19 = vadd.f32 %v7765_v58, %v7806_v14 }
0x2253   :  { %6523 = vrcp.f32 %v3427_v26 }
0x2254   :  { %v6522_v5 = vpop.eup %6521 }
0x2255   :  { %v3401_v50 = vadd.f32 1.0, %v6522_v5 }
0x2257   :  { %6525 = vrcp.f32 %v3401_v50 }
0x225d   :  { %v6524_v11 = vpop.eup %6523 }
0x225e   :  { %v3441_v2 = vsub.f32 1.0, %v6524_v11  ;;  %v3447_v45 = vmul.f32 %v6524_v11, %v7851_v46 }
0x2261   :  { %v6526_v38 = vpop.eup %6525 }
0x2262   :  { %v3415_v9 = vsub.f32 1.0, %v6526_v38  ;;  %v3421_v16 = vmul.f32 %v6526_v38, %v7856_v13 }
0x22b4   :  { %v3432_v28 = vpop.permute.xlu1 %3431 }
0x22b5   :  { %v3434_v3 = vmul.f32 %v6524_v11, %v3432_v28 }
0x22b7   :  { %3436 = vrot.lane.b32.xlu0 %v3434_v3, %s6903_s7 }
0x22b8   :  { %v3406_v49 = vpop.permute.xlu1 %3405 }
0x22b9   :  { %v3408_v33 = vmul.f32 %v6526_v38, %v3406_v49 }
0x22bb   :  { %3410 = vrot.lane.b32.xlu1 %v3408_v33, %s6903_s7 }
0x2329   :  { %v3437_v60 = vpop.permute.xlu0 %3436 }
0x232a   :  { %v3439_v4 = vadd.f32 %v3437_v60, %v2818_v20 }
0x232c   :  { %6527 = vtanh.f32 %v3439_v4 }
0x232d   :  { %v3411_v6 = vpop.permute.xlu1 %3410 }
0x232e   :  { %v3413_v62 = vadd.f32 %v3411_v6, %v2663_v44 }
0x2330   :  { %6529 = vtanh.f32 %v3413_v62 }
0x2336   :  { %v6528_v30 = vpop.eup %6527 }
0x2337   :  { %3443 = vrot.lane.b32.xlu0 %v6528_v30, %s6904_s24 }
0x233a   :  { %v6530_v59 = vpop.eup %6529 }
0x233b   :  { %3417 = vrot.lane.b32.xlu1 %v6530_v59, %s6904_s24 }
0x23a9   :  { %v3444_v55 = vpop.permute.xlu0 %3443 }
0x23aa   :  { %v3446_v47 = vmul.f32 %v3444_v55, %v3441_v2 }
0x23ac   :  { %v7890_v8 = vadd.f32 %v3447_v45, %v3446_v47 }
0x23ad   :  { %v3418_v15 = vpop.permute.xlu1 %3417 }
0x23ae   :  { %v3420_v63 = vmul.f32 %v3418_v15, %v3415_v9  ;;  %3525 = vrot.lane.b32.xlu0 %v7890_v8, %s6904_s24 }
0x23b0   :  { %v7895_v17 = vadd.f32 %v3421_v16, %v3420_v63 }
0x23b2   :  { %3450 = vrot.lane.b32.xlu0 %v7895_v17, %s6904_s24 }
0x2420   :  { %v3526_v12 = vpop.permute.xlu0 %3525 }
0x2421   :  { %5893 = vmatmul.mubr.msk.f32.vlgmr.msra.gmra.mrb[56].mxu1 %vm498_vm2, %v3526_v12 }
0x2422   :  { %6274 = vmatpush3.bf16.msra.mxu1 %v7673_v32  ;;  %5914 = vmatprep.mubr.msk.f32.mxu1 %vm6901_vm0, %v6902_v1 }
0x2423   :  { %6275 = vmatprep.subr.bf16.mxu1 %v6900_v0 }
0x2424   :  { %v7904_v13 = vpop.permute.xlu0 %3450 }
0x2425   :  { %5882 = vmatmul.mubr.msk.f32.vlgmr.msra.gmra.mrb[36].mxu0 %vm498_vm2, %v7904_v13 }
0x2426   :  { %6268 = vmatpush3.bf16.msra.mxu0 %v7678_v25  ;;  %6277 = vmatpush3.bf16.msra.mxu1 %v7696_v10 }
0x2427   :  { %6269 = vmatprep.subr.bf16.mxu0 %v6900_v0  ;;  %5903 = vmatprep.mubr.msk.f32.mxu0 %vm6901_vm0, %v6902_v1 }
0x2428   :  { %6284 = vmatprep.subr.bf16.mxu1 %v6900_v0 }
0x242a   :  { %6271 = vmatpush3.bf16.msra.mxu0 %v7699_v53 }
0x242b   :  { %6278 = vmatprep.subr.bf16.mxu0 %v6900_v0 }
0x24f4   :  { %v3595_v18 = vpop.f32.mrb[56].mxu1 }
0x24f5   :  { %v3596_v27 = vadd.f32 %v7795_v52, %v3595_v18  ;;  %v5894_v20 = vpop.f32.mrb[57].mxu1 }
0x24f7   :  { %3633 = vrot.lane.b32.xlu1 %v3596_v27, %s6903_s7  ;;  %v3625_v23 = vadd.f32 %v3596_v27, %v2813_v22 }
0x24f8   :  { %v3520_v21 = vpop.f32.mrb[36].mxu0 }
0x24f9   :  { %v3521_v44 = vadd.f32 %v7798_v37, %v3520_v21  ;;  %v5883_v24 = vpop.f32.mrb[37].mxu0  ;;  %v5173_v26 = vmul.f32 -1.442695, %v3625_v23 }
0x24fb   :  { %3607 = vrot.lane.b32.xlu1 %v3521_v44, %s6903_s7  ;;  %v3599_v5 = vadd.f32 %v3521_v44, %v2668_v19  ;;  %6531 = vpow2.f32 %v5173_v26 }
0x24fd   :  { %v5172_v50 = vmul.f32 -1.442695, %v3599_v5  ;;  %v2808_v5 = vadd.f32 %v7775_v36, %v7803_v56 }
0x24ff   :  { %6533 = vpow2.f32 %v5172_v50 }
0x2505   :  { %v6532_v11 = vpop.eup %6531 }
0x2506   :  { %v3629_v28 = vadd.f32 1.0, %v6532_v11  ;;  %v2673_v11 = vadd.f32 %v7806_v14, %v7777_v29 }
0x2508   :  { %6535 = vrcp.f32 %v3629_v28 }
0x2509   :  { %v6534_v3 = vpop.eup %6533 }
0x250a   :  { %v3603_v38 = vadd.f32 1.0, %v6534_v3 }
0x250c   :  { %6537 = vrcp.f32 %v3603_v38 }
0x2512   :  { %v6536_v49 = vpop.eup %6535 }
0x2513   :  { %v3643_v45 = vsub.f32 1.0, %v6536_v49  ;;  %v3649_v9 = vmul.f32 %v6536_v49, %v7890_v8 }
0x2516   :  { %v6538_v42 = vpop.eup %6537 }
0x2517   :  { %v3617_v63 = vsub.f32 1.0, %v6538_v42  ;;  %v3623_v18 = vmul.f32 %v6538_v42, %v7895_v17 }
0x2569   :  { %v3634_v33 = vpop.permute.xlu1 %3633 }
0x256a   :  { %v3636_v60 = vmul.f32 %v6536_v49, %v3634_v33 }
0x256c   :  { %3638 = vrot.lane.b32.xlu0 %v3636_v60, %s6903_s7 }
0x256d   :  { %v3608_v4 = vpop.permute.xlu1 %3607 }
0x256e   :  { %v3610_v6 = vmul.f32 %v6538_v42, %v3608_v4 }
0x2570   :  { %3612 = vrot.lane.b32.xlu1 %v3610_v6, %s6903_s7 }
0x25de   :  { %v3639_v58 = vpop.permute.xlu0 %3638 }
0x25df   :  { %v3641_v62 = vadd.f32 %v3639_v58, %v2813_v22 }
0x25e1   :  { %6539 = vtanh.f32 %v3641_v62 }
0x25e2   :  { %v3613_v30 = vpop.permute.xlu1 %3612 }
0x25e3   :  { %v3615_v59 = vadd.f32 %v3613_v30, %v2668_v19 }
0x25e5   :  { %6541 = vtanh.f32 %v3615_v59 }
0x25eb   :  { %v6540_v2 = vpop.eup %6539 }
0x25ec   :  { %3645 = vrot.lane.b32.xlu0 %v6540_v2, %s6904_s24 }
0x25ef   :  { %v6542_v55 = vpop.eup %6541 }
0x25f0   :  { %3619 = vrot.lane.b32.xlu1 %v6542_v55, %s6904_s24 }
0x265e   :  { %v3646_v47 = vpop.permute.xlu0 %3645 }
0x265f   :  { %v3648_v15 = vmul.f32 %v3646_v47, %v3643_v45 }
0x2661   :  { %v7929_v16 = vadd.f32 %v3649_v9, %v3648_v15 }
0x2662   :  { %v3620_v12 = vpop.permute.xlu1 %3619 }
0x2663   :  { %v3622_v27 = vmul.f32 %v3620_v12, %v3617_v63  ;;  %3727 = vrot.lane.b32.xlu0 %v7929_v16, %s6904_s24 }
0x2665   :  { %v7934_v20 = vadd.f32 %v3623_v18, %v3622_v27 }
0x2667   :  { %3652 = vrot.lane.b32.xlu0 %v7934_v20, %s6904_s24 }
0x26d5   :  { %v3728_v21 = vpop.permute.xlu0 %3727 }
0x26d6   :  { %5915 = vmatmul.mubr.msk.f32.vlgmr.msra.gmra.mrb[58].mxu1 %vm498_vm2, %v3728_v21 }
0x26d7   :  { %6286 = vmatpush3.bf16.msra.mxu1 %v7673_v32  ;;  %5936 = vmatprep.mubr.msk.f32.mxu1 %vm6901_vm0, %v6902_v1 }
0x26d8   :  { %6287 = vmatprep.subr.bf16.mxu1 %v6900_v0 }
0x26d9   :  { %v7943_v17 = vpop.permute.xlu0 %3652 }
0x26da   :  { %5904 = vmatmul.mubr.msk.f32.vlgmr.msra.gmra.mrb[38].mxu0 %vm498_vm2, %v7943_v17 }
0x26db   :  { %6280 = vmatpush3.bf16.msra.mxu0 %v7678_v25  ;;  %6289 = vmatpush3.bf16.msra.mxu1 %v7696_v10 }
0x26dc   :  { %6281 = vmatprep.subr.bf16.mxu0 %v6900_v0  ;;  %5925 = vmatprep.mubr.msk.f32.mxu0 %vm6901_vm0, %v6902_v1 }
0x26dd   :  { %6296 = vmatprep.subr.bf16.mxu1 %v6900_v0 }
0x26df   :  { %6283 = vmatpush3.bf16.msra.mxu0 %v7699_v53 }
0x26e0   :  { %6290 = vmatprep.subr.bf16.mxu0 %v6900_v0 }
0x27a9   :  { %v3797_v44 = vpop.f32.mrb[58].mxu1 }
0x27aa   :  { %v3798_v24 = vadd.f32 %v7795_v52, %v3797_v44  ;;  %v5916_v22 = vpop.f32.mrb[59].mxu1 }
0x27ac   :  { %3835 = vrot.lane.b32.xlu1 %v3798_v24, %s6903_s7  ;;  %v3827_v50 = vadd.f32 %v3798_v24, %v2808_v5 }
0x27ad   :  { %v3722_v23 = vpop.f32.mrb[38].mxu0 }
0x27ae   :  { %v3723_v19 = vadd.f32 %v7798_v37, %v3722_v23  ;;  %v5905_v26 = vpop.f32.mrb[39].mxu0  ;;  %v5177_v28 = vmul.f32 -1.442695, %v3827_v50 }
0x27b0   :  { %3809 = vrot.lane.b32.xlu1 %v3723_v19, %s6903_s7  ;;  %v3801_v3 = vadd.f32 %v3723_v19, %v2673_v11  ;;  %6543 = vpow2.f32 %v5177_v28 }
0x27b2   :  { %v5176_v38 = vmul.f32 -1.442695, %v3801_v3  ;;  %v2803_v3 = vadd.f32 %v7803_v56, %v7779_v31 }
0x27b4   :  { %6545 = vpow2.f32 %v5176_v38 }
0x27ba   :  { %v6544_v49 = vpop.eup %6543 }
0x27bb   :  { %v3831_v33 = vadd.f32 1.0, %v6544_v49  ;;  %v2678_v49 = vadd.f32 %v7773_v34, %v7806_v14 }
0x27bd   :  { %6547 = vrcp.f32 %v3831_v33 }
0x27be   :  { %v6546_v60 = vpop.eup %6545 }
0x27bf   :  { %v3805_v42 = vadd.f32 1.0, %v6546_v60 }
0x27c1   :  { %6549 = vrcp.f32 %v3805_v42 }
0x27c7   :  { %v6548_v4 = vpop.eup %6547 }
0x27c8   :  { %v3845_v9 = vsub.f32 1.0, %v6548_v4  ;;  %v3851_v63 = vmul.f32 %v6548_v4, %v7929_v16 }
0x27cb   :  { %v6550_v36 = vpop.eup %6549 }
0x27cc   :  { %v3819_v27 = vsub.f32 1.0, %v6550_v36  ;;  %v3825_v44 = vmul.f32 %v6550_v36, %v7934_v20 }
0x281e   :  { %v3836_v6 = vpop.permute.xlu1 %3835 }
0x281f   :  { %v3838_v58 = vmul.f32 %v6548_v4, %v3836_v6 }
0x2821   :  { %3840 = vrot.lane.b32.xlu0 %v3838_v58, %s6903_s7 }
0x2822   :  { %v3810_v62 = vpop.permute.xlu1 %3809 }
0x2823   :  { %v3812_v30 = vmul.f32 %v6550_v36, %v3810_v62 }
0x2825   :  { %3814 = vrot.lane.b32.xlu1 %v3812_v30, %s6903_s7 }
0x2893   :  { %v3841_v29 = vpop.permute.xlu0 %3840 }
0x2894   :  { %v3843_v59 = vadd.f32 %v3841_v29, %v2808_v5 }
0x2896   :  { %6551 = vtanh.f32 %v3843_v59 }
0x2897   :  { %v3815_v2 = vpop.permute.xlu1 %3814 }
0x2898   :  { %v3817_v55 = vadd.f32 %v3815_v2, %v2673_v11 }
0x289a   :  { %6553 = vtanh.f32 %v3817_v55 }
0x28a0   :  { %v6552_v45 = vpop.eup %6551 }
0x28a1   :  { %3847 = vrot.lane.b32.xlu0 %v6552_v45, %s6904_s24 }
0x28a4   :  { %v6554_v47 = vpop.eup %6553 }
0x28a5   :  { %3821 = vrot.lane.b32.xlu1 %v6554_v47, %s6904_s24 }
0x2913   :  { %v3848_v15 = vpop.permute.xlu0 %3847 }
0x2914   :  { %v3850_v12 = vmul.f32 %v3848_v15, %v3845_v9 }
0x2916   :  { %v7968_v18 = vadd.f32 %v3851_v63, %v3850_v12 }
0x2917   :  { %v3822_v21 = vpop.permute.xlu1 %3821 }
0x2918   :  { %v3824_v24 = vmul.f32 %v3822_v21, %v3819_v27  ;;  %3929 = vrot.lane.b32.xlu0 %v7968_v18, %s6904_s24 }
0x291a   :  { %v7973_v22 = vadd.f32 %v3825_v44, %v3824_v24 }
0x291c   :  { %3854 = vrot.lane.b32.xlu0 %v7973_v22, %s6904_s24 }
0x298a   :  { %v3930_v23 = vpop.permute.xlu0 %3929 }
0x298b   :  { %5937 = vmatmul.mubr.msk.f32.vlgmr.msra.gmra.mrb[60].mxu1 %vm498_vm2, %v3930_v23 }
0x298c   :  { %6298 = vmatpush3.bf16.msra.mxu1 %v7673_v32  ;;  %5958 = vmatprep.mubr.msk.f32.mxu1 %vm6901_vm0, %v6902_v1 }
0x298d   :  { %6299 = vmatprep.subr.bf16.mxu1 %v6900_v0 }
0x298e   :  { %v7982_v20 = vpop.permute.xlu0 %3854 }
0x298f   :  { %5926 = vmatmul.mubr.msk.f32.vlgmr.msra.gmra.mrb[40].mxu0 %vm498_vm2, %v7982_v20 }
0x2990   :  { %6292 = vmatpush3.bf16.msra.mxu0 %v7678_v25  ;;  %6301 = vmatpush3.bf16.msra.mxu1 %v7696_v10 }
0x2991   :  { %6293 = vmatprep.subr.bf16.mxu0 %v6900_v0  ;;  %5947 = vmatprep.mubr.msk.f32.mxu0 %vm6901_vm0, %v6902_v1 }
0x2992   :  { %6308 = vmatprep.subr.bf16.mxu1 %v6900_v0 }
0x2994   :  { %6295 = vmatpush3.bf16.msra.mxu0 %v7699_v53 }
0x2995   :  { %6302 = vmatprep.subr.bf16.mxu0 %v6900_v0 }
0x2a5e   :  { %v3999_v19 = vpop.f32.mrb[60].mxu1 }
0x2a5f   :  { %v4000_v26 = vadd.f32 %v7795_v52, %v3999_v19  ;;  %v5938_v5 = vpop.f32.mrb[61].mxu1 }
0x2a61   :  { %4037 = vrot.lane.b32.xlu1 %v4000_v26, %s6903_s7  ;;  %v4029_v38 = vadd.f32 %v4000_v26, %v2803_v3 }
0x2a62   :  { %v3924_v50 = vpop.f32.mrb[40].mxu0 }
0x2a63   :  { %v3925_v11 = vadd.f32 %v7798_v37, %v3924_v50  ;;  %v5927_v28 = vpop.f32.mrb[41].mxu0  ;;  %v5181_v33 = vmul.f32 -1.442695, %v4029_v38 }
0x2a65   :  { %4011 = vrot.lane.b32.xlu1 %v3925_v11, %s6903_s7  ;;  %v4003_v60 = vadd.f32 %v3925_v11, %v2678_v49  ;;  %6555 = vpow2.f32 %v5181_v33 }
0x2a67   :  { %v5180_v42 = vmul.f32 -1.442695, %v4003_v60  ;;  %v2798_v60 = vadd.f32 %v7767_v61, %v7803_v56 }
0x2a69   :  { %6557 = vpow2.f32 %v5180_v42 }
0x2a6f   :  { %v6556_v4 = vpop.eup %6555 }
0x2a70   :  { %v4033_v6 = vadd.f32 1.0, %v6556_v4  ;;  %v2683_v4 = vadd.f32 %v7806_v14, %v7785_v40 }
0x2a72   :  { %6559 = vrcp.f32 %v4033_v6 }
0x2a73   :  { %v6558_v58 = vpop.eup %6557 }
0x2a74   :  { %v4007_v36 = vadd.f32 1.0, %v6558_v58 }
0x2a76   :  { %6561 = vrcp.f32 %v4007_v36 }
0x2a7c   :  { %v6560_v62 = vpop.eup %6559 }
0x2a7d   :  { %v4047_v63 = vsub.f32 1.0, %v6560_v62  ;;  %v4053_v27 = vmul.f32 %v6560_v62, %v7968_v18 }
0x2a80   :  { %v6562_v31 = vpop.eup %6561 }
0x2a81   :  { %v4021_v24 = vsub.f32 1.0, %v6562_v31  ;;  %v4027_v19 = vmul.f32 %v6562_v31, %v7973_v22 }
0x2ad3   :  { %v4038_v30 = vpop.permute.xlu1 %4037 }
0x2ad4   :  { %v4040_v29 = vmul.f32 %v6560_v62, %v4038_v30 }
0x2ad6   :  { %4042 = vrot.lane.b32.xlu0 %v4040_v29, %s6903_s7 }
0x2ad7   :  { %v4012_v59 = vpop.permute.xlu1 %4011 }
0x2ad8   :  { %v4014_v2 = vmul.f32 %v6562_v31, %v4012_v59 }
0x2ada   :  { %4016 = vrot.lane.b32.xlu1 %v4014_v2, %s6903_s7 }
0x2b48   :  { %v4043_v34 = vpop.permute.xlu0 %4042 }
0x2b49   :  { %v4045_v55 = vadd.f32 %v4043_v34, %v2803_v3 }
0x2b4b   :  { %6563 = vtanh.f32 %v4045_v55 }
0x2b4c   :  { %v4017_v45 = vpop.permute.xlu1 %4016 }
0x2b4d   :  { %v4019_v47 = vadd.f32 %v4017_v45, %v2678_v49 }
0x2b4f   :  { %6565 = vtanh.f32 %v4019_v47 }
0x2b55   :  { %v6564_v9 = vpop.eup %6563 }
0x2b56   :  { %4049 = vrot.lane.b32.xlu0 %v6564_v9, %s6904_s24 }
0x2b59   :  { %v6566_v15 = vpop.eup %6565 }
0x2b5a   :  { %4023 = vrot.lane.b32.xlu1 %v6566_v15, %s6904_s24 }
0x2bc8   :  { %v4050_v12 = vpop.permute.xlu0 %4049 }
0x2bc9   :  { %v4052_v21 = vmul.f32 %v4050_v12, %v4047_v63 }
0x2bcb   :  { %v8007_v44 = vadd.f32 %v4053_v27, %v4052_v21 }
0x2bcc   :  { %v4024_v23 = vpop.permute.xlu1 %4023 }
0x2bcd   :  { %v4026_v26 = vmul.f32 %v4024_v23, %v4021_v24  ;;  %4131 = vrot.lane.b32.xlu0 %v8007_v44, %s6904_s24 }
0x2bcf   :  { %v8012_v5 = vadd.f32 %v4027_v19, %v4026_v26 }
0x2bd1   :  { %4056 = vrot.lane.b32.xlu0 %v8012_v5, %s6904_s24 }
0x2c3f   :  { %v4132_v50 = vpop.permute.xlu0 %4131 }
0x2c40   :  { %5959 = vmatmul.mubr.msk.f32.vlgmr.msra.gmra.mrb[62].mxu1 %vm498_vm2, %v4132_v50 }
0x2c41   :  { %6310 = vmatpush3.bf16.msra.mxu1 %v7673_v32  ;;  %5980 = vmatprep.mubr.msk.f32.mxu1 %vm6901_vm0, %v6902_v1 }
0x2c42   :  { %6311 = vmatprep.subr.bf16.mxu1 %v6900_v0 }
0x2c43   :  { %v8021_v22 = vpop.permute.xlu0 %4056 }
0x2c44   :  { %5948 = vmatmul.mubr.msk.f32.vlgmr.msra.gmra.mrb[42].mxu0 %vm498_vm2, %v8021_v22 }
0x2c45   :  { %6304 = vmatpush3.bf16.msra.mxu0 %v7678_v25  ;;  %6313 = vmatpush3.bf16.msra.mxu1 %v7696_v10 }
0x2c46   :  { %6305 = vmatprep.subr.bf16.mxu0 %v6900_v0  ;;  %5969 = vmatprep.mubr.msk.f32.mxu0 %vm6901_vm0, %v6902_v1 }
0x2c47   :  { %6320 = vmatprep.subr.bf16.mxu1 %v6900_v0 }
0x2c49   :  { %6307 = vmatpush3.bf16.msra.mxu0 %v7699_v53 }
0x2c4a   :  { %6314 = vmatprep.subr.bf16.mxu0 %v6900_v0 }
0x2d13   :  { %v4201_v11 = vpop.f32.mrb[62].mxu1 }
0x2d14   :  { %v4202_v28 = vadd.f32 %v7795_v52, %v4201_v11  ;;  %v5960_v3 = vpop.f32.mrb[63].mxu1 }
0x2d16   :  { %4239 = vrot.lane.b32.xlu1 %v4202_v28, %s6903_s7  ;;  %v4231_v42 = vadd.f32 %v4202_v28, %v2798_v60 }
0x2d17   :  { %v4126_v38 = vpop.f32.mrb[42].mxu0 }
0x2d18   :  { %v4127_v49 = vadd.f32 %v7798_v37, %v4126_v38  ;;  %v5949_v33 = vpop.f32.mrb[43].mxu0  ;;  %v5185_v6 = vmul.f32 -1.442695, %v4231_v42 }
0x2d1a   :  { %4213 = vrot.lane.b32.xlu1 %v4127_v49, %s6903_s7  ;;  %v4205_v58 = vadd.f32 %v4127_v49, %v2683_v4  ;;  %6567 = vpow2.f32 %v5185_v6 }
0x2d1c   :  { %v5184_v36 = vmul.f32 -1.442695, %v4205_v58  ;;  %v2793_v58 = vadd.f32 %v7803_v56, %v7771_v54 }
0x2d1e   :  { %6569 = vpow2.f32 %v5184_v36 }
0x2d24   :  { %v6568_v62 = vpop.eup %6567 }
0x2d25   :  { %v4235_v30 = vadd.f32 1.0, %v6568_v62  ;;  %v2688_v62 = vadd.f32 %v7781_v35, %v7806_v14 }
0x2d27   :  { %6571 = vrcp.f32 %v4235_v30 }
0x2d28   :  { %v6570_v29 = vpop.eup %6569 }
0x2d29   :  { %v4209_v31 = vadd.f32 1.0, %v6570_v29 }
0x2d2b   :  { %6573 = vrcp.f32 %v4209_v31 }
0x2d31   :  { %v6572_v59 = vpop.eup %6571 }
0x2d32   :  { %v4249_v27 = vsub.f32 1.0, %v6572_v59  ;;  %v4255_v24 = vmul.f32 %v6572_v59, %v8007_v44 }
0x2d35   :  { %v6574_v61 = vpop.eup %6573 }
0x2d36   :  { %v4223_v26 = vsub.f32 1.0, %v6574_v61  ;;  %v4229_v11 = vmul.f32 %v6574_v61, %v8012_v5 }
0x2d88   :  { %v4240_v2 = vpop.permute.xlu1 %4239 }
0x2d89   :  { %v4242_v34 = vmul.f32 %v6572_v59, %v4240_v2 }
0x2d8b   :  { %4244 = vrot.lane.b32.xlu0 %v4242_v34, %s6903_s7 }
0x2d8c   :  { %v4214_v55 = vpop.permute.xlu1 %4213 }
0x2d8d   :  { %v4216_v45 = vmul.f32 %v6574_v61, %v4214_v55 }
0x2d8f   :  { %4218 = vrot.lane.b32.xlu1 %v4216_v45, %s6903_s7 }
0x2dfd   :  { %v4245_v40 = vpop.permute.xlu0 %4244 }
0x2dfe   :  { %v4247_v47 = vadd.f32 %v4245_v40, %v2798_v60 }
0x2e00   :  { %6575 = vtanh.f32 %v4247_v47 }
0x2e01   :  { %v4219_v9 = vpop.permute.xlu1 %4218 }
0x2e02   :  { %v4221_v15 = vadd.f32 %v4219_v9, %v2683_v4 }
0x2e04   :  { %6577 = vtanh.f32 %v4221_v15 }
0x2e0a   :  { %v6576_v63 = vpop.eup %6575 }
0x2e0b   :  { %4251 = vrot.lane.b32.xlu0 %v6576_v63, %s6904_s24 }
0x2e0e   :  { %v6578_v12 = vpop.eup %6577 }
0x2e0f   :  { %4225 = vrot.lane.b32.xlu1 %v6578_v12, %s6904_s24 }
0x2e7d   :  { %v4252_v21 = vpop.permute.xlu0 %4251 }
0x2e7e   :  { %v4254_v23 = vmul.f32 %v4252_v21, %v4249_v27 }
0x2e80   :  { %v8046_v19 = vadd.f32 %v4255_v24, %v4254_v23 }
0x2e81   :  { %v4226_v50 = vpop.permute.xlu1 %4225 }
0x2e82   :  { %v4228_v28 = vmul.f32 %v4226_v50, %v4223_v26  ;;  %4333 = vrot.lane.b32.xlu0 %v8046_v19, %s6904_s24 }
0x2e84   :  { %v8051_v3 = vadd.f32 %v4229_v11, %v4228_v28 }
0x2e86   :  { %4258 = vrot.lane.b32.xlu0 %v8051_v3, %s6904_s24 }
0x2ef4   :  { %v4334_v38 = vpop.permute.xlu0 %4333 }
0x2ef5   :  { %5981 = vmatmul.mubr.msk.f32.vlgmr.msra.gmra.mrb[64].mxu1 %vm498_vm2, %v4334_v38 }
0x2ef6   :  { %6322 = vmatpush3.bf16.msra.mxu1 %v7673_v32  ;;  %6002 = vmatprep.mubr.msk.f32.mxu1 %vm6901_vm0, %v6902_v1 }
0x2ef7   :  { %6323 = vmatprep.subr.bf16.mxu1 %v6900_v0 }
0x2ef8   :  { %v8060_v5 = vpop.permute.xlu0 %4258 }
0x2ef9   :  { %5970 = vmatmul.mubr.msk.f32.vlgmr.msra.gmra.mrb[44].mxu0 %vm498_vm2, %v8060_v5 }
0x2efa   :  { %6316 = vmatpush3.bf16.msra.mxu0 %v7678_v25  ;;  %6325 = vmatpush3.bf16.msra.mxu1 %v7696_v10 }
0x2efb   :  { %6317 = vmatprep.subr.bf16.mxu0 %v6900_v0  ;;  %5991 = vmatprep.mubr.msk.f32.mxu0 %vm6901_vm0, %v6902_v1 }
0x2efc   :  { %6332 = vmatprep.subr.bf16.mxu1 %v6900_v0 }
0x2efe   :  { %6319 = vmatpush3.bf16.msra.mxu0 %v7699_v53 }
0x2eff   :  { %6326 = vmatprep.subr.bf16.mxu0 %v6900_v0 }
0x2fc8   :  { %v4403_v49 = vpop.f32.mrb[64].mxu1 }
0x2fc9   :  { %v4404_v33 = vadd.f32 %v7795_v52, %v4403_v49  ;;  %v5982_v60 = vpop.f32.mrb[65].mxu1  ;;  %v6617_v49 = vld [vmem:[#allocation19] ss:$0 sm:$0xff] }
0x2fcb   :  { %4441 = vrot.lane.b32.xlu1 %v4404_v33, %s6903_s7  ;;  %v4433_v36 = vadd.f32 %v4404_v33, %v2793_v58 }
0x2fcc   :  { %v4328_v42 = vpop.f32.mrb[44].mxu0 }
0x2fcd   :  { %v4329_v4 = vadd.f32 %v7798_v37, %v4328_v42  ;;  %v5971_v6 = vpop.f32.mrb[45].mxu0  ;;  %v5189_v30 = vmul.f32 -1.442695, %v4433_v36  ;;  %v6620_v36 = vld [vmem:[#allocation13] ss:$0 sm:$0xff] }
0x2fcf   :  { %4415 = vrot.lane.b32.xlu1 %v4329_v4, %s6903_s7  ;;  %v4407_v29 = vadd.f32 %v4329_v4, %v2688_v62  ;;  %6579 = vpow2.f32 %v5189_v30  ;;  %v6618_v4 = vld [vmem:[#allocation16] ss:$0 sm:$0xff] }
0x2fd1   :  { %v5188_v52 = vmul.f32 -1.442695, %v4407_v29 }
0x2fd3   :  { %6581 = vpow2.f32 %v5188_v52 }
0x2fd9   :  { %v6580_v31 = vpop.eup %6579 }
0x2fda   :  { %v4437_v59 = vadd.f32 1.0, %v6580_v31 }
0x2fdc   :  { %6583 = vrcp.f32 %v4437_v59 }
0x2fdd   :  { %v6582_v2 = vpop.eup %6581 }
0x2fde   :  { %v4411_v37 = vadd.f32 1.0, %v6582_v2 }
0x2fe0   :  { %6585 = vrcp.f32 %v4411_v37 }
0x2fe6   :  { %v6584_v34 = vpop.eup %6583 }
0x2fe7   :  { %v4451_v63 = vsub.f32 1.0, %v6584_v34  ;;  %v4457_v27 = vmul.f32 %v6584_v34, %v8046_v19 }
0x2fea   :  { %v6586_v54 = vpop.eup %6585 }
0x2feb   :  { %v4425_v23 = vsub.f32 1.0, %v6586_v54  ;;  %v4431_v50 = vmul.f32 %v6586_v54, %v8051_v3 }
0x303d   :  { %v4442_v61 = vpop.permute.xlu1 %4441 }
0x303e   :  { %v4444_v55 = vmul.f32 %v6584_v34, %v4442_v61 }
0x3040   :  { %4446 = vrot.lane.b32.xlu0 %v4444_v55, %s6903_s7 }
0x3041   :  { %v4416_v56 = vpop.permute.xlu1 %4415 }
0x3042   :  { %v4418_v45 = vmul.f32 %v6586_v54, %v4416_v56 }
0x3044   :  { %4420 = vrot.lane.b32.xlu1 %v4418_v45, %s6903_s7 }
0x30b2   :  { %v4447_v35 = vpop.permute.xlu0 %4446 }
0x30b3   :  { %v4449_v14 = vadd.f32 %v4447_v35, %v2793_v58 }
0x30b5   :  { %6587 = vtanh.f32 %v4449_v14 }
0x30b6   :  { %v4421_v40 = vpop.permute.xlu1 %4420 }
0x30b7   :  { %v4423_v47 = vadd.f32 %v4421_v40, %v2688_v62 }
0x30b9   :  { %6589 = vtanh.f32 %v4423_v47 }
0x30bf   :  { %v6588_v9 = vpop.eup %6587 }
0x30c0   :  { %4453 = vrot.lane.b32.xlu0 %v6588_v9, %s6904_s24 }
0x30c3   :  { %v6590_v15 = vpop.eup %6589 }
0x30c4   :  { %4427 = vrot.lane.b32.xlu1 %v6590_v15, %s6904_s24 }
0x3132   :  { %v4454_v12 = vpop.permute.xlu0 %4453 }
0x3133   :  { %v4456_v21 = vmul.f32 %v4454_v12, %v4451_v63 }
0x3135   :  { %v8085_v24 = vadd.f32 %v4457_v27, %v4456_v21 }
0x3136   :  { %v4428_v26 = vpop.permute.xlu1 %4427 }
0x3137   :  { %v4430_v11 = vmul.f32 %v4428_v26, %v4425_v23  ;;  %4535 = vrot.lane.b32.xlu0 %v8085_v24, %s6904_s24 }
0x3139   :  { %v8090_v28 = vadd.f32 %v4431_v50, %v4430_v11 }
0x313b   :  { %4460 = vrot.lane.b32.xlu0 %v8090_v28, %s6904_s24 }
0x31a9   :  { %v4536_v38 = vpop.permute.xlu0 %4535 }
0x31aa   :  { %6003 = vmatmul.mubr.msk.f32.vlgmr.msra.gmra.mrb[66].mxu1 %vm498_vm2, %v4536_v38 }
0x31ab   :  { %6334 = vmatpush3.bf16.msra.mxu1 %v7673_v32  ;;  %6024 = vmatprep.mubr.msk.f32.mxu1 %vm6901_vm0, %v6902_v1 }
0x31ac   :  { %6335 = vmatprep.subr.bf16.mxu1 %v6900_v0 }
0x31ad   :  { %v8099_v3 = vpop.permute.xlu0 %4460 }
0x31ae   :  { %5992 = vmatmul.mubr.msk.f32.vlgmr.msra.gmra.mrb[46].mxu0 %vm498_vm2, %v8099_v3 }
0x31af   :  { %6328 = vmatpush3.bf16.msra.mxu0 %v7678_v25  ;;  %6337 = vmatpush3.bf16.msra.mxu1 %v7696_v10  ;;  %v6619_v25 = vld [vmem:[#allocation17] ss:$0 sm:$0xff] }
0x31b0   :  { %6329 = vmatprep.subr.bf16.mxu0 %v6900_v0  ;;  %6013 = vmatprep.mubr.msk.f32.mxu0 %vm6901_vm0, %v6902_v1  ;;  %v2788_v0 = vadd.f32 %v6619_v25, %v7761_v7  ;;  %v2693_v1 = vadd.f32 %v6620_v36, %v7791_v48 }
0x31b3   :  { %6331 = vmatpush3.bf16.msra.mxu0 %v7699_v53 }
0x327d   :  { %v4605_v32 = vpop.f32.mrb[66].mxu1 }
0x327e   :  { %v4606_v33 = vadd.f32 %v6617_v49, %v4605_v32  ;;  %v6004_v60 = vpop.f32.mrb[67].mxu1 }
0x3280   :  { %4643 = vrot.lane.b32.xlu1 %v4606_v33, %s6903_s7  ;;  %v4635_v10 = vadd.f32 %v4606_v33, %v2788_v0 }
0x3281   :  { %v4530_v42 = vpop.f32.mrb[46].mxu0 }
0x3282   :  { %v4531_v6 = vadd.f32 %v6618_v4, %v4530_v42  ;;  %v5993_v58 = vpop.f32.mrb[47].mxu0  ;;  %v5193_v53 = vmul.f32 -1.442695, %v4635_v10 }
0x3284   :  { %4617 = vrot.lane.b32.xlu1 %v4531_v6, %s6903_s7  ;;  %v4609_v62 = vadd.f32 %v4531_v6, %v2693_v1  ;;  %6591 = vpow2.f32 %v5193_v53  ;;  %v2783_v6 = vadd.f32 %v6619_v25, %v7763_v39 }
0x3286   :  { %v5192_v30 = vmul.f32 -1.442695, %v4609_v62 }
0x3288   :  { %6593 = vpow2.f32 %v5192_v30 }
0x328e   :  { %v6592_v29 = vpop.eup %6591 }
0x328f   :  { %v4639_v52 = vadd.f32 1.0, %v6592_v29 }
0x3291   :  { %6595 = vrcp.f32 %v4639_v52 }
0x3292   :  { %v6594_v31 = vpop.eup %6593 }
0x3293   :  { %v4613_v59 = vadd.f32 1.0, %v6594_v31 }
0x3295   :  { %6597 = vrcp.f32 %v4613_v59 }
0x329b   :  { %v6596_v2 = vpop.eup %6595 }
0x329c   :  { %v4653_v40 = vsub.f32 1.0, %v6596_v2  ;;  %v4659_v9 = vmul.f32 %v6596_v2, %v8085_v24 }
0x329f   :  { %v6598_v7 = vpop.eup %6597 }
0x32a0   :  { %v4627_v12 = vsub.f32 1.0, %v6598_v7  ;;  %v4633_v21 = vmul.f32 %v6598_v7, %v8090_v28 }
0x32f2   :  { %v4644_v37 = vpop.permute.xlu1 %4643 }
0x32f3   :  { %v4646_v34 = vmul.f32 %v6596_v2, %v4644_v37  ;;  %v4888_v2 = vld [vmem:[%s8245_s17 + $0x10] sm:$0xff] }
0x32f5   :  { %4648 = vrot.lane.b32.xlu0 %v4646_v34, %s6903_s7  ;;  %v4889_v34 = vld [vmem:[%s8245_s17 + $0x18] sm:$0xff] }
0x32f6   :  { %v4618_v61 = vpop.permute.xlu1 %4617 }
0x32f7   :  { %v4620_v55 = vmul.f32 %v6598_v7, %v4618_v61  ;;  %v6342_v7 = vpack.c.bf16 %v4889_v34, %v4888_v2  ;;  %v4890_v61 = vld [vmem:[%s8245_s17 + $0x20] sm:$0xff] }
0x32f9   :  { %4622 = vrot.lane.b32.xlu1 %v4620_v55, %s6903_s7  ;;  %v4891_v55 = vld [vmem:[%s8245_s17 + $0x28] sm:$0xff] }
0x3367   :  { %v4649_v48 = vpop.permute.xlu0 %4648 }
0x3368   :  { %v4651_v54 = vadd.f32 %v4649_v48, %v2788_v0  ;;  %v2698_v0 = vadd.f32 %v6620_v36, %v7789_v51  ;;  %v4886_v51 = vld [vmem:[%s8245_s17] sm:$0xff]  ;;  %v4887_v36 = vld [vmem:[%s8245_s17 + $0x8] sm:$0xff]  ;;  %v6346_v48 = vpack.c.bf16 %v4891_v55, %v4890_v61 }
0x3369   :  { %v6338_v37 = vpack.c.bf16 %v4887_v36, %v4886_v51 }
0x336a   :  { %6599 = vtanh.f32 %v4651_v54 }
0x336b   :  { %v4623_v56 = vpop.permute.xlu1 %4622  ;;  %6339 = vmatprep.subr.bf16.mxu0 %v6338_v37 }
0x336c   :  { %v4625_v45 = vadd.f32 %v4623_v56, %v2693_v1 }
0x336e   :  { %6601 = vtanh.f32 %v4625_v45  ;;  %v4892_v45 = vld [vmem:[%s8245_s17 + $0x30] sm:$0xff] }
0x3374   :  { %v6600_v35 = vpop.eup %6599 }
0x3375   :  { %4655 = vrot.lane.b32.xlu0 %v6600_v35, %s6904_s24  ;;  %v4893_v35 = vld [vmem:[%s8245_s17 + $0x38] sm:$0xff] }
0x3378   :  { %v6602_v14 = vpop.eup %6601 }
0x3379   :  { %4629 = vrot.lane.b32.xlu1 %v6602_v14, %s6904_s24  ;;  %v6350_v14 = vpack.c.bf16 %v4893_v35, %v4892_v45 }
0x33e7   :  { %v4656_v47 = vpop.permute.xlu0 %4655 }
0x33e8   :  { %v4658_v15 = vmul.f32 %v4656_v47, %v4653_v40 }
0x33ea   :  { %v8118_v63 = vadd.f32 %v4659_v9, %v4658_v15 }
0x33eb   :  { %v4630_v27 = vpop.permute.xlu1 %4629 }
0x33ec   :  { %v4632_v23 = vmul.f32 %v4630_v27, %v4627_v12  ;;  %4737 = vrot.lane.b32.xlu0 %v8118_v63, %s6904_s24 }
0x33ee   :  { %v8123_v26 = vadd.f32 %v4633_v21, %v4632_v23 }
0x33f0   :  { %4662 = vrot.lane.b32.xlu0 %v8123_v26, %s6904_s24 }
0x345e   :  { %v4738_v50 = vpop.permute.xlu0 %4737 }
0x345f   :  { %6025 = vmatmul.mubr.msk.f32.vlgmr.msra.gmra.mrb[68].mxu1 %vm498_vm2, %v4738_v50 }
0x3462   :  { %v8128_v11 = vpop.permute.xlu0 %4662 }
0x3463   :  { %6014 = vmatmul.mubr.msk.f32.vlgmr.msra.gmra.mrb[48].mxu0 %vm498_vm2, %v8128_v11 }
0x3464   :  { %6341 = vmatpush3.bf16.msra.mxu0 %v6338_v37 }
0x3465   :  { %6343 = vmatprep.subr.bf16.mxu0 %v6342_v7 }
0x3468   :  { %6345 = vmatpush3.bf16.msra.mxu0 %v6342_v7 }
0x3469   :  { %6347 = vmatprep.subr.bf16.mxu0 %v6346_v48 }
0x346c   :  { %6349 = vmatpush3.bf16.msra.mxu0 %v6346_v48 }
0x346d   :  { %6351 = vmatprep.subr.bf16.mxu0 %v6350_v14 }
0x3470   :  { %6353 = vmatpush3.bf16.msra.mxu0 %v6350_v14 }
0x3532   :  { %v4807_v38 = vpop.f32.mrb[68].mxu1 }
0x3533   :  { %v4808_v32 = vadd.f32 %v6617_v49, %v4807_v38  ;;  %v6026_v28 = vpop.f32.mrb[69].mxu1 }
0x3535   :  { %4845 = vrot.lane.b32.xlu1 %v4808_v32, %s6903_s7  ;;  %v4837_v58 = vadd.f32 %v4808_v32, %v2783_v6 }
0x3536   :  { %v4732_v33 = vpop.f32.mrb[48].mxu0 }
0x3537   :  { %v4733_v60 = vadd.f32 %v6618_v4, %v4732_v33  ;;  %v6015_v42 = vpop.f32.mrb[49].mxu0  ;;  %v5197_v10 = vmul.f32 -1.442695, %v4837_v58  ;;  %v4868_v58 = vsel %vm498_vm2, %v7904_v13, %v8085_v24  ;;  %v4874_v13 = vsel %vm498_vm2, %v8021_v22, %v7968_v18 }
0x3538   :  { %v4866_v42 = vsel %vm498_vm2, %v7865_v41, %v8118_v63  ;;  %v4872_v41 = vsel %vm498_vm2, %v7982_v20, %v8007_v44  ;;  %v4876_v24 = vsel %vm498_vm2, %v8060_v5, %v7929_v16  ;;  %v4880_v20 = vsel %vm498_vm2, %v8128_v11, %v7851_v46  ;;  %v201_v46 = vld [vmem:[%s8259_s2 + $0x28] sm:$0xff] }
0x3539   :  { %4819 = vrot.lane.b32.xlu1 %v4733_v60, %s6903_s7  ;;  %v4811_v1 = vadd.f32 %v4733_v60, %v2698_v0  ;;  %6603 = vpow2.f32 %v5197_v10 }
0x353b   :  { %v5196_v53 = vmul.f32 -1.442695, %v4811_v1 }
0x353d   :  { %6605 = vpow2.f32 %v5196_v53 }
0x3543   :  { %v6604_v62 = vpop.eup %6603 }
0x3544   :  { %v4841_v49 = vadd.f32 1.0, %v6604_v62 }
0x3546   :  { %6607 = vrcp.f32 %v4841_v49 }
0x3547   :  { %v6606_v30 = vpop.eup %6605 }
0x3548   :  { %v4815_v29 = vadd.f32 1.0, %v6606_v30 }
0x354a   :  { %6609 = vrcp.f32 %v4815_v29 }
0x3550   :  { %v6608_v4 = vpop.eup %6607 }
0x3551   :  { %v4855_v12 = vsub.f32 1.0, %v6608_v4  ;;  %v4861_v21 = vmul.f32 %v6608_v4, %v8118_v63 }
0x3554   :  { %v6610_v39 = vpop.eup %6609 }
0x3555   :  { %v4829_v38 = vsub.f32 1.0, %v6610_v39  ;;  %v4835_v28 = vmul.f32 %v6610_v39, %v8123_v26 }
0x35a7   :  { %v4846_v52 = vpop.permute.xlu1 %4845 }
0x35a8   :  { %v4848_v31 = vmul.f32 %v6608_v4, %v4846_v52 }
0x35aa   :  { %4850 = vrot.lane.b32.xlu0 %v4848_v31, %s6903_s7 }
0x35ab   :  { %v4820_v25 = vpop.permute.xlu1 %4819 }
0x35ac   :  { %v4822_v59 = vmul.f32 %v6610_v39, %v4820_v25 }
0x35ae   :  { %4824 = vrot.lane.b32.xlu1 %v4822_v59, %s6903_s7 }
0x361c   :  { %v4851_v54 = vpop.permute.xlu0 %4850 }
0x361d   :  { %v4853_v56 = vadd.f32 %v4851_v54, %v2783_v6 }
0x361f   :  { %6611 = vtanh.f32 %v4853_v56 }
0x3620   :  { %v4825_v40 = vpop.permute.xlu1 %4824 }
0x3621   :  { %v4827_v47 = vadd.f32 %v4825_v40, %v2698_v0 }
0x3623   :  { %6613 = vtanh.f32 %v4827_v47 }
0x3629   :  { %v6612_v9 = vpop.eup %6611 }
0x362a   :  { %4857 = vrot.lane.b32.xlu0 %v6612_v9, %s6904_s24 }
0x362d   :  { %v6614_v15 = vpop.eup %6613 }
0x362e   :  { %4831 = vrot.lane.b32.xlu0 %v6614_v15, %s6904_s24 }
0x369c   :  { %v4858_v27 = vpop.permute.xlu0 %4857 }
0x369d   :  { %v4860_v23 = vmul.f32 %v4858_v27, %v4855_v12 }
0x369f   :  { %v4862_v50 = vadd.f32 %v4861_v21, %v4860_v23 }
0x36a0   :  { %v4832_v32 = vpop.permute.xlu0 %4831 }
0x36a1   :  { %v4834_v33 = vmul.f32 %v4832_v32, %v4829_v38  ;;  %v4864_v60 = vsel %vm498_vm2, %v7826_v43, %v4862_v50  ;;  %v4870_v43 = vsel %vm498_vm2, %v7943_v17, %v8046_v19  ;;  %v4878_v17 = vsel %vm498_vm2, %v8099_v3, %v7890_v8  ;;  %v5198_v8 = vld [vmem:[%s8246_s18] ss:$0 sm:$0xff] }
0x36a2   :  { %6043 = vmatprep.mubr.msk.f32.mxu0 %vm2555_vm3, %v4864_v60 }
0x36a3   :  { %v4836_v6 = vadd.f32 %v4835_v28, %v4834_v33  ;;  %6044 = vmatmul.mubr.msk.f32.vlgmr.msra.gmra.mrb[50].mxu0 %vm2555_vm3, %v4866_v42 }
0x36a4   :  { %6046 = vmatprep.mubr.msk.f32.mxu0 %vm2555_vm3, %v4868_v58 }
0x36a5   :  { %4882 = vrot.lane.b32.xlu1 %v4836_v6, %s6904_s24 }
0x36a7   :  { %6047 = vmatmul.mubr.msk.f32.gmra.mrb[52].mxu0 %vm2555_vm3, %v4870_v43 }
0x36a8   :  { %6049 = vmatprep.mubr.msk.f32.mxu0 %vm2555_vm3, %v4872_v41 }
0x36ab   :  { %6050 = vmatmul.mubr.msk.f32.gmra.mrb[54].mxu0 %vm2555_vm3, %v4874_v13 }
0x36ac   :  { %6052 = vmatprep.mubr.msk.f32.mxu0 %vm2555_vm3, %v4876_v24 }
0x36af   :  { %6053 = vmatmul.mubr.msk.f32.gmra.mrb[56].mxu0 %vm2555_vm3, %v4878_v17 }
0x36b0   :  { %6055 = vmatprep.mubr.msk.f32.mxu0 %vm2555_vm3, %v4880_v20 }
0x3717   :  { %v4883_v18 = vpop.permute.xlu1 %4882 }
0x3718   :  { %v4885_v16 = vsel %vm498_vm2, %v4883_v18, %v7813_v57  ;;  %v200_v57 = vld [vmem:[%s8259_s2 + $0x20] sm:$0xff] }
0x3719   :  { %6056 = vmatmul.mubr.msk.f32.gmra.mrb[58].mxu0 %vm2555_vm3, %v4885_v16 }
0x3776   :  { %v6045_v44 = vpop.f32.mrb[50].mxu0 }
0x3777   :  { %v4997_v22 = vpop.f32.mrb[51].mxu0 }
0x377a   :  { %v6048_v19 = vpop.f32.mrb[52].mxu0 }
0x377b   :  { %v5005_v5 = vpop.f32.mrb[53].mxu0 }
0x377e   :  { %v6051_v3 = vpop.f32.mrb[54].mxu0 }
0x377f   :  { %v5019_v63 = vadd.f32 %v6051_v3, %v5198_v8  ;;  %v5013_v26 = vpop.f32.mrb[55].mxu0 }
0x3780   :  { %v5014_v11 = vadd.f32 %v5198_v8, %v5013_v26 }
0x3781   :  { %v5039_v0 = vsub.f32 %v5019_v63, %v201_v46 }
0x3782   :  { %v5038_v10 = vsub.f32 %v5014_v11, %v200_v57  ;;  %v6054_v1 = vpop.f32.mrb[56].mxu0 }
0x3783   :  { %v5041_v53 = vmul.f32 %v5039_v0, %v5039_v0  ;;  %v5023_v62 = vpop.f32.mrb[57].mxu0 }
0x3784   :  { %v5040_v49 = vmul.f32 %v5038_v10, %v5038_v10 }
0x3785   :  { %v5043_v30 = vsel %vm215_vm1, %v5041_v53, 0.0 }
0x3786   :  { %v5042_v29 = vsel %vm215_vm1, %v5040_v49, 0.0 }
0x3787   :  { %v5044_v4 = vadd.f32 %v5043_v30, %v5042_v29 }
0x3789   :  { %5045 = vadd.xlane.f32.xlu0 %v5044_v4 }
0x37ec   :  { %v6057_v52 = vpop.f32.mrb[58].mxu0 }
0x37ed   :  { %v5031_v31 = vpop.f32.mrb[59].mxu0 }
0x3816   :  { %v5046_v39 = vpop.xlane.xlu0 %5045 }
0x3817   :  { %v5047_v25 = vrot.slane %v5046_v39, 4 }
0x3819   :  { %v5048_v59 = vadd.f32 %v5047_v25, %v5046_v39 }
0x381b   :  { %v5049_v51 = vrot.slane %v5048_v59, 2 }
0x381d   :  { %v5050_v36 = vadd.f32 %v5049_v51, %v5048_v59 }
0x381f   :  { %v5051_v2 = vrot.slane %v5050_v36, 1 }
0x3821   :  { %v5052_v37 = vadd.f32 %v5051_v2, %v5050_v36 }
0x3823   :  { %6354 = vpush %v5052_v37 }
0x3854   :  { %s6355_s18 = spop %6354 }
0x3855   :  { %s5056_s2 = smul.f32 0.00078125, %s6355_s18 }
0x3857   :  { %5058 = sst [smem:[#allocation20]] %s5056_s2 }
0x3858   :  { %6872 = shalt.err (!%p6869_p6)
}
0x3859   :  { %s6905_s5 = smov [#allocation20]  }
0x385a   :  { %5066 = dma.smem_to_hbm %s6905_s5, 16, %s8247_s19, [#allocation4]  }
0x385b   :  { %6885 = dma.done.wait [#allocation4], 16  }
0x385c   :  { %6886 = vsyncadd [#allocation4], 4294967280 }
0x385d   :  { %5070 = sfence }
0x385e   :  { %5071 = vsyncpa [#allocation3], 1 }
0x385f   :  { %5072 = vsyncpa [#allocation6], 1 }
0x3860   :  { %5073 = vsyncpa [#allocation9], 1 }
0x3861   :  { %5074 = vsyncpa [#allocation12], 1 }
0x3862   :  { %5075 = vsyncpa [#allocation15], 1 }
0x3863   :  { %5076 = vsyncpa [#allocation18], 1 }
0x3864   :  { %5077 = vsyncpa [#allocation4], 1 }

</bundles_post_ra>
